<compile_context>
chip_gen: v7x
topology: tpu7x:2x2x1
jax: 0.10.0
libtpu: 0.0.40
codegen_flags: <defaults>
</compile_context>

<pallas_src>
import jax
import jax.numpy as jnp
from jax import lax
from jax.experimental import pallas as pl
from jax.experimental.pallas import tpu as pltpu


# ------------------------------- helpers ------------------------------------ #

def _round_up(x, m):
    return ((x + m - 1) // m) * m


def _zero_border(ref):
    """Zero the 1-pixel spatial halo of a (tb, H+2, W+2, C) padded scratch buffer."""
    tb, hp2, wp2, c = ref.shape
    row = jnp.zeros((tb, 1, wp2, c), ref.dtype)
    col = jnp.zeros((tb, hp2, 1, c), ref.dtype)
    ref[:, pl.ds(0, 1), :, :] = row
    ref[:, pl.ds(hp2 - 1, 1), :, :] = row
    ref[:, :, pl.ds(0, 1), :] = col
    ref[:, :, pl.ds(wp2 - 1, 1), :] = col


# ------------------------------- Pallas kernel ------------------------------ #

def _condition_net_kernel(x_ref, w1_ref, b1_ref, w2_ref, b2_ref,
                          w3_ref, b3_ref, w4_ref, b4_ref,
                          o_ref,
                          p1, p2, p3, p4, im1, im2, im3, im4, pool_s):
    # x_ref : (tb, H, W, C0p) f32        input block (tb tasks)
    # wN_ref: (9*Cin, Cout)   bf16       row index = (kh*3+kw)*Cin + c
    # bN_ref: (1, Cout)       f32
    # o_ref : (tb, 1, 128)    f32
    # p1..p4: zero-halo padded NHWC feature buffers (f32)
    # im1..4: bf16 im2col buffers, one per conv
    # pool_s: staging buffer for the 2x2 average pool (f32)
    tb, h, w, _ = x_ref.shape
    hh, wh = h // 2, w // 2
    c1 = w1_ref.shape[1]
    c2 = w2_ref.shape[1]
    c3 = w3_ref.shape[1]
    c4 = w4_ref.shape[1]

    # Only the halo must stay zero; the interior is fully rewritten each step.
    for p in (p1, p2, p3, p4):
        _zero_border(p)

    def conv3x3_relu(pad_ref, im_ref, w_ref, b_ref, hgt, wid):
        """3x3 'same' conv: bf16 im2col (M, 9*cin) + ONE MXU matmul, bias+ReLU in f32."""
        cin = pad_ref.shape[3]
        m = tb * hgt * wid
        for kh in range(3):
            for kw in range(3):
                tap = kh * 3 + kw
                patch = pad_ref[:, pl.ds(kh, hgt), pl.ds(kw, wid), :]
                im_ref[:, pl.ds(tap * cin, cin)] = (
                    patch.reshape(m, cin).astype(jnp.bfloat16))
        acc = jnp.dot(im_ref[...], w_ref[...],
                      preferred_element_type=jnp.float32)        # (m, cout) f32
        return jnp.maximum(acc + b_ref[...], 0.0)

    # ---- conv1 + ReLU ------------------------------------------------------
    p1[:, pl.ds(1, h), pl.ds(1, w), :] = x_ref[...]
    y1 = conv3x3_relu(p1, im1, w1_ref, b1_ref, h, w)              # (tb*h*w, c1)

    # ---- conv2 + ReLU ------------------------------------------------------
    p2[:, pl.ds(1, h), pl.ds(1, w), :] = y1.reshape(tb, h, w, c1)
    y2 = conv3x3_relu(p2, im2, w2_ref, b2_ref, h, w)              # (tb*h*w, c2)

    # ---- AvgPool2d(2,2): one staging write + 4 strided quadrant reads -------
    # pool_s[a, j, x, c] = y2[t, y, x, c] with a = t*hh + y//2, j = y % 2.
    pool_s[...] = y2.reshape(tb * hh, 2, w, c2)
    q00 = pool_s[:, pl.ds(0, 1), pl.ds(0, wh, stride=2), :]
    q01 = pool_s[:, pl.ds(0, 1), pl.ds(1, wh, stride=2), :]
    q10 = pool_s[:, pl.ds(1, 1), pl.ds(0, wh, stride=2), :]
    q11 = pool_s[:, pl.ds(1, 1), pl.ds(1, wh, stride=2), :]
    pooled = ((q00 + q01) + (q10 + q11)) * 0.25                   # (tb*hh, 1, wh, c2)

    # ---- conv3 + ReLU ------------------------------------------------------
    p3[:, pl.ds(1, hh), pl.ds(1, wh), :] = pooled.reshape(tb, hh, wh, c2)
    y3 = conv3x3_relu(p3, im3, w3_ref, b3_ref, hh, wh)            # (tb*hh*wh, c3)

    # ---- conv4 + ReLU ------------------------------------------------------
    p4[:, pl.ds(1, hh), pl.ds(1, wh), :] = y3.reshape(tb, hh, wh, c3)
    y4 = conv3x3_relu(p4, im4, w4_ref, b4_ref, hh, wh)            # (tb*hh*wh, c4)

    # ---- global average pool (lane-dense (tb, 1, 128) output block) ---------
    o_ref[...] = jnp.mean(y4.reshape(tb, hh * wh, c4), axis=1, keepdims=True)


# ------------------------------ JAX-side wrapper ---------------------------- #

def _prep_w(w, cin_pad=None):
    """PyTorch conv weight (Cout, Cin, 3, 3) -> (9*Cin, Cout) bf16, row=(kh*3+kw)*Cin+c."""
    cout, cin = int(w.shape[0]), int(w.shape[1])
    wt = jnp.transpose(w, (2, 3, 1, 0))                          # (3, 3, cin, cout)
    if cin_pad is not None and cin_pad > cin:
        wt = jnp.pad(wt, ((0, 0), (0, 0), (0, cin_pad - cin), (0, 0)))
        cin = cin_pad
    return wt.reshape(9 * cin, cout).astype(jnp.bfloat16)


def _prep_b(b):
    return b.reshape(1, -1).astype(jnp.float32)


def _vmem_bytes(shape, dtype):
    """Rough tiled-footprint estimate (last dim -> 128 lanes, 2nd-last -> sublane tile)."""
    item = jnp.dtype(dtype).itemsize
    dims = list(shape)
    dims[-1] = _round_up(dims[-1], 128)
    if len(dims) >= 2:
        dims[-2] = _round_up(dims[-2], 8 * (4 // item))
    n = item
    for d in dims:
        n *= d
    return n


def condition_net_forward(params, support_x_nchw):
    """support_x: (task_size, 3*support_size, H, W) NCHW -> (task_size, 128, 1, 1)."""
    x = jnp.transpose(support_x_nchw, (0, 2, 3, 1)).astype(jnp.float32)   # NHWC
    n, h, w, c0 = x.shape
    if h % 2 or w % 2:
        raise ValueError("H and W must be even (AvgPool2d(2,2)).")

    (w1, b1), (w2, b2), (w3, b3), (w4, b4) = params
    c1 = int(w1.shape[0]); c2 = int(w2.shape[0])
    c3 = int(w3.shape[0]); c4 = int(w4.shape[0])
    hh, wh = h // 2, w // 2

    # Pad the tiny input-channel dim to a multiple of 8 (weights zero-padded too).
    c0p = _round_up(c0, 8)
    if c0p != c0:
        x = jnp.pad(x, ((0, 0), (0, 0), (0, 0), (0, c0p - c0)))

    # Tasks per grid step: largest divisor of n with M = tb*H*W <= 1024 (MXU
    # utilisation is governed by K/N, not M) while keeping >= 2 grid steps when
    # n >= 2 so the "parallel" axis can be sharded across two TensorCores (v7x).
    tb = 1
    for d in range(1, n + 1):
        if n % d == 0 and d * h * w <= 1024 and (n // d >= 2 or n < 2):
            tb = d
    grid = (n // tb,)
    m1 = tb * h * w            # matmul rows for conv1/conv2
    m2 = tb * hh * wh          # matmul rows for conv3/conv4

    scratch_list = [
        ((tb, h + 2, w + 2, c0p), jnp.float32),    # p1: padded input
        ((tb, h + 2, w + 2, c1), jnp.float32),     # p2: padded conv1 out
        ((tb, hh + 2, wh + 2, c2), jnp.float32),   # p3: padded pooled map
        ((tb, hh + 2, wh + 2, c3), jnp.float32),   # p4: padded conv3 out
        ((m1, 9 * c0p), jnp.bfloat16),             # im1: conv1 im2col
        ((m1, 9 * c1), jnp.bfloat16),              # im2: conv2 im2col
        ((m2, 9 * c2), jnp.bfloat16),              # im3: conv3 im2col
        ((m2, 9 * c3), jnp.bfloat16),              # im4: conv4 im2col
        ((tb * hh, 2, w, c2), jnp.float32),        # pool staging
    ]
    scratch_shapes = [pltpu.VMEM(s, d) for s, d in scratch_list]

    w1p = _prep_w(w1, c0p)
    w2p, w3p, w4p = _prep_w(w2), _prep_w(w3), _prep_w(w4)
    b1p, b2p, b3p, b4p = _prep_b(b1), _prep_b(b2), _prep_b(b3), _prep_b(b4)

    # Explicit VMEM budget: declared scratch + double-buffered I/O blocks +
    # resident weights + headroom for Mosaic-managed temporaries (acc, patches).
    est = sum(_vmem_bytes(s, d) for s, d in scratch_list)
    est += 2 * _vmem_bytes((tb, h, w, c0p), jnp.float32)
    est += 2 * _vmem_bytes((tb, 1, c4), jnp.float32)
    for wp in (w1p, w2p, w3p, w4p):
        est += _vmem_bytes(wp.shape, wp.dtype)
    est += 3 * _vmem_bytes((max(m1, m2), max(c1, c2, c3, c4)), jnp.float32)
    vmem_limit = int(min(max(1.5 * est + (4 << 20), 32 << 20), 100 << 20))

    out = pl.pallas_call(
        _condition_net_kernel,
        out_shape=jax.ShapeDtypeStruct((n, 1, c4), jnp.float32),
        grid=grid,
        in_specs=[
            pl.BlockSpec((tb, h, w, c0p), lambda i: (i, 0, 0, 0)),
            pl.BlockSpec((9 * c0p, c1), lambda i: (0, 0)),
            pl.BlockSpec((1, c1), lambda i: (0, 0)),
            pl.BlockSpec((9 * c1, c2), lambda i: (0, 0)),
            pl.BlockSpec((1, c2), lambda i: (0, 0)),
            pl.BlockSpec((9 * c2, c3), lambda i: (0, 0)),
            pl.BlockSpec((1, c3), lambda i: (0, 0)),
            pl.BlockSpec((9 * c3, c4), lambda i: (0, 0)),
            pl.BlockSpec((1, c4), lambda i: (0, 0)),
        ],
        out_specs=pl.BlockSpec((tb, 1, c4), lambda i: (i, 0, 0)),
        scratch_shapes=scratch_shapes,
        compiler_params=pltpu.CompilerParams(
            dimension_semantics=("parallel",),
            vmem_limit_bytes=vmem_limit),
    )(x, w1p, b1p, w2p, b2p, w3p, b3p, w4p, b4p)

    return out.reshape(n, c4, 1, 1)                               # NCHW


# -------------------------- parameters & reference -------------------------- #

def _kaiming_conv(key, cout, cin, scale=0.1):
    """kaiming_normal_(a=0, mode='fan_in') * scale, zero bias (as in the module)."""
    fan_in = cin * 9
    std = (2.0 / fan_in) ** 0.5
    w = jax.random.normal(key, (cout, cin, 3, 3), jnp.float32) * std * scale
    b = jnp.zeros((cout,), jnp.float32)
    return w, b


def _reference_forward(params, support_x_nchw):
    """Pure-JAX (XLA, full precision) reference of the same forward pass."""
    x = jnp.transpose(support_x_nchw, (0, 2, 3, 1)).astype(jnp.float32)

    def conv(x, w, b):
        w_hwio = jnp.transpose(w, (2, 3, 1, 0))
        y = lax.conv_general_dilated(
            x, w_hwio, (1, 1), 'SAME',
            dimension_numbers=('NHWC', 'HWIO', 'NHWC'),
            precision=lax.Precision.HIGHEST)
        return jax.nn.relu(y + b)

    (w1, b1), (w2, b2), (w3, b3), (w4, b4) = params
    y = conv(x, w1, b1)
    y = conv(y, w2, b2)
    n, h, w, c = y.shape
    y = y.reshape(n, h // 2, 2, w // 2, 2, c).mean(axis=(2, 4))
    y = conv(y, w3, b3)
    y = conv(y, w4, b4)
    return y.mean(axis=(1, 2)).reshape(n, -1, 1, 1)


# ----------------------------------- main ----------------------------------- #

if __name__ == "__main__":
    key = jax.random.PRNGKey(0)
    task_size, support_size, H, W = 2, 2, 16, 16     # small demo shapes
    cin0 = 3 * support_size

    k_x, k1, k2, k3, k4 = jax.random.split(key, 5)
    support_x = jax.random.normal(k_x, (task_size, cin0, H, W), jnp.float32)
    params = [
        _kaiming_conv(k1, 64, cin0),
        _kaiming_conv(k2, 64, 64),
        _kaiming_conv(k3, 128, 64),
        _kaiming_conv(k4, 128, 128),
    ]

    out = jax.jit(condition_net_forward)(params, support_x)
    out = jax.block_until_ready(out)
    assert out.shape == (task_size, 128, 1, 1), out.shape

    ref = _reference_forward(params, support_x)
    rel_err = float(jnp.max(jnp.abs(out - ref)) / (jnp.max(jnp.abs(ref)) + 1e-12))
    # bf16 MXU operands -> allow bf16-level deviation from the f32 reference.
    assert rel_err < 2e-2, f"relative error too large: {rel_err}"

    print("KERNEL_OK")
</pallas_src>

<mosaic_0001>
module attributes {stable_mosaic.version = 11 : i64} {
  func.func @_condition_net_kernel(%arg0: i32, %arg1: memref<1x16x16x8xf32, #tpu.memory_space<vmem>>, %arg2: memref<72x64xbf16, #tpu.memory_space<vmem>>, %arg3: memref<1x64xf32, #tpu.memory_space<vmem>>, %arg4: memref<576x64xbf16, #tpu.memory_space<vmem>>, %arg5: memref<1x64xf32, #tpu.memory_space<vmem>>, %arg6: memref<576x128xbf16, #tpu.memory_space<vmem>>, %arg7: memref<1x128xf32, #tpu.memory_space<vmem>>, %arg8: memref<1152x128xbf16, #tpu.memory_space<vmem>>, %arg9: memref<1x128xf32, #tpu.memory_space<vmem>>, %arg10: memref<1x1x128xf32, #tpu.memory_space<vmem>>, %arg11: memref<1x18x18x8xf32, #tpu.memory_space<vmem>>, %arg12: memref<1x18x18x64xf32, #tpu.memory_space<vmem>>, %arg13: memref<1x10x10x64xf32, #tpu.memory_space<vmem>>, %arg14: memref<1x10x10x128xf32, #tpu.memory_space<vmem>>, %arg15: memref<256x72xbf16, #tpu.memory_space<vmem>>, %arg16: memref<256x576xbf16, #tpu.memory_space<vmem>>, %arg17: memref<64x576xbf16, #tpu.memory_space<vmem>>, %arg18: memref<64x1152xbf16, #tpu.memory_space<vmem>>, %arg19: memref<8x2x16x64xf32, #tpu.memory_space<vmem>>) attributes {dimension_semantics = [#tpu.dimension_semantics<parallel>], iteration_bounds = array<i64: 2>, scalar_prefetch = 0 : i64, scratch_operands = 9 : i64, tpu.core_type = #tpu.core_type<tc>, window_params = [{transform_indices = @transform_0, window_bounds = array<i64: 1, 16, 16, 8>}, {pipeline_mode = #tpu.pipeline_mode<synchronous>, transform_indices = @transform_1, window_bounds = array<i64: 72, 64>}, {pipeline_mode = #tpu.pipeline_mode<synchronous>, transform_indices = @transform_2, window_bounds = array<i64: 1, 64>}, {pipeline_mode = #tpu.pipeline_mode<synchronous>, transform_indices = @transform_3, window_bounds = array<i64: 576, 64>}, {pipeline_mode = #tpu.pipeline_mode<synchronous>, transform_indices = @transform_4, window_bounds = array<i64: 1, 64>}, {pipeline_mode = #tpu.pipeline_mode<synchronous>, transform_indices = @transform_5, window_bounds = array<i64: 576, 128>}, {pipeline_mode = #tpu.pipeline_mode<synchronous>, transform_indices = @transform_6, window_bounds = array<i64: 1, 128>}, {pipeline_mode = #tpu.pipeline_mode<synchronous>, transform_indices = @transform_7, window_bounds = array<i64: 1152, 128>}, {pipeline_mode = #tpu.pipeline_mode<synchronous>, transform_indices = @transform_8, window_bounds = array<i64: 1, 128>}, {transform_indices = @transform_9, window_bounds = array<i64: 1, 1, 128>}]} {
    %cst = arith.constant 0.000000e+00 : f32
    %0 = vector.broadcast %cst : f32 to vector<1x1x18x8xf32>
    %cst_0 = arith.constant 0.000000e+00 : f32
    %1 = vector.broadcast %cst_0 : f32 to vector<1x18x1x8xf32>
    %c0 = arith.constant 0 : index
    %c0_1 = arith.constant 0 : index
    %c0_2 = arith.constant 0 : index
    %c0_3 = arith.constant 0 : index
    %2 = vector.load %arg11[%c0, %c0_1, %c0_2, %c0_3] : memref<1x18x18x8xf32, #tpu.memory_space<vmem>>, vector<1x1x18x8xf32>
    tpu.vector_store %arg11[%c0, %c0_1, %c0_2, %c0_3], %0 {strides = array<i32>} : memref<1x18x18x8xf32, #tpu.memory_space<vmem>>, vector<1x1x18x8xf32>,
    %c0_4 = arith.constant 0 : index
    %c17 = arith.constant 17 : index
    %c0_5 = arith.constant 0 : index
    %c0_6 = arith.constant 0 : index
    %3 = vector.load %arg11[%c0_4, %c17, %c0_5, %c0_6] : memref<1x18x18x8xf32, #tpu.memory_space<vmem>>, vector<1x1x18x8xf32>
    tpu.vector_store %arg11[%c0_4, %c17, %c0_5, %c0_6], %0 {strides = array<i32>} : memref<1x18x18x8xf32, #tpu.memory_space<vmem>>, vector<1x1x18x8xf32>,
    %c0_7 = arith.constant 0 : index
    %c0_8 = arith.constant 0 : index
    %c0_9 = arith.constant 0 : index
    %c0_10 = arith.constant 0 : index
    %4 = vector.load %arg11[%c0_7, %c0_8, %c0_9, %c0_10] : memref<1x18x18x8xf32, #tpu.memory_space<vmem>>, vector<1x18x1x8xf32>
    tpu.vector_store %arg11[%c0_7, %c0_8, %c0_9, %c0_10], %1 {strides = array<i32>} : memref<1x18x18x8xf32, #tpu.memory_space<vmem>>, vector<1x18x1x8xf32>,
    %c0_11 = arith.constant 0 : index
    %c0_12 = arith.constant 0 : index
    %c17_13 = arith.constant 17 : index
    %c0_14 = arith.constant 0 : index
    %5 = vector.load %arg11[%c0_11, %c0_12, %c17_13, %c0_14] : memref<1x18x18x8xf32, #tpu.memory_space<vmem>>, vector<1x18x1x8xf32>
    tpu.vector_store %arg11[%c0_11, %c0_12, %c17_13, %c0_14], %1 {strides = array<i32>} : memref<1x18x18x8xf32, #tpu.memory_space<vmem>>, vector<1x18x1x8xf32>,
    %cst_15 = arith.constant 0.000000e+00 : f32
    %6 = vector.broadcast %cst_15 : f32 to vector<1x1x18x64xf32>
    %cst_16 = arith.constant 0.000000e+00 : f32
    %7 = vector.broadcast %cst_16 : f32 to vector<1x18x1x64xf32>
    %c0_17 = arith.constant 0 : index
    %c0_18 = arith.constant 0 : index
    %c0_19 = arith.constant 0 : index
    %c0_20 = arith.constant 0 : index
    %8 = vector.load %arg12[%c0_17, %c0_18, %c0_19, %c0_20] : memref<1x18x18x64xf32, #tpu.memory_space<vmem>>, vector<1x1x18x64xf32>
    tpu.vector_store %arg12[%c0_17, %c0_18, %c0_19, %c0_20], %6 {strides = array<i32>} : memref<1x18x18x64xf32, #tpu.memory_space<vmem>>, vector<1x1x18x64xf32>,
    %c0_21 = arith.constant 0 : index
    %c17_22 = arith.constant 17 : index
    %c0_23 = arith.constant 0 : index
    %c0_24 = arith.constant 0 : index
    %9 = vector.load %arg12[%c0_21, %c17_22, %c0_23, %c0_24] : memref<1x18x18x64xf32, #tpu.memory_space<vmem>>, vector<1x1x18x64xf32>
    tpu.vector_store %arg12[%c0_21, %c17_22, %c0_23, %c0_24], %6 {strides = array<i32>} : memref<1x18x18x64xf32, #tpu.memory_space<vmem>>, vector<1x1x18x64xf32>,
    %c0_25 = arith.constant 0 : index
    %c0_26 = arith.constant 0 : index
    %c0_27 = arith.constant 0 : index
    %c0_28 = arith.constant 0 : index
    %10 = vector.load %arg12[%c0_25, %c0_26, %c0_27, %c0_28] : memref<1x18x18x64xf32, #tpu.memory_space<vmem>>, vector<1x18x1x64xf32>
    tpu.vector_store %arg12[%c0_25, %c0_26, %c0_27, %c0_28], %7 {strides = array<i32>} : memref<1x18x18x64xf32, #tpu.memory_space<vmem>>, vector<1x18x1x64xf32>,
    %c0_29 = arith.constant 0 : index
    %c0_30 = arith.constant 0 : index
    %c17_31 = arith.constant 17 : index
    %c0_32 = arith.constant 0 : index
    %11 = vector.load %arg12[%c0_29, %c0_30, %c17_31, %c0_32] : memref<1x18x18x64xf32, #tpu.memory_space<vmem>>, vector<1x18x1x64xf32>
    tpu.vector_store %arg12[%c0_29, %c0_30, %c17_31, %c0_32], %7 {strides = array<i32>} : memref<1x18x18x64xf32, #tpu.memory_space<vmem>>, vector<1x18x1x64xf32>,
    %cst_33 = arith.constant 0.000000e+00 : f32
    %12 = vector.broadcast %cst_33 : f32 to vector<1x1x10x64xf32>
    %cst_34 = arith.constant 0.000000e+00 : f32
    %13 = vector.broadcast %cst_34 : f32 to vector<1x10x1x64xf32>
    %c0_35 = arith.constant 0 : index
    %c0_36 = arith.constant 0 : index
    %c0_37 = arith.constant 0 : index
    %c0_38 = arith.constant 0 : index
    %14 = vector.load %arg13[%c0_35, %c0_36, %c0_37, %c0_38] : memref<1x10x10x64xf32, #tpu.memory_space<vmem>>, vector<1x1x10x64xf32>
    tpu.vector_store %arg13[%c0_35, %c0_36, %c0_37, %c0_38], %12 {strides = array<i32>} : memref<1x10x10x64xf32, #tpu.memory_space<vmem>>, vector<1x1x10x64xf32>,
    %c0_39 = arith.constant 0 : index
    %c9 = arith.constant 9 : index
    %c0_40 = arith.constant 0 : index
    %c0_41 = arith.constant 0 : index
    %15 = vector.load %arg13[%c0_39, %c9, %c0_40, %c0_41] : memref<1x10x10x64xf32, #tpu.memory_space<vmem>>, vector<1x1x10x64xf32>
    tpu.vector_store %arg13[%c0_39, %c9, %c0_40, %c0_41], %12 {strides = array<i32>} : memref<1x10x10x64xf32, #tpu.memory_space<vmem>>, vector<1x1x10x64xf32>,
    %c0_42 = arith.constant 0 : index
    %c0_43 = arith.constant 0 : index
    %c0_44 = arith.constant 0 : index
    %c0_45 = arith.constant 0 : index
    %16 = vector.load %arg13[%c0_42, %c0_43, %c0_44, %c0_45] : memref<1x10x10x64xf32, #tpu.memory_space<vmem>>, vector<1x10x1x64xf32>
    tpu.vector_store %arg13[%c0_42, %c0_43, %c0_44, %c0_45], %13 {strides = array<i32>} : memref<1x10x10x64xf32, #tpu.memory_space<vmem>>, vector<1x10x1x64xf32>,
    %c0_46 = arith.constant 0 : index
    %c0_47 = arith.constant 0 : index
    %c9_48 = arith.constant 9 : index
    %c0_49 = arith.constant 0 : index
    %17 = vector.load %arg13[%c0_46, %c0_47, %c9_48, %c0_49] : memref<1x10x10x64xf32, #tpu.memory_space<vmem>>, vector<1x10x1x64xf32>
    tpu.vector_store %arg13[%c0_46, %c0_47, %c9_48, %c0_49], %13 {strides = array<i32>} : memref<1x10x10x64xf32, #tpu.memory_space<vmem>>, vector<1x10x1x64xf32>,
    %cst_50 = arith.constant 0.000000e+00 : f32
    %18 = vector.broadcast %cst_50 : f32 to vector<1x1x10x128xf32>
    %cst_51 = arith.constant 0.000000e+00 : f32
    %19 = vector.broadcast %cst_51 : f32 to vector<1x10x1x128xf32>
    %c0_52 = arith.constant 0 : index
    %c0_53 = arith.constant 0 : index
    %c0_54 = arith.constant 0 : index
    %c0_55 = arith.constant 0 : index
    %20 = vector.load %arg14[%c0_52, %c0_53, %c0_54, %c0_55] : memref<1x10x10x128xf32, #tpu.memory_space<vmem>>, vector<1x1x10x128xf32>
    tpu.vector_store %arg14[%c0_52, %c0_53, %c0_54, %c0_55], %18 {strides = array<i32>} : memref<1x10x10x128xf32, #tpu.memory_space<vmem>>, vector<1x1x10x128xf32>,
    %c0_56 = arith.constant 0 : index
    %c9_57 = arith.constant 9 : index
    %c0_58 = arith.constant 0 : index
    %c0_59 = arith.constant 0 : index
    %21 = vector.load %arg14[%c0_56, %c9_57, %c0_58, %c0_59] : memref<1x10x10x128xf32, #tpu.memory_space<vmem>>, vector<1x1x10x128xf32>
    tpu.vector_store %arg14[%c0_56, %c9_57, %c0_58, %c0_59], %18 {strides = array<i32>} : memref<1x10x10x128xf32, #tpu.memory_space<vmem>>, vector<1x1x10x128xf32>,
    %c0_60 = arith.constant 0 : index
    %c0_61 = arith.constant 0 : index
    %c0_62 = arith.constant 0 : index
    %c0_63 = arith.constant 0 : index
    %22 = vector.load %arg14[%c0_60, %c0_61, %c0_62, %c0_63] : memref<1x10x10x128xf32, #tpu.memory_space<vmem>>, vector<1x10x1x128xf32>
    tpu.vector_store %arg14[%c0_60, %c0_61, %c0_62, %c0_63], %19 {strides = array<i32>} : memref<1x10x10x128xf32, #tpu.memory_space<vmem>>, vector<1x10x1x128xf32>,
    %c0_64 = arith.constant 0 : index
    %c0_65 = arith.constant 0 : index
    %c9_66 = arith.constant 9 : index
    %c0_67 = arith.constant 0 : index
    %23 = vector.load %arg14[%c0_64, %c0_65, %c9_66, %c0_67] : memref<1x10x10x128xf32, #tpu.memory_space<vmem>>, vector<1x10x1x128xf32>
    tpu.vector_store %arg14[%c0_64, %c0_65, %c9_66, %c0_67], %19 {strides = array<i32>} : memref<1x10x10x128xf32, #tpu.memory_space<vmem>>, vector<1x10x1x128xf32>,
    %c0_68 = arith.constant 0 : index
    %c0_69 = arith.constant 0 : index
    %c0_70 = arith.constant 0 : index
    %c0_71 = arith.constant 0 : index
    %24 = vector.load %arg1[%c0_68, %c0_69, %c0_70, %c0_71] : memref<1x16x16x8xf32, #tpu.memory_space<vmem>>, vector<1x16x16x8xf32>
    %c0_72 = arith.constant 0 : index
    %c1 = arith.constant 1 : index
    %c1_73 = arith.constant 1 : index
    %c0_74 = arith.constant 0 : index
    %25 = vector.load %arg11[%c0_72, %c1, %c1_73, %c0_74] : memref<1x18x18x8xf32, #tpu.memory_space<vmem>>, vector<1x16x16x8xf32>
    tpu.vector_store %arg11[%c0_72, %c1, %c1_73, %c0_74], %24 {strides = array<i32>} : memref<1x18x18x8xf32, #tpu.memory_space<vmem>>, vector<1x16x16x8xf32>,
    %c0_75 = arith.constant 0 : index
    %c0_76 = arith.constant 0 : index
    %c0_77 = arith.constant 0 : index
    %c0_78 = arith.constant 0 : index
    %26 = vector.load %arg11[%c0_75, %c0_76, %c0_77, %c0_78] : memref<1x18x18x8xf32, #tpu.memory_space<vmem>>, vector<1x16x16x8xf32>
    %27 = vector.shape_cast %26 : vector<1x16x16x8xf32> to vector<256x8xf32>
    %28 = arith.truncf %27 : vector<256x8xf32> to vector<256x8xbf16>
    %c0_79 = arith.constant 0 : index
    %c0_80 = arith.constant 0 : index
    %29 = vector.load %arg15[%c0_79, %c0_80] : memref<256x72xbf16, #tpu.memory_space<vmem>>, vector<256x8xbf16>
    tpu.vector_store %arg15[%c0_79, %c0_80], %28 {strides = array<i32>} : memref<256x72xbf16, #tpu.memory_space<vmem>>, vector<256x8xbf16>,
    %c0_81 = arith.constant 0 : index
    %c0_82 = arith.constant 0 : index
    %c1_83 = arith.constant 1 : index
    %c0_84 = arith.constant 0 : index
    %30 = vector.load %arg11[%c0_81, %c0_82, %c1_83, %c0_84] : memref<1x18x18x8xf32, #tpu.memory_space<vmem>>, vector<1x16x16x8xf32>
    %31 = vector.shape_cast %30 : vector<1x16x16x8xf32> to vector<256x8xf32>
    %32 = arith.truncf %31 : vector<256x8xf32> to vector<256x8xbf16>
    %c0_85 = arith.constant 0 : index
    %c8 = arith.constant 8 : index
    %33 = vector.load %arg15[%c0_85, %c8] : memref<256x72xbf16, #tpu.memory_space<vmem>>, vector<256x8xbf16>
    tpu.vector_store %arg15[%c0_85, %c8], %32 {strides = array<i32>} : memref<256x72xbf16, #tpu.memory_space<vmem>>, vector<256x8xbf16>,
    %c0_86 = arith.constant 0 : index
    %c0_87 = arith.constant 0 : index
    %c2 = arith.constant 2 : index
    %c0_88 = arith.constant 0 : index
    %34 = vector.load %arg11[%c0_86, %c0_87, %c2, %c0_88] : memref<1x18x18x8xf32, #tpu.memory_space<vmem>>, vector<1x16x16x8xf32>
    %35 = vector.shape_cast %34 : vector<1x16x16x8xf32> to vector<256x8xf32>
    %36 = arith.truncf %35 : vector<256x8xf32> to vector<256x8xbf16>
    %c0_89 = arith.constant 0 : index
    %c16 = arith.constant 16 : index
    %37 = vector.load %arg15[%c0_89, %c16] : memref<256x72xbf16, #tpu.memory_space<vmem>>, vector<256x8xbf16>
    tpu.vector_store %arg15[%c0_89, %c16], %36 {strides = array<i32>} : memref<256x72xbf16, #tpu.memory_space<vmem>>, vector<256x8xbf16>,
    %c0_90 = arith.constant 0 : index
    %c1_91 = arith.constant 1 : index
    %c0_92 = arith.constant 0 : index
    %c0_93 = arith.constant 0 : index
    %38 = vector.load %arg11[%c0_90, %c1_91, %c0_92, %c0_93] : memref<1x18x18x8xf32, #tpu.memory_space<vmem>>, vector<1x16x16x8xf32>
    %39 = vector.shape_cast %38 : vector<1x16x16x8xf32> to vector<256x8xf32>
    %40 = arith.truncf %39 : vector<256x8xf32> to vector<256x8xbf16>
    %c0_94 = arith.constant 0 : index
    %c24 = arith.constant 24 : index
    %41 = vector.load %arg15[%c0_94, %c24] : memref<256x72xbf16, #tpu.memory_space<vmem>>, vector<256x8xbf16>
    tpu.vector_store %arg15[%c0_94, %c24], %40 {strides = array<i32>} : memref<256x72xbf16, #tpu.memory_space<vmem>>, vector<256x8xbf16>,
    %c0_95 = arith.constant 0 : index
    %c1_96 = arith.constant 1 : index
    %c1_97 = arith.constant 1 : index
    %c0_98 = arith.constant 0 : index
    %42 = vector.load %arg11[%c0_95, %c1_96, %c1_97, %c0_98] : memref<1x18x18x8xf32, #tpu.memory_space<vmem>>, vector<1x16x16x8xf32>
    %43 = vector.shape_cast %42 : vector<1x16x16x8xf32> to vector<256x8xf32>
    %44 = arith.truncf %43 : vector<256x8xf32> to vector<256x8xbf16>
    %c0_99 = arith.constant 0 : index
    %c32 = arith.constant 32 : index
    %45 = vector.load %arg15[%c0_99, %c32] : memref<256x72xbf16, #tpu.memory_space<vmem>>, vector<256x8xbf16>
    tpu.vector_store %arg15[%c0_99, %c32], %44 {strides = array<i32>} : memref<256x72xbf16, #tpu.memory_space<vmem>>, vector<256x8xbf16>,
    %c0_100 = arith.constant 0 : index
    %c1_101 = arith.constant 1 : index
    %c2_102 = arith.constant 2 : index
    %c0_103 = arith.constant 0 : index
    %46 = vector.load %arg11[%c0_100, %c1_101, %c2_102, %c0_103] : memref<1x18x18x8xf32, #tpu.memory_space<vmem>>, vector<1x16x16x8xf32>
    %47 = vector.shape_cast %46 : vector<1x16x16x8xf32> to vector<256x8xf32>
    %48 = arith.truncf %47 : vector<256x8xf32> to vector<256x8xbf16>
    %c0_104 = arith.constant 0 : index
    %c40 = arith.constant 40 : index
    %49 = vector.load %arg15[%c0_104, %c40] : memref<256x72xbf16, #tpu.memory_space<vmem>>, vector<256x8xbf16>
    tpu.vector_store %arg15[%c0_104, %c40], %48 {strides = array<i32>} : memref<256x72xbf16, #tpu.memory_space<vmem>>, vector<256x8xbf16>,
    %c0_105 = arith.constant 0 : index
    %c2_106 = arith.constant 2 : index
    %c0_107 = arith.constant 0 : index
    %c0_108 = arith.constant 0 : index
    %50 = vector.load %arg11[%c0_105, %c2_106, %c0_107, %c0_108] : memref<1x18x18x8xf32, #tpu.memory_space<vmem>>, vector<1x16x16x8xf32>
    %51 = vector.shape_cast %50 : vector<1x16x16x8xf32> to vector<256x8xf32>
    %52 = arith.truncf %51 : vector<256x8xf32> to vector<256x8xbf16>
    %c0_109 = arith.constant 0 : index
    %c48 = arith.constant 48 : index
    %53 = vector.load %arg15[%c0_109, %c48] : memref<256x72xbf16, #tpu.memory_space<vmem>>, vector<256x8xbf16>
    tpu.vector_store %arg15[%c0_109, %c48], %52 {strides = array<i32>} : memref<256x72xbf16, #tpu.memory_space<vmem>>, vector<256x8xbf16>,
    %c0_110 = arith.constant 0 : index
    %c2_111 = arith.constant 2 : index
    %c1_112 = arith.constant 1 : index
    %c0_113 = arith.constant 0 : index
    %54 = vector.load %arg11[%c0_110, %c2_111, %c1_112, %c0_113] : memref<1x18x18x8xf32, #tpu.memory_space<vmem>>, vector<1x16x16x8xf32>
    %55 = vector.shape_cast %54 : vector<1x16x16x8xf32> to vector<256x8xf32>
    %56 = arith.truncf %55 : vector<256x8xf32> to vector<256x8xbf16>
    %c0_114 = arith.constant 0 : index
    %c56 = arith.constant 56 : index
    %57 = vector.load %arg15[%c0_114, %c56] : memref<256x72xbf16, #tpu.memory_space<vmem>>, vector<256x8xbf16>
    tpu.vector_store %arg15[%c0_114, %c56], %56 {strides = array<i32>} : memref<256x72xbf16, #tpu.memory_space<vmem>>, vector<256x8xbf16>,
    %c0_115 = arith.constant 0 : index
    %c2_116 = arith.constant 2 : index
    %c2_117 = arith.constant 2 : index
    %c0_118 = arith.constant 0 : index
    %58 = vector.load %arg11[%c0_115, %c2_116, %c2_117, %c0_118] : memref<1x18x18x8xf32, #tpu.memory_space<vmem>>, vector<1x16x16x8xf32>
    %59 = vector.shape_cast %58 : vector<1x16x16x8xf32> to vector<256x8xf32>
    %60 = arith.truncf %59 : vector<256x8xf32> to vector<256x8xbf16>
    %c0_119 = arith.constant 0 : index
    %c64 = arith.constant 64 : index
    %61 = vector.load %arg15[%c0_119, %c64] : memref<256x72xbf16, #tpu.memory_space<vmem>>, vector<256x8xbf16>
    tpu.vector_store %arg15[%c0_119, %c64], %60 {strides = array<i32>} : memref<256x72xbf16, #tpu.memory_space<vmem>>, vector<256x8xbf16>,
    %c0_120 = arith.constant 0 : index
    %c0_121 = arith.constant 0 : index
    %62 = vector.load %arg15[%c0_120, %c0_121] : memref<256x72xbf16, #tpu.memory_space<vmem>>, vector<256x72xbf16>
    %c0_122 = arith.constant 0 : index
    %c0_123 = arith.constant 0 : index
    %63 = vector.load %arg2[%c0_122, %c0_123] : memref<72x64xbf16, #tpu.memory_space<vmem>>, vector<72x64xbf16>
    %cst_124 = arith.constant dense<0.000000e+00> : vector<256x64xf32>
    %64 = tpu.matmul %62, %63, %cst_124 {dimension_numbers = #tpu.dot_dimension_numbers<[1], [0], [0], [1], [0, 0, 1, 1], [], []>} : vector<256x72xbf16>, vector<72x64xbf16>, vector<256x64xf32> -> vector<256x64xf32>
    %c0_125 = arith.constant 0 : index
    %c0_126 = arith.constant 0 : index
    %65 = vector.load %arg3[%c0_125, %c0_126] : memref<1x64xf32, #tpu.memory_space<vmem>>, vector<1x64xf32>
    %66 = vector.broadcast %65 : vector<1x64xf32> to vector<256x64xf32>
    %67 = arith.addf %64, %66 : vector<256x64xf32>
    %cst_127 = arith.constant 0.000000e+00 : f32
    %68 = vector.broadcast %cst_127 : f32 to vector<256x64xf32>
    %69 = arith.maximumf %67, %68 : vector<256x64xf32>
    %70 = vector.shape_cast %69 : vector<256x64xf32> to vector<1x16x16x64xf32>
    %c0_128 = arith.constant 0 : index
    %c1_129 = arith.constant 1 : index
    %c1_130 = arith.constant 1 : index
    %c0_131 = arith.constant 0 : index
    %71 = vector.load %arg12[%c0_128, %c1_129, %c1_130, %c0_131] : memref<1x18x18x64xf32, #tpu.memory_space<vmem>>, vector<1x16x16x64xf32>
    tpu.vector_store %arg12[%c0_128, %c1_129, %c1_130, %c0_131], %70 {strides = array<i32>} : memref<1x18x18x64xf32, #tpu.memory_space<vmem>>, vector<1x16x16x64xf32>,
    %c0_132 = arith.constant 0 : index
    %c0_133 = arith.constant 0 : index
    %c0_134 = arith.constant 0 : index
    %c0_135 = arith.constant 0 : index
    %72 = vector.load %arg12[%c0_132, %c0_133, %c0_134, %c0_135] : memref<1x18x18x64xf32, #tpu.memory_space<vmem>>, vector<1x16x16x64xf32>
    %73 = vector.shape_cast %72 : vector<1x16x16x64xf32> to vector<256x64xf32>
    %74 = arith.truncf %73 : vector<256x64xf32> to vector<256x64xbf16>
    %c0_136 = arith.constant 0 : index
    %c0_137 = arith.constant 0 : index
    %75 = vector.load %arg16[%c0_136, %c0_137] : memref<256x576xbf16, #tpu.memory_space<vmem>>, vector<256x64xbf16>
    tpu.vector_store %arg16[%c0_136, %c0_137], %74 {strides = array<i32>} : memref<256x576xbf16, #tpu.memory_space<vmem>>, vector<256x64xbf16>,
    %c0_138 = arith.constant 0 : index
    %c0_139 = arith.constant 0 : index
    %c1_140 = arith.constant 1 : index
    %c0_141 = arith.constant 0 : index
    %76 = vector.load %arg12[%c0_138, %c0_139, %c1_140, %c0_141] : memref<1x18x18x64xf32, #tpu.memory_space<vmem>>, vector<1x16x16x64xf32>
    %77 = vector.shape_cast %76 : vector<1x16x16x64xf32> to vector<256x64xf32>
    %78 = arith.truncf %77 : vector<256x64xf32> to vector<256x64xbf16>
    %c0_142 = arith.constant 0 : index
    %c64_143 = arith.constant 64 : index
    %79 = vector.load %arg16[%c0_142, %c64_143] : memref<256x576xbf16, #tpu.memory_space<vmem>>, vector<256x64xbf16>
    tpu.vector_store %arg16[%c0_142, %c64_143], %78 {strides = array<i32>} : memref<256x576xbf16, #tpu.memory_space<vmem>>, vector<256x64xbf16>,
    %c0_144 = arith.constant 0 : index
    %c0_145 = arith.constant 0 : index
    %c2_146 = arith.constant 2 : index
    %c0_147 = arith.constant 0 : index
    %80 = vector.load %arg12[%c0_144, %c0_145, %c2_146, %c0_147] : memref<1x18x18x64xf32, #tpu.memory_space<vmem>>, vector<1x16x16x64xf32>
    %81 = vector.shape_cast %80 : vector<1x16x16x64xf32> to vector<256x64xf32>
    %82 = arith.truncf %81 : vector<256x64xf32> to vector<256x64xbf16>
    %c0_148 = arith.constant 0 : index
    %c128 = arith.constant 128 : index
    %83 = vector.load %arg16[%c0_148, %c128] : memref<256x576xbf16, #tpu.memory_space<vmem>>, vector<256x64xbf16>
    tpu.vector_store %arg16[%c0_148, %c128], %82 {strides = array<i32>} : memref<256x576xbf16, #tpu.memory_space<vmem>>, vector<256x64xbf16>,
    %c0_149 = arith.constant 0 : index
    %c1_150 = arith.constant 1 : index
    %c0_151 = arith.constant 0 : index
    %c0_152 = arith.constant 0 : index
    %84 = vector.load %arg12[%c0_149, %c1_150, %c0_151, %c0_152] : memref<1x18x18x64xf32, #tpu.memory_space<vmem>>, vector<1x16x16x64xf32>
    %85 = vector.shape_cast %84 : vector<1x16x16x64xf32> to vector<256x64xf32>
    %86 = arith.truncf %85 : vector<256x64xf32> to vector<256x64xbf16>
    %c0_153 = arith.constant 0 : index
    %c192 = arith.constant 192 : index
    %87 = vector.load %arg16[%c0_153, %c192] : memref<256x576xbf16, #tpu.memory_space<vmem>>, vector<256x64xbf16>
    tpu.vector_store %arg16[%c0_153, %c192], %86 {strides = array<i32>} : memref<256x576xbf16, #tpu.memory_space<vmem>>, vector<256x64xbf16>,
    %c0_154 = arith.constant 0 : index
    %c1_155 = arith.constant 1 : index
    %c1_156 = arith.constant 1 : index
    %c0_157 = arith.constant 0 : index
    %88 = vector.load %arg12[%c0_154, %c1_155, %c1_156, %c0_157] : memref<1x18x18x64xf32, #tpu.memory_space<vmem>>, vector<1x16x16x64xf32>
    %89 = vector.shape_cast %88 : vector<1x16x16x64xf32> to vector<256x64xf32>
    %90 = arith.truncf %89 : vector<256x64xf32> to vector<256x64xbf16>
    %c0_158 = arith.constant 0 : index
    %c256 = arith.constant 256 : index
    %91 = vector.load %arg16[%c0_158, %c256] : memref<256x576xbf16, #tpu.memory_space<vmem>>, vector<256x64xbf16>
    tpu.vector_store %arg16[%c0_158, %c256], %90 {strides = array<i32>} : memref<256x576xbf16, #tpu.memory_space<vmem>>, vector<256x64xbf16>,
    %c0_159 = arith.constant 0 : index
    %c1_160 = arith.constant 1 : index
    %c2_161 = arith.constant 2 : index
    %c0_162 = arith.constant 0 : index
    %92 = vector.load %arg12[%c0_159, %c1_160, %c2_161, %c0_162] : memref<1x18x18x64xf32, #tpu.memory_space<vmem>>, vector<1x16x16x64xf32>
    %93 = vector.shape_cast %92 : vector<1x16x16x64xf32> to vector<256x64xf32>
    %94 = arith.truncf %93 : vector<256x64xf32> to vector<256x64xbf16>
    %c0_163 = arith.constant 0 : index
    %c320 = arith.constant 320 : index
    %95 = vector.load %arg16[%c0_163, %c320] : memref<256x576xbf16, #tpu.memory_space<vmem>>, vector<256x64xbf16>
    tpu.vector_store %arg16[%c0_163, %c320], %94 {strides = array<i32>} : memref<256x576xbf16, #tpu.memory_space<vmem>>, vector<256x64xbf16>,
    %c0_164 = arith.constant 0 : index
    %c2_165 = arith.constant 2 : index
    %c0_166 = arith.constant 0 : index
    %c0_167 = arith.constant 0 : index
    %96 = vector.load %arg12[%c0_164, %c2_165, %c0_166, %c0_167] : memref<1x18x18x64xf32, #tpu.memory_space<vmem>>, vector<1x16x16x64xf32>
    %97 = vector.shape_cast %96 : vector<1x16x16x64xf32> to vector<256x64xf32>
    %98 = arith.truncf %97 : vector<256x64xf32> to vector<256x64xbf16>
    %c0_168 = arith.constant 0 : index
    %c384 = arith.constant 384 : index
    %99 = vector.load %arg16[%c0_168, %c384] : memref<256x576xbf16, #tpu.memory_space<vmem>>, vector<256x64xbf16>
    tpu.vector_store %arg16[%c0_168, %c384], %98 {strides = array<i32>} : memref<256x576xbf16, #tpu.memory_space<vmem>>, vector<256x64xbf16>,
    %c0_169 = arith.constant 0 : index
    %c2_170 = arith.constant 2 : index
    %c1_171 = arith.constant 1 : index
    %c0_172 = arith.constant 0 : index
    %100 = vector.load %arg12[%c0_169, %c2_170, %c1_171, %c0_172] : memref<1x18x18x64xf32, #tpu.memory_space<vmem>>, vector<1x16x16x64xf32>
    %101 = vector.shape_cast %100 : vector<1x16x16x64xf32> to vector<256x64xf32>
    %102 = arith.truncf %101 : vector<256x64xf32> to vector<256x64xbf16>
    %c0_173 = arith.constant 0 : index
    %c448 = arith.constant 448 : index
    %103 = vector.load %arg16[%c0_173, %c448] : memref<256x576xbf16, #tpu.memory_space<vmem>>, vector<256x64xbf16>
    tpu.vector_store %arg16[%c0_173, %c448], %102 {strides = array<i32>} : memref<256x576xbf16, #tpu.memory_space<vmem>>, vector<256x64xbf16>,
    %c0_174 = arith.constant 0 : index
    %c2_175 = arith.constant 2 : index
    %c2_176 = arith.constant 2 : index
    %c0_177 = arith.constant 0 : index
    %104 = vector.load %arg12[%c0_174, %c2_175, %c2_176, %c0_177] : memref<1x18x18x64xf32, #tpu.memory_space<vmem>>, vector<1x16x16x64xf32>
    %105 = vector.shape_cast %104 : vector<1x16x16x64xf32> to vector<256x64xf32>
    %106 = arith.truncf %105 : vector<256x64xf32> to vector<256x64xbf16>
    %c0_178 = arith.constant 0 : index
    %c512 = arith.constant 512 : index
    %107 = vector.load %arg16[%c0_178, %c512] : memref<256x576xbf16, #tpu.memory_space<vmem>>, vector<256x64xbf16>
    tpu.vector_store %arg16[%c0_178, %c512], %106 {strides = array<i32>} : memref<256x576xbf16, #tpu.memory_space<vmem>>, vector<256x64xbf16>,
    %c0_179 = arith.constant 0 : index
    %c0_180 = arith.constant 0 : index
    %108 = vector.load %arg16[%c0_179, %c0_180] : memref<256x576xbf16, #tpu.memory_space<vmem>>, vector<256x576xbf16>
    %c0_181 = arith.constant 0 : index
    %c0_182 = arith.constant 0 : index
    %109 = vector.load %arg4[%c0_181, %c0_182] : memref<576x64xbf16, #tpu.memory_space<vmem>>, vector<576x64xbf16>
    %cst_183 = arith.constant dense<0.000000e+00> : vector<256x64xf32>
    %110 = tpu.matmul %108, %109, %cst_183 {dimension_numbers = #tpu.dot_dimension_numbers<[1], [0], [0], [1], [0, 0, 1, 1], [], []>} : vector<256x576xbf16>, vector<576x64xbf16>, vector<256x64xf32> -> vector<256x64xf32>
    %c0_184 = arith.constant 0 : index
    %c0_185 = arith.constant 0 : index
    %111 = vector.load %arg5[%c0_184, %c0_185] : memref<1x64xf32, #tpu.memory_space<vmem>>, vector<1x64xf32>
    %112 = vector.broadcast %111 : vector<1x64xf32> to vector<256x64xf32>
    %113 = arith.addf %110, %112 : vector<256x64xf32>
    %cst_186 = arith.constant 0.000000e+00 : f32
    %114 = vector.broadcast %cst_186 : f32 to vector<256x64xf32>
    %115 = arith.maximumf %113, %114 : vector<256x64xf32>
    %116 = vector.shape_cast %115 : vector<256x64xf32> to vector<8x2x16x64xf32>
    %c0_187 = arith.constant 0 : index
    %c0_188 = arith.constant 0 : index
    %c0_189 = arith.constant 0 : index
    %c0_190 = arith.constant 0 : index
    %117 = vector.load %arg19[%c0_187, %c0_188, %c0_189, %c0_190] : memref<8x2x16x64xf32, #tpu.memory_space<vmem>>, vector<8x2x16x64xf32>
    tpu.vector_store %arg19[%c0_187, %c0_188, %c0_189, %c0_190], %116 {strides = array<i32>} : memref<8x2x16x64xf32, #tpu.memory_space<vmem>>, vector<8x2x16x64xf32>,
    %c0_191 = arith.constant 0 : index
    %c0_192 = arith.constant 0 : index
    %c0_193 = arith.constant 0 : index
    %c0_194 = arith.constant 0 : index
    %118 = tpu.strided_load %arg19[%c0_191, %c0_192, %c0_193, %c0_194] {strides = array<i32: 1, 1, 2, 1>} : memref<8x2x16x64xf32, #tpu.memory_space<vmem>>, vector<8x1x8x64xf32>
    %c0_195 = arith.constant 0 : index
    %c0_196 = arith.constant 0 : index
    %c1_197 = arith.constant 1 : index
    %c0_198 = arith.constant 0 : index
    %119 = tpu.strided_load %arg19[%c0_195, %c0_196, %c1_197, %c0_198] {strides = array<i32: 1, 1, 2, 1>} : memref<8x2x16x64xf32, #tpu.memory_space<vmem>>, vector<8x1x8x64xf32>
    %c0_199 = arith.constant 0 : index
    %c1_200 = arith.constant 1 : index
    %c0_201 = arith.constant 0 : index
    %c0_202 = arith.constant 0 : index
    %120 = tpu.strided_load %arg19[%c0_199, %c1_200, %c0_201, %c0_202] {strides = array<i32: 1, 1, 2, 1>} : memref<8x2x16x64xf32, #tpu.memory_space<vmem>>, vector<8x1x8x64xf32>
    %c0_203 = arith.constant 0 : index
    %c1_204 = arith.constant 1 : index
    %c1_205 = arith.constant 1 : index
    %c0_206 = arith.constant 0 : index
    %121 = tpu.strided_load %arg19[%c0_203, %c1_204, %c1_205, %c0_206] {strides = array<i32: 1, 1, 2, 1>} : memref<8x2x16x64xf32, #tpu.memory_space<vmem>>, vector<8x1x8x64xf32>
    %122 = arith.addf %118, %119 : vector<8x1x8x64xf32>
    %123 = arith.addf %120, %121 : vector<8x1x8x64xf32>
    %124 = arith.addf %122, %123 : vector<8x1x8x64xf32>
    %cst_207 = arith.constant 2.500000e-01 : f32
    %125 = vector.broadcast %cst_207 : f32 to vector<8x1x8x64xf32>
    %126 = arith.mulf %124, %125 : vector<8x1x8x64xf32>
    %127 = vector.shape_cast %126 : vector<8x1x8x64xf32> to vector<1x8x8x64xf32>
    %c0_208 = arith.constant 0 : index
    %c1_209 = arith.constant 1 : index
    %c1_210 = arith.constant 1 : index
    %c0_211 = arith.constant 0 : index
    %128 = vector.load %arg13[%c0_208, %c1_209, %c1_210, %c0_211] : memref<1x10x10x64xf32, #tpu.memory_space<vmem>>, vector<1x8x8x64xf32>
    tpu.vector_store %arg13[%c0_208, %c1_209, %c1_210, %c0_211], %127 {strides = array<i32>} : memref<1x10x10x64xf32, #tpu.memory_space<vmem>>, vector<1x8x8x64xf32>,
    %c0_212 = arith.constant 0 : index
    %c0_213 = arith.constant 0 : index
    %c0_214 = arith.constant 0 : index
    %c0_215 = arith.constant 0 : index
    %129 = vector.load %arg13[%c0_212, %c0_213, %c0_214, %c0_215] : memref<1x10x10x64xf32, #tpu.memory_space<vmem>>, vector<1x8x8x64xf32>
    %130 = vector.shape_cast %129 : vector<1x8x8x64xf32> to vector<64x64xf32>
    %131 = arith.truncf %130 : vector<64x64xf32> to vector<64x64xbf16>
    %c0_216 = arith.constant 0 : index
    %c0_217 = arith.constant 0 : index
    %132 = vector.load %arg17[%c0_216, %c0_217] : memref<64x576xbf16, #tpu.memory_space<vmem>>, vector<64x64xbf16>
    tpu.vector_store %arg17[%c0_216, %c0_217], %131 {strides = array<i32>} : memref<64x576xbf16, #tpu.memory_space<vmem>>, vector<64x64xbf16>,
    %c0_218 = arith.constant 0 : index
    %c0_219 = arith.constant 0 : index
    %c1_220 = arith.constant 1 : index
    %c0_221 = arith.constant 0 : index
    %133 = vector.load %arg13[%c0_218, %c0_219, %c1_220, %c0_221] : memref<1x10x10x64xf32, #tpu.memory_space<vmem>>, vector<1x8x8x64xf32>
    %134 = vector.shape_cast %133 : vector<1x8x8x64xf32> to vector<64x64xf32>
    %135 = arith.truncf %134 : vector<64x64xf32> to vector<64x64xbf16>
    %c0_222 = arith.constant 0 : index
    %c64_223 = arith.constant 64 : index
    %136 = vector.load %arg17[%c0_222, %c64_223] : memref<64x576xbf16, #tpu.memory_space<vmem>>, vector<64x64xbf16>
    tpu.vector_store %arg17[%c0_222, %c64_223], %135 {strides = array<i32>} : memref<64x576xbf16, #tpu.memory_space<vmem>>, vector<64x64xbf16>,
    %c0_224 = arith.constant 0 : index
    %c0_225 = arith.constant 0 : index
    %c2_226 = arith.constant 2 : index
    %c0_227 = arith.constant 0 : index
    %137 = vector.load %arg13[%c0_224, %c0_225, %c2_226, %c0_227] : memref<1x10x10x64xf32, #tpu.memory_space<vmem>>, vector<1x8x8x64xf32>
    %138 = vector.shape_cast %137 : vector<1x8x8x64xf32> to vector<64x64xf32>
    %139 = arith.truncf %138 : vector<64x64xf32> to vector<64x64xbf16>
    %c0_228 = arith.constant 0 : index
    %c128_229 = arith.constant 128 : index
    %140 = vector.load %arg17[%c0_228, %c128_229] : memref<64x576xbf16, #tpu.memory_space<vmem>>, vector<64x64xbf16>
    tpu.vector_store %arg17[%c0_228, %c128_229], %139 {strides = array<i32>} : memref<64x576xbf16, #tpu.memory_space<vmem>>, vector<64x64xbf16>,
    %c0_230 = arith.constant 0 : index
    %c1_231 = arith.constant 1 : index
    %c0_232 = arith.constant 0 : index
    %c0_233 = arith.constant 0 : index
    %141 = vector.load %arg13[%c0_230, %c1_231, %c0_232, %c0_233] : memref<1x10x10x64xf32, #tpu.memory_space<vmem>>, vector<1x8x8x64xf32>
    %142 = vector.shape_cast %141 : vector<1x8x8x64xf32> to vector<64x64xf32>
    %143 = arith.truncf %142 : vector<64x64xf32> to vector<64x64xbf16>
    %c0_234 = arith.constant 0 : index
    %c192_235 = arith.constant 192 : index
    %144 = vector.load %arg17[%c0_234, %c192_235] : memref<64x576xbf16, #tpu.memory_space<vmem>>, vector<64x64xbf16>
    tpu.vector_store %arg17[%c0_234, %c192_235], %143 {strides = array<i32>} : memref<64x576xbf16, #tpu.memory_space<vmem>>, vector<64x64xbf16>,
    %c0_236 = arith.constant 0 : index
    %c1_237 = arith.constant 1 : index
    %c1_238 = arith.constant 1 : index
    %c0_239 = arith.constant 0 : index
    %145 = vector.load %arg13[%c0_236, %c1_237, %c1_238, %c0_239] : memref<1x10x10x64xf32, #tpu.memory_space<vmem>>, vector<1x8x8x64xf32>
    %146 = vector.shape_cast %145 : vector<1x8x8x64xf32> to vector<64x64xf32>
    %147 = arith.truncf %146 : vector<64x64xf32> to vector<64x64xbf16>
    %c0_240 = arith.constant 0 : index
    %c256_241 = arith.constant 256 : index
    %148 = vector.load %arg17[%c0_240, %c256_241] : memref<64x576xbf16, #tpu.memory_space<vmem>>, vector<64x64xbf16>
    tpu.vector_store %arg17[%c0_240, %c256_241], %147 {strides = array<i32>} : memref<64x576xbf16, #tpu.memory_space<vmem>>, vector<64x64xbf16>,
    %c0_242 = arith.constant 0 : index
    %c1_243 = arith.constant 1 : index
    %c2_244 = arith.constant 2 : index
    %c0_245 = arith.constant 0 : index
    %149 = vector.load %arg13[%c0_242, %c1_243, %c2_244, %c0_245] : memref<1x10x10x64xf32, #tpu.memory_space<vmem>>, vector<1x8x8x64xf32>
    %150 = vector.shape_cast %149 : vector<1x8x8x64xf32> to vector<64x64xf32>
    %151 = arith.truncf %150 : vector<64x64xf32> to vector<64x64xbf16>
    %c0_246 = arith.constant 0 : index
    %c320_247 = arith.constant 320 : index
    %152 = vector.load %arg17[%c0_246, %c320_247] : memref<64x576xbf16, #tpu.memory_space<vmem>>, vector<64x64xbf16>
    tpu.vector_store %arg17[%c0_246, %c320_247], %151 {strides = array<i32>} : memref<64x576xbf16, #tpu.memory_space<vmem>>, vector<64x64xbf16>,
    %c0_248 = arith.constant 0 : index
    %c2_249 = arith.constant 2 : index
    %c0_250 = arith.constant 0 : index
    %c0_251 = arith.constant 0 : index
    %153 = vector.load %arg13[%c0_248, %c2_249, %c0_250, %c0_251] : memref<1x10x10x64xf32, #tpu.memory_space<vmem>>, vector<1x8x8x64xf32>
    %154 = vector.shape_cast %153 : vector<1x8x8x64xf32> to vector<64x64xf32>
    %155 = arith.truncf %154 : vector<64x64xf32> to vector<64x64xbf16>
    %c0_252 = arith.constant 0 : index
    %c384_253 = arith.constant 384 : index
    %156 = vector.load %arg17[%c0_252, %c384_253] : memref<64x576xbf16, #tpu.memory_space<vmem>>, vector<64x64xbf16>
    tpu.vector_store %arg17[%c0_252, %c384_253], %155 {strides = array<i32>} : memref<64x576xbf16, #tpu.memory_space<vmem>>, vector<64x64xbf16>,
    %c0_254 = arith.constant 0 : index
    %c2_255 = arith.constant 2 : index
    %c1_256 = arith.constant 1 : index
    %c0_257 = arith.constant 0 : index
    %157 = vector.load %arg13[%c0_254, %c2_255, %c1_256, %c0_257] : memref<1x10x10x64xf32, #tpu.memory_space<vmem>>, vector<1x8x8x64xf32>
    %158 = vector.shape_cast %157 : vector<1x8x8x64xf32> to vector<64x64xf32>
    %159 = arith.truncf %158 : vector<64x64xf32> to vector<64x64xbf16>
    %c0_258 = arith.constant 0 : index
    %c448_259 = arith.constant 448 : index
    %160 = vector.load %arg17[%c0_258, %c448_259] : memref<64x576xbf16, #tpu.memory_space<vmem>>, vector<64x64xbf16>
    tpu.vector_store %arg17[%c0_258, %c448_259], %159 {strides = array<i32>} : memref<64x576xbf16, #tpu.memory_space<vmem>>, vector<64x64xbf16>,
    %c0_260 = arith.constant 0 : index
    %c2_261 = arith.constant 2 : index
    %c2_262 = arith.constant 2 : index
    %c0_263 = arith.constant 0 : index
    %161 = vector.load %arg13[%c0_260, %c2_261, %c2_262, %c0_263] : memref<1x10x10x64xf32, #tpu.memory_space<vmem>>, vector<1x8x8x64xf32>
    %162 = vector.shape_cast %161 : vector<1x8x8x64xf32> to vector<64x64xf32>
    %163 = arith.truncf %162 : vector<64x64xf32> to vector<64x64xbf16>
    %c0_264 = arith.constant 0 : index
    %c512_265 = arith.constant 512 : index
    %164 = vector.load %arg17[%c0_264, %c512_265] : memref<64x576xbf16, #tpu.memory_space<vmem>>, vector<64x64xbf16>
    tpu.vector_store %arg17[%c0_264, %c512_265], %163 {strides = array<i32>} : memref<64x576xbf16, #tpu.memory_space<vmem>>, vector<64x64xbf16>,
    %c0_266 = arith.constant 0 : index
    %c0_267 = arith.constant 0 : index
    %165 = vector.load %arg17[%c0_266, %c0_267] : memref<64x576xbf16, #tpu.memory_space<vmem>>, vector<64x576xbf16>
    %c0_268 = arith.constant 0 : index
    %c0_269 = arith.constant 0 : index
    %166 = vector.load %arg6[%c0_268, %c0_269] : memref<576x128xbf16, #tpu.memory_space<vmem>>, vector<576x128xbf16>
    %cst_270 = arith.constant dense<0.000000e+00> : vector<64x128xf32>
    %167 = tpu.matmul %165, %166, %cst_270 {dimension_numbers = #tpu.dot_dimension_numbers<[1], [0], [0], [1], [0, 0, 1, 1], [], []>} : vector<64x576xbf16>, vector<576x128xbf16>, vector<64x128xf32> -> vector<64x128xf32>
    %c0_271 = arith.constant 0 : index
    %c0_272 = arith.constant 0 : index
    %168 = vector.load %arg7[%c0_271, %c0_272] : memref<1x128xf32, #tpu.memory_space<vmem>>, vector<1x128xf32>
    %169 = vector.broadcast %168 : vector<1x128xf32> to vector<64x128xf32>
    %170 = arith.addf %167, %169 : vector<64x128xf32>
    %cst_273 = arith.constant 0.000000e+00 : f32
    %171 = vector.broadcast %cst_273 : f32 to vector<64x128xf32>
    %172 = arith.maximumf %170, %171 : vector<64x128xf32>
    %173 = vector.shape_cast %172 : vector<64x128xf32> to vector<1x8x8x128xf32>
    %c0_274 = arith.constant 0 : index
    %c1_275 = arith.constant 1 : index
    %c1_276 = arith.constant 1 : index
    %c0_277 = arith.constant 0 : index
    %174 = vector.load %arg14[%c0_274, %c1_275, %c1_276, %c0_277] : memref<1x10x10x128xf32, #tpu.memory_space<vmem>>, vector<1x8x8x128xf32>
    tpu.vector_store %arg14[%c0_274, %c1_275, %c1_276, %c0_277], %173 {strides = array<i32>} : memref<1x10x10x128xf32, #tpu.memory_space<vmem>>, vector<1x8x8x128xf32>,
    %c0_278 = arith.constant 0 : index
    %c0_279 = arith.constant 0 : index
    %c0_280 = arith.constant 0 : index
    %c0_281 = arith.constant 0 : index
    %175 = vector.load %arg14[%c0_278, %c0_279, %c0_280, %c0_281] : memref<1x10x10x128xf32, #tpu.memory_space<vmem>>, vector<1x8x8x128xf32>
    %176 = vector.shape_cast %175 : vector<1x8x8x128xf32> to vector<64x128xf32>
    %177 = arith.truncf %176 : vector<64x128xf32> to vector<64x128xbf16>
    %c0_282 = arith.constant 0 : index
    %c0_283 = arith.constant 0 : index
    %178 = vector.load %arg18[%c0_282, %c0_283] : memref<64x1152xbf16, #tpu.memory_space<vmem>>, vector<64x128xbf16>
    tpu.vector_store %arg18[%c0_282, %c0_283], %177 {strides = array<i32>} : memref<64x1152xbf16, #tpu.memory_space<vmem>>, vector<64x128xbf16>,
    %c0_284 = arith.constant 0 : index
    %c0_285 = arith.constant 0 : index
    %c1_286 = arith.constant 1 : index
    %c0_287 = arith.constant 0 : index
    %179 = vector.load %arg14[%c0_284, %c0_285, %c1_286, %c0_287] : memref<1x10x10x128xf32, #tpu.memory_space<vmem>>, vector<1x8x8x128xf32>
    %180 = vector.shape_cast %179 : vector<1x8x8x128xf32> to vector<64x128xf32>
    %181 = arith.truncf %180 : vector<64x128xf32> to vector<64x128xbf16>
    %c0_288 = arith.constant 0 : index
    %c128_289 = arith.constant 128 : index
    %182 = vector.load %arg18[%c0_288, %c128_289] : memref<64x1152xbf16, #tpu.memory_space<vmem>>, vector<64x128xbf16>
    tpu.vector_store %arg18[%c0_288, %c128_289], %181 {strides = array<i32>} : memref<64x1152xbf16, #tpu.memory_space<vmem>>, vector<64x128xbf16>,
    %c0_290 = arith.constant 0 : index
    %c0_291 = arith.constant 0 : index
    %c2_292 = arith.constant 2 : index
    %c0_293 = arith.constant 0 : index
    %183 = vector.load %arg14[%c0_290, %c0_291, %c2_292, %c0_293] : memref<1x10x10x128xf32, #tpu.memory_space<vmem>>, vector<1x8x8x128xf32>
    %184 = vector.shape_cast %183 : vector<1x8x8x128xf32> to vector<64x128xf32>
    %185 = arith.truncf %184 : vector<64x128xf32> to vector<64x128xbf16>
    %c0_294 = arith.constant 0 : index
    %c256_295 = arith.constant 256 : index
    %186 = vector.load %arg18[%c0_294, %c256_295] : memref<64x1152xbf16, #tpu.memory_space<vmem>>, vector<64x128xbf16>
    tpu.vector_store %arg18[%c0_294, %c256_295], %185 {strides = array<i32>} : memref<64x1152xbf16, #tpu.memory_space<vmem>>, vector<64x128xbf16>,
    %c0_296 = arith.constant 0 : index
    %c1_297 = arith.constant 1 : index
    %c0_298 = arith.constant 0 : index
    %c0_299 = arith.constant 0 : index
    %187 = vector.load %arg14[%c0_296, %c1_297, %c0_298, %c0_299] : memref<1x10x10x128xf32, #tpu.memory_space<vmem>>, vector<1x8x8x128xf32>
    %188 = vector.shape_cast %187 : vector<1x8x8x128xf32> to vector<64x128xf32>
    %189 = arith.truncf %188 : vector<64x128xf32> to vector<64x128xbf16>
    %c0_300 = arith.constant 0 : index
    %c384_301 = arith.constant 384 : index
    %190 = vector.load %arg18[%c0_300, %c384_301] : memref<64x1152xbf16, #tpu.memory_space<vmem>>, vector<64x128xbf16>
    tpu.vector_store %arg18[%c0_300, %c384_301], %189 {strides = array<i32>} : memref<64x1152xbf16, #tpu.memory_space<vmem>>, vector<64x128xbf16>,
    %c0_302 = arith.constant 0 : index
    %c1_303 = arith.constant 1 : index
    %c1_304 = arith.constant 1 : index
    %c0_305 = arith.constant 0 : index
    %191 = vector.load %arg14[%c0_302, %c1_303, %c1_304, %c0_305] : memref<1x10x10x128xf32, #tpu.memory_space<vmem>>, vector<1x8x8x128xf32>
    %192 = vector.shape_cast %191 : vector<1x8x8x128xf32> to vector<64x128xf32>
    %193 = arith.truncf %192 : vector<64x128xf32> to vector<64x128xbf16>
    %c0_306 = arith.constant 0 : index
    %c512_307 = arith.constant 512 : index
    %194 = vector.load %arg18[%c0_306, %c512_307] : memref<64x1152xbf16, #tpu.memory_space<vmem>>, vector<64x128xbf16>
    tpu.vector_store %arg18[%c0_306, %c512_307], %193 {strides = array<i32>} : memref<64x1152xbf16, #tpu.memory_space<vmem>>, vector<64x128xbf16>,
    %c0_308 = arith.constant 0 : index
    %c1_309 = arith.constant 1 : index
    %c2_310 = arith.constant 2 : index
    %c0_311 = arith.constant 0 : index
    %195 = vector.load %arg14[%c0_308, %c1_309, %c2_310, %c0_311] : memref<1x10x10x128xf32, #tpu.memory_space<vmem>>, vector<1x8x8x128xf32>
    %196 = vector.shape_cast %195 : vector<1x8x8x128xf32> to vector<64x128xf32>
    %197 = arith.truncf %196 : vector<64x128xf32> to vector<64x128xbf16>
    %c0_312 = arith.constant 0 : index
    %c640 = arith.constant 640 : index
    %198 = vector.load %arg18[%c0_312, %c640] : memref<64x1152xbf16, #tpu.memory_space<vmem>>, vector<64x128xbf16>
    tpu.vector_store %arg18[%c0_312, %c640], %197 {strides = array<i32>} : memref<64x1152xbf16, #tpu.memory_space<vmem>>, vector<64x128xbf16>,
    %c0_313 = arith.constant 0 : index
    %c2_314 = arith.constant 2 : index
    %c0_315 = arith.constant 0 : index
    %c0_316 = arith.constant 0 : index
    %199 = vector.load %arg14[%c0_313, %c2_314, %c0_315, %c0_316] : memref<1x10x10x128xf32, #tpu.memory_space<vmem>>, vector<1x8x8x128xf32>
    %200 = vector.shape_cast %199 : vector<1x8x8x128xf32> to vector<64x128xf32>
    %201 = arith.truncf %200 : vector<64x128xf32> to vector<64x128xbf16>
    %c0_317 = arith.constant 0 : index
    %c768 = arith.constant 768 : index
    %202 = vector.load %arg18[%c0_317, %c768] : memref<64x1152xbf16, #tpu.memory_space<vmem>>, vector<64x128xbf16>
    tpu.vector_store %arg18[%c0_317, %c768], %201 {strides = array<i32>} : memref<64x1152xbf16, #tpu.memory_space<vmem>>, vector<64x128xbf16>,
    %c0_318 = arith.constant 0 : index
    %c2_319 = arith.constant 2 : index
    %c1_320 = arith.constant 1 : index
    %c0_321 = arith.constant 0 : index
    %203 = vector.load %arg14[%c0_318, %c2_319, %c1_320, %c0_321] : memref<1x10x10x128xf32, #tpu.memory_space<vmem>>, vector<1x8x8x128xf32>
    %204 = vector.shape_cast %203 : vector<1x8x8x128xf32> to vector<64x128xf32>
    %205 = arith.truncf %204 : vector<64x128xf32> to vector<64x128xbf16>
    %c0_322 = arith.constant 0 : index
    %c896 = arith.constant 896 : index
    %206 = vector.load %arg18[%c0_322, %c896] : memref<64x1152xbf16, #tpu.memory_space<vmem>>, vector<64x128xbf16>
    tpu.vector_store %arg18[%c0_322, %c896], %205 {strides = array<i32>} : memref<64x1152xbf16, #tpu.memory_space<vmem>>, vector<64x128xbf16>,
    %c0_323 = arith.constant 0 : index
    %c2_324 = arith.constant 2 : index
    %c2_325 = arith.constant 2 : index
    %c0_326 = arith.constant 0 : index
    %207 = vector.load %arg14[%c0_323, %c2_324, %c2_325, %c0_326] : memref<1x10x10x128xf32, #tpu.memory_space<vmem>>, vector<1x8x8x128xf32>
    %208 = vector.shape_cast %207 : vector<1x8x8x128xf32> to vector<64x128xf32>
    %209 = arith.truncf %208 : vector<64x128xf32> to vector<64x128xbf16>
    %c0_327 = arith.constant 0 : index
    %c1024 = arith.constant 1024 : index
    %210 = vector.load %arg18[%c0_327, %c1024] : memref<64x1152xbf16, #tpu.memory_space<vmem>>, vector<64x128xbf16>
    tpu.vector_store %arg18[%c0_327, %c1024], %209 {strides = array<i32>} : memref<64x1152xbf16, #tpu.memory_space<vmem>>, vector<64x128xbf16>,
    %c0_328 = arith.constant 0 : index
    %c0_329 = arith.constant 0 : index
    %211 = vector.load %arg18[%c0_328, %c0_329] : memref<64x1152xbf16, #tpu.memory_space<vmem>>, vector<64x1152xbf16>
    %c0_330 = arith.constant 0 : index
    %c0_331 = arith.constant 0 : index
    %212 = vector.load %arg8[%c0_330, %c0_331] : memref<1152x128xbf16, #tpu.memory_space<vmem>>, vector<1152x128xbf16>
    %cst_332 = arith.constant dense<0.000000e+00> : vector<64x128xf32>
    %213 = tpu.matmul %211, %212, %cst_332 {dimension_numbers = #tpu.dot_dimension_numbers<[1], [0], [0], [1], [0, 0, 1, 1], [], []>} : vector<64x1152xbf16>, vector<1152x128xbf16>, vector<64x128xf32> -> vector<64x128xf32>
    %c0_333 = arith.constant 0 : index
    %c0_334 = arith.constant 0 : index
    %214 = vector.load %arg9[%c0_333, %c0_334] : memref<1x128xf32, #tpu.memory_space<vmem>>, vector<1x128xf32>
    %215 = vector.broadcast %214 : vector<1x128xf32> to vector<64x128xf32>
    %216 = arith.addf %213, %215 : vector<64x128xf32>
    %cst_335 = arith.constant 0.000000e+00 : f32
    %217 = vector.broadcast %cst_335 : f32 to vector<64x128xf32>
    %218 = arith.maximumf %216, %217 : vector<64x128xf32>
    %219 = vector.shape_cast %218 : vector<64x128xf32> to vector<1x64x128xf32>
    %cst_336 = arith.constant dense<0.000000e+00> : vector<1x128xf32>
    %220 = vector.multi_reduction <add>, %219, %cst_336 [1] : vector<1x64x128xf32> to vector<1x128xf32>
    %221 = vector.shape_cast %220 : vector<1x128xf32> to vector<1x1x128xf32>
    %cst_337 = arith.constant 6.400000e+01 : f32
    %222 = vector.broadcast %cst_337 : f32 to vector<1x1x128xf32>
    %223 = arith.divf %221, %222 : vector<1x1x128xf32>
    %c0_338 = arith.constant 0 : index
    %c0_339 = arith.constant 0 : index
    %c0_340 = arith.constant 0 : index
    %224 = vector.load %arg10[%c0_338, %c0_339, %c0_340] : memref<1x1x128xf32, #tpu.memory_space<vmem>>, vector<1x1x128xf32>
    tpu.vector_store %arg10[%c0_338, %c0_339, %c0_340], %223 {strides = array<i32>} : memref<1x1x128xf32, #tpu.memory_space<vmem>>, vector<1x1x128xf32>,
    return
  }
  func.func @transform_0(%arg0: i32) -> (i32, i32, i32, i32) {
    %c0_i32 = arith.constant 0 : i32
    %c0_i32_0 = arith.constant 0 : i32
    %c0_i32_1 = arith.constant 0 : i32
    %c0_i32_2 = arith.constant 0 : i32
    return %arg0, %c0_i32, %c0_i32_0, %c0_i32_1 : i32, i32, i32, i32
  }
  func.func @transform_1(%arg0: i32) -> (i32, i32) {
    %c0_i32 = arith.constant 0 : i32
    %c0_i32_0 = arith.constant 0 : i32
    %c0_i32_1 = arith.constant 0 : i32
    return %c0_i32, %c0_i32_0 : i32, i32
  }
  func.func @transform_2(%arg0: i32) -> (i32, i32) {
    %c0_i32 = arith.constant 0 : i32
    %c0_i32_0 = arith.constant 0 : i32
    %c0_i32_1 = arith.constant 0 : i32
    return %c0_i32, %c0_i32_0 : i32, i32
  }
  func.func @transform_3(%arg0: i32) -> (i32, i32) {
    %c0_i32 = arith.constant 0 : i32
    %c0_i32_0 = arith.constant 0 : i32
    %c0_i32_1 = arith.constant 0 : i32
    return %c0_i32, %c0_i32_0 : i32, i32
  }
  func.func @transform_4(%arg0: i32) -> (i32, i32) {
    %c0_i32 = arith.constant 0 : i32
    %c0_i32_0 = arith.constant 0 : i32
    %c0_i32_1 = arith.constant 0 : i32
    return %c0_i32, %c0_i32_0 : i32, i32
  }
  func.func @transform_5(%arg0: i32) -> (i32, i32) {
    %c0_i32 = arith.constant 0 : i32
    %c0_i32_0 = arith.constant 0 : i32
    %c0_i32_1 = arith.constant 0 : i32
    return %c0_i32, %c0_i32_0 : i32, i32
  }
  func.func @transform_6(%arg0: i32) -> (i32, i32) {
    %c0_i32 = arith.constant 0 : i32
    %c0_i32_0 = arith.constant 0 : i32
    %c0_i32_1 = arith.constant 0 : i32
    return %c0_i32, %c0_i32_0 : i32, i32
  }
  func.func @transform_7(%arg0: i32) -> (i32, i32) {
    %c0_i32 = arith.constant 0 : i32
    %c0_i32_0 = arith.constant 0 : i32
    %c0_i32_1 = arith.constant 0 : i32
    return %c0_i32, %c0_i32_0 : i32, i32
  }
  func.func @transform_8(%arg0: i32) -> (i32, i32) {
    %c0_i32 = arith.constant 0 : i32
    %c0_i32_0 = arith.constant 0 : i32
    %c0_i32_1 = arith.constant 0 : i32
    return %c0_i32, %c0_i32_0 : i32, i32
  }
  func.func @transform_9(%arg0: i32) -> (i32, i32, i32) {
    %c0_i32 = arith.constant 0 : i32
    %c0_i32_0 = arith.constant 0 : i32
    %c0_i32_1 = arith.constant 0 : i32
    return %arg0, %c0_i32, %c0_i32_0 : i32, i32, i32
  }
}

</mosaic_0001>

<bundles_post_ra>
// kernel: condition_net_forward.1
= control target key start
LH: loop header
LB: loop body
LE: loop exit
PB: predicated region body
PF: predicated region fallthrough
CT: control target
= control target key end

     0   :  { %14 = vsyncpa [#allocation12], 0  ;;  %s9119_s0 = inlined_call_operand.vmem [shape: f32[2,16,16,8], index: 0, kind: input, shape index: {}]   ;;  %s9120_s1 = inlined_call_operand.vmem [shape: bf16[72,64], index: 1, kind: input, shape index: {}]   ;;  %s9121_s2 = inlined_call_operand.vmem [shape: f32[1,64], index: 2, kind: input, shape index: {}]   ;;  %s9122_s3 = inlined_call_operand.vmem [shape: bf16[576,64], index: 3, kind: input, shape index: {}]   ;;  %s9123_s4 = inlined_call_operand.vmem [shape: f32[1,64], index: 4, kind: input, shape index: {}]   ;;  %s9124_s5 = inlined_call_operand.vmem [shape: bf16[576,128], index: 5, kind: input, shape index: {}]   ;;  %s9125_s6 = inlined_call_operand.vmem [shape: f32[1,128], index: 6, kind: input, shape index: {}]   ;;  %s9126_s7 = inlined_call_operand.vmem [shape: bf16[1152,128], index: 7, kind: input, shape index: {}]   ;;  %s9127_s8 = inlined_call_operand.vmem [shape: f32[1,128], index: 8, kind: input, shape index: {}]   ;;  %s9128_s9 = inlined_call_operand.hbm [shape: f32[2,1,128], index: 9, kind: output, shape index: {}]  }
   0x1   :  { %16 = vsyncpa [#allocation12 + $0x1], 0  ;;  %s6994_s30 = smov 0   ;;  %s6996_s10 = smov 0  }
   0x2   :  { %s6998_s11 = smov 0   ;;  %s7000_s12 = smov 0  }
   0x3 LB: > { %s7015_s13 = sadd.s32 4294967295, %s6932_s12   ;;  %s5825_s14 = sadd.s32 4294967294, %s6932_s12   ;;  %s6932_s12 = sphi %s7000_s12, %s9140_s12   ;;  %s6928_s11 = sphi %s6998_s11, %s9139_s11   ;;  %s6924_s10 = sphi %s6996_s10, %s9138_s10   ;;  %s6920_s30 = sphi %s6994_s30, %s9137_s30  }
   0x4   : > { %s7019_s15 = sadd.s32 1, %s6932_s12   ;;  %s223_s16 = sadd.s32 1, %s6928_s11 }
   0x5   : > { %s220_s17 = ssub.s32 %s6932_s12, %s7019_s15  ;;  %p233_p0 = scmp.ne.s32.totalorder %s6928_s11, %s6924_s10 }
   0x6   : > { %p221_p1 = scmp.eq.s32.totalorder %s220_s17, 0  ;;  %p234_p2 = scmp.eq.s32.totalorder %s7015_s13, 1 }
   0x7   : > { %p239_p3 = scmp.ne.s32.totalorder %s6924_s10, %s6920_s30  ;;  %p240_p4 = scmp.eq.s32.totalorder %s5825_s14, 1 }
   0x8   : > { %s7030_s18 = scalar_select %p221_p1, %s6928_s11, %s223_s16  }
   0x9   : > { %p7032_p5 = por %p234_p2, %p233_p0  ;;  %p7036_p6 = por %p240_p4, %p239_p3 }
   0xa   : > { %p5828_p7 = scmp.ge.s32.totalorder %s6932_s12, 1  ;;  %p290_p8 = scmp.lt.s32.totalorder %s6932_s12, 3 }
   0xc   : > { %p291_p9 = pnand %p5828_p7, %p290_p8 }
   0xd   : > { %vm331_vm0 = vcmask (!%p291_p9), 64512   ;;  %vm334_vm1 = vcmask (!%p291_p9), 58368   ;;  %vm340_vm2 = vcmask (!%p291_p9), 57344   ;;  %v6934_v0 = vmov (!%p291_p9), 0.0   ;;  %p325_p10 = scmp.lt.s32.totalorder (!%p291_p9), %s7015_s13, 1  ;;  %s6935_s26 = smov (!%p291_p9), 8  }
   0xe   : > { %294 = sbr.rel (%p291_p9) target bundleno = 1787 (0x6fb), region = 56  ;;  %332 = vst.msk [vmem:[#allocation2] sm:$0xff] (!%p291_p9), %vm331_vm0, %v6934_v0  ;;  %333 = vst.msk [vmem:[#allocation2 + $0x8] sm:$0xff] (!%p291_p9), %vm331_vm0, %v6934_v0  ;;  %s6936_s27 = smov (!%p291_p9), 16   ;;  %vm1743_vm3 = vcmask (!%p291_p9), 1043456   ;;  %vm714_vm4 = vcmask (!%p291_p9), 130112  }
   0xf   : > { %335 = vst.msk [vmem:[#allocation2 + $0x10] sm:$0x3] (!%p291_p9), %vm334_vm1, %v6934_v0  ;;  %339 = vst.msk [vmem:[#allocation2 + $0x1a8] sm:$0x3] (!%p291_p9), %vm334_vm1, %v6934_v0  ;;  %s6937_s28 = smov (!%p291_p9), 24   ;;  %s6938_s29 = smov (!%p291_p9), 32  }
  0x10   : > { %337 = vst.msk [vmem:[#allocation2 + $0x198] sm:$0xff] (!%p291_p9), %vm331_vm0, %v6934_v0  ;;  %338 = vst.msk [vmem:[#allocation2 + $0x1a0] sm:$0xff] (!%p291_p9), %vm331_vm0, %v6934_v0  ;;  %s9131_s14 = smov (!%p291_p9), 40   ;;  %s9129_s23 = smov (!%p291_p9), 48   ;;  %vm843_vm5 = vcmask (!%p291_p9), 195712   ;;  %vm972_vm6 = vcmask (!%p291_p9), 261312  }
  0x11   : > { %342 = vst.msk [vmem:[#allocation2 + $0x18] sm:$0x1] (!%p291_p9), %vm340_vm2, %v6934_v0  ;;  %343 = vst.msk [vmem:[#allocation2 + $0x30] sm:$0x1] (!%p291_p9), %vm340_vm2, %v6934_v0  ;;  %s6941_s17 = smov (!%p291_p9), 56   ;;  %s6942_s24 = smov (!%p291_p9), 64  }
  0x12   : > { %344 = vst.msk [vmem:[#allocation2 + $0x48] sm:$0x1] (!%p291_p9), %vm340_vm2, %v6934_v0  ;;  %345 = vst.msk [vmem:[#allocation2 + $0x60] sm:$0x1] (!%p291_p9), %vm340_vm2, %v6934_v0  ;;  %vm1101_vm7 = vcmask (!%p291_p9), 326912   ;;  %vm1230_vm8 = vcmask (!%p291_p9), 392512  }
  0x13   : > { %346 = vst.msk [vmem:[#allocation2 + $0x78] sm:$0x1] (!%p291_p9), %vm340_vm2, %v6934_v0  ;;  %347 = vst.msk [vmem:[#allocation2 + $0x90] sm:$0x1] (!%p291_p9), %vm340_vm2, %v6934_v0  ;;  %vm1360_vm9 = vcmask (!%p291_p9), 458112   ;;  %vm1489_vm10 = vcmask (!%p291_p9), 523712  }
  0x14   : > { %348 = vst.msk [vmem:[#allocation2 + $0xa8] sm:$0x1] (!%p291_p9), %vm340_vm2, %v6934_v0  ;;  %349 = vst.msk [vmem:[#allocation2 + $0xc0] sm:$0x1] (!%p291_p9), %vm340_vm2, %v6934_v0  ;;  %vm1618_vm11 = vcmask (!%p291_p9), 589312   ;;  %vm1694_vm12 = vcmask (!%p291_p9), 588800  }
  0x15   : > { %350 = vst.msk [vmem:[#allocation2 + $0xd8] sm:$0x1] %vm340_vm2, %v6934_v0  ;;  %351 = vst.msk [vmem:[#allocation2 + $0xf0] sm:$0x1] %vm340_vm2, %v6934_v0  ;;  %s326_s21 = scalar_select %p325_p10, %s7015_s13, 1  ;;  %v602_v4 = vld [vmem:[#allocation2 + $0x1] sm:$0xff] }
  0x16   : > { %352 = vst.msk [vmem:[#allocation2 + $0x108] sm:$0x1] %vm340_vm2, %v6934_v0  ;;  %353 = vst.msk [vmem:[#allocation2 + $0x120] sm:$0x1] %vm340_vm2, %v6934_v0  ;;  %v603_v5 = vld [vmem:[#allocation2 + $0x9] sm:$0xff]  ;;  %vm377_vm13 = vcmask 523264  }
  0x17   : > { %354 = vst.msk [vmem:[#allocation2 + $0x138] sm:$0x1] %vm340_vm2, %v6934_v0  ;;  %355 = vst.msk [vmem:[#allocation2 + $0x150] sm:$0x1] %vm340_vm2, %v6934_v0  ;;  %s6023_s22 = sshll.u32 %s326_s21, 8  ;;  %v731_v6 = vld [vmem:[#allocation2 + $0x2] sm:$0xff]  ;;  %v634_v7 = vpack.c.bf16 %v603_v5, %v602_v4 }
  0x18   : > { %356 = vst.msk [vmem:[#allocation2 + $0x168] sm:$0x1] %vm340_vm2, %v6934_v0  ;;  %357 = vst.msk [vmem:[#allocation2 + $0x180] sm:$0x1] %vm340_vm2, %v6934_v0  ;;  %s7153_s25 = scalar_lea.vmem %s9119_s0, %s6023_s22  ;;  %v539_v23 = vld [vmem:[#allocation2 + $0x8] sm:$0xff]  ;;  %vm380_vm14 = vcmask 517120  }
  0x19   : > { %360 = vst.msk [vmem:[#allocation2 + $0x29] sm:$0x1] %vm340_vm2, %v6934_v0  ;;  %361 = vst.msk [vmem:[#allocation2 + $0x41] sm:$0x1] %vm340_vm2, %v6934_v0  ;;  %v473_v1 = vld [vmem:[%s7153_s25] sm:$0xff]  ;;  %v474_v2 = vld [vmem:[%s7153_s25 + $0x8] sm:$0xff]  ;;  %666 = vrot.lane.b32.xlu0 %v634_v7, %s6935_s26 }
  0x1a   : > { %362 = vst.msk [vmem:[#allocation2 + $0x59] sm:$0x1] %vm340_vm2, %v6934_v0  ;;  %363 = vst.msk [vmem:[#allocation2 + $0x71] sm:$0x1] %vm340_vm2, %v6934_v0  ;;  %v475_v3 = vld [vmem:[%s7153_s25 + $0x10] sm:$0xff]  ;;  %v476_v9 = vld [vmem:[%s7153_s25 + $0x18] sm:$0xff] }
  0x1b   : > { %364 = vst.msk [vmem:[#allocation2 + $0x89] sm:$0x1] %vm340_vm2, %v6934_v0  ;;  %365 = vst.msk [vmem:[#allocation2 + $0xa1] sm:$0x1] %vm340_vm2, %v6934_v0  ;;  %v477_v10 = vld [vmem:[%s7153_s25 + $0x20] sm:$0xff]  ;;  %v478_v12 = vld [vmem:[%s7153_s25 + $0x28] sm:$0xff] }
  0x1c   : > { %366 = vst.msk [vmem:[#allocation2 + $0xb9] sm:$0x1] %vm340_vm2, %v6934_v0  ;;  %367 = vst.msk [vmem:[#allocation2 + $0xd1] sm:$0x1] %vm340_vm2, %v6934_v0  ;;  %v479_v13 = vld [vmem:[%s7153_s25 + $0x30] sm:$0xff]  ;;  %v480_v14 = vld [vmem:[%s7153_s25 + $0x38] sm:$0xff] }
  0x1d   : > { %368 = vst.msk [vmem:[#allocation2 + $0xe9] sm:$0x1] %vm340_vm2, %v6934_v0  ;;  %369 = vst.msk [vmem:[#allocation2 + $0x101] sm:$0x1] %vm340_vm2, %v6934_v0  ;;  %v481_v15 = vld [vmem:[%s7153_s25 + $0x40] sm:$0xff]  ;;  %v482_v16 = vld [vmem:[%s7153_s25 + $0x48] sm:$0xff] }
  0x1e   : > { %370 = vst.msk [vmem:[#allocation2 + $0x119] sm:$0x1] %vm340_vm2, %v6934_v0  ;;  %371 = vst.msk [vmem:[#allocation2 + $0x131] sm:$0x1] %vm340_vm2, %v6934_v0  ;;  %v483_v17 = vld [vmem:[%s7153_s25 + $0x50] sm:$0xff]  ;;  %v484_v18 = vld [vmem:[%s7153_s25 + $0x58] sm:$0xff] }
  0x1f   : > { %372 = vst.msk [vmem:[#allocation2 + $0x149] sm:$0x1] %vm340_vm2, %v6934_v0  ;;  %373 = vst.msk [vmem:[#allocation2 + $0x161] sm:$0x1] %vm340_vm2, %v6934_v0  ;;  %v485_v19 = vld [vmem:[%s7153_s25 + $0x60] sm:$0xff]  ;;  %v486_v20 = vld [vmem:[%s7153_s25 + $0x68] sm:$0xff] }
  0x20   : > { %374 = vst.msk [vmem:[#allocation2 + $0x179] sm:$0x1] %vm340_vm2, %v6934_v0  ;;  %375 = vst.msk [vmem:[#allocation2 + $0x191] sm:$0x1] %vm340_vm2, %v6934_v0  ;;  %v487_v21 = vld [vmem:[%s7153_s25 + $0x70] sm:$0xff]  ;;  %v488_v22 = vld [vmem:[%s7153_s25 + $0x78] sm:$0xff] }
  0x21   : > { %448 = vst [vmem:[#allocation5] sm:$0xff] %v6934_v0  ;;  %449 = vst [vmem:[#allocation5 + $0x8] sm:$0x3] %v6934_v0  ;;  %v489_v25 = vld [vmem:[%s7153_s25 + $0x80] sm:$0xff]  ;;  %v490_v26 = vld [vmem:[%s7153_s25 + $0x88] sm:$0xff]  ;;  %vm386_vm15 = vcmask 516096  }
  0x22   : > { %451 = vst [vmem:[#allocation5 + $0x90] sm:$0xff] %v6934_v0  ;;  %452 = vst [vmem:[#allocation5 + $0x98] sm:$0x3] %v6934_v0  ;;  %v6721_v4 = vld [vmem:[%s9120_s1 + $0x8] sm:$0xff]   ;;  %v491_v5 = vld [vmem:[%s7153_s25 + $0x90] sm:$0xff] }
  0x23   : > { %454 = vst [vmem:[#allocation5 + $0x10] sm:$0x1] %v6934_v0  ;;  %455 = vst [vmem:[#allocation5 + $0x20] sm:$0x1] %v6934_v0 }
  0x24   : > { %456 = vst [vmem:[#allocation5 + $0x30] sm:$0x1] %v6934_v0  ;;  %457 = vst [vmem:[#allocation5 + $0x40] sm:$0x1] %v6934_v0 }
  0x25   : > { %458 = vst [vmem:[#allocation5 + $0x50] sm:$0x1] %v6934_v0  ;;  %459 = vst [vmem:[#allocation5 + $0x60] sm:$0x1] %v6934_v0 }
  0x26   : > { %460 = vst [vmem:[#allocation5 + $0x70] sm:$0x1] %v6934_v0  ;;  %461 = vst [vmem:[#allocation5 + $0x80] sm:$0x1] %v6934_v0 }
  0x27   : > { %464 = vst [vmem:[#allocation5 + $0x19] sm:$0x1] %v6934_v0  ;;  %465 = vst [vmem:[#allocation5 + $0x29] sm:$0x1] %v6934_v0 }
  0x28   : > { %466 = vst [vmem:[#allocation5 + $0x39] sm:$0x1] %v6934_v0  ;;  %467 = vst [vmem:[#allocation5 + $0x49] sm:$0x1] %v6934_v0 }
  0x29   : > { %468 = vst [vmem:[#allocation5 + $0x59] sm:$0x1] %v6934_v0  ;;  %469 = vst [vmem:[#allocation5 + $0x69] sm:$0x1] %v6934_v0 }
  0x2a   : > { %470 = vst [vmem:[#allocation5 + $0x79] sm:$0x1] %v6934_v0  ;;  %471 = vst [vmem:[#allocation5 + $0x89] sm:$0x1] %v6934_v0 }
  0x2b   : > { %376 = vst.msk [vmem:[#allocation2 + $0x1a9] sm:$0x1] %vm340_vm2, %v6934_v0  ;;  %341 = vst.msk [vmem:[#allocation2] sm:$0x1] %vm340_vm2, %v6934_v0 }
  0x2c   : > { %359 = vst.msk [vmem:[#allocation2 + $0x11] sm:$0x1] %vm340_vm2, %v6934_v0  ;;  %358 = vst.msk [vmem:[#allocation2 + $0x198] sm:$0x1] %vm340_vm2, %v6934_v0 }
  0x2d   : > { %453 = vst [vmem:[#allocation5] sm:$0x1] %v6934_v0  ;;  %462 = vst [vmem:[#allocation5 + $0x90] sm:$0x1] %v6934_v0 }
  0x2e   : > { %463 = vst [vmem:[#allocation5 + $0x9] sm:$0x1] %v6934_v0  ;;  %472 = vst [vmem:[#allocation5 + $0x99] sm:$0x1] %v6934_v0 }
  0x2f   : > { %506 = vst.msk [vmem:[#allocation2 + $0x19] sm:$0xff] %vm331_vm0, %v473_v1  ;;  %507 = vst.msk [vmem:[#allocation2 + $0x21] sm:$0xff] %vm331_vm0, %v474_v2 }
  0x30   : > { %508 = vst.msk [vmem:[#allocation2 + $0x31] sm:$0xff] %vm331_vm0, %v475_v3  ;;  %509 = vst.msk [vmem:[#allocation2 + $0x39] sm:$0xff] %vm331_vm0, %v476_v9  ;;  %v6720_v3 = vld [vmem:[%s9120_s1] sm:$0xff]  }
  0x31   : > { %510 = vst.msk [vmem:[#allocation2 + $0x49] sm:$0xff] %vm331_vm0, %v477_v10  ;;  %511 = vst.msk [vmem:[#allocation2 + $0x51] sm:$0xff] %vm331_vm0, %v478_v12  ;;  %6549 = vmatprep.subr.bf16.mxu0 %v6720_v3  ;;  %v493_v9 = vld [vmem:[%s7153_s25 + $0xa0] sm:$0xff]  ;;  %v494_v10 = vld [vmem:[%s7153_s25 + $0xa8] sm:$0xff] }
  0x32   : > { %512 = vst.msk [vmem:[#allocation2 + $0x61] sm:$0xff] %vm331_vm0, %v479_v13  ;;  %513 = vst.msk [vmem:[#allocation2 + $0x69] sm:$0xff] %vm331_vm0, %v480_v14  ;;  %v538_v24 = vld [vmem:[#allocation2] sm:$0xff]  ;;  %6550 = vmatpush3.bf16.msra.mxu0 %v6720_v3  ;;  %v6722_v12 = vld [vmem:[%s9120_s1 + $0x10] sm:$0xff]  }
  0x33   : > { %v732_v8 = vld [vmem:[#allocation2 + $0xa] sm:$0xff]  ;;  %514 = vst.msk [vmem:[#allocation2 + $0x79] sm:$0xff] %vm331_vm0, %v481_v15  ;;  %515 = vst.msk [vmem:[#allocation2 + $0x81] sm:$0xff] %vm331_vm0, %v482_v16  ;;  %v570_v30 = vpack.c.bf16 %v539_v23, %v538_v24  ;;  %6551 = vmatprep.subr.bf16.mxu0 %v6721_v4  ;;  %v6723_v14 = vld [vmem:[%s9120_s1 + $0x18] sm:$0xff]  }
  0x34   : > { %v763_v11 = vpack.c.bf16 %v732_v8, %v731_v6  ;;  %516 = vst.msk [vmem:[#allocation2 + $0x91] sm:$0xff] %vm331_vm0, %v483_v17  ;;  %517 = vst.msk [vmem:[#allocation2 + $0x99] sm:$0xff] %vm331_vm0, %v484_v18  ;;  %v492_v6 = vld [vmem:[%s7153_s25 + $0x98] sm:$0xff]  ;;  %v6724_v16 = vld [vmem:[%s9120_s1 + $0x20] ss:$0 sps:$4 sm:$0xff]  }
  0x35   : > { %518 = vst.msk [vmem:[#allocation2 + $0xa9] sm:$0xff] %vm331_vm0, %v485_v19  ;;  %519 = vst.msk [vmem:[#allocation2 + $0xb1] sm:$0xff] %vm331_vm0, %v486_v20  ;;  %v495_v23 = vld [vmem:[%s7153_s25 + $0xb0] sm:$0xff]  ;;  %v496_v24 = vld [vmem:[%s7153_s25 + $0xb8] sm:$0xff] }
  0x36   : > { %795 = vrot.lane.b32.xlu1 %v763_v11, %s6936_s27  ;;  %520 = vst.msk [vmem:[#allocation2 + $0xc1] sm:$0xff] %vm331_vm0, %v487_v21  ;;  %521 = vst.msk [vmem:[#allocation2 + $0xc9] sm:$0xff] %vm331_vm0, %v488_v22  ;;  %v604_v27 = vld [vmem:[#allocation2 + $0x19] sm:$0xff]  ;;  %v605_v28 = vld [vmem:[#allocation2 + $0x21] sm:$0xff]  ;;  %6552 = vmatpush3.bf16.msra.mxu0 %v6721_v4  ;;  %v1745_v22 = vsel %vm1743_vm3, %v6724_v16, 0 }
  0x37   : > { %v733_v29 = vld [vmem:[#allocation2 + $0x1a] sm:$0xff]  ;;  %522 = vst.msk [vmem:[#allocation2 + $0xd9] sm:$0xff] %vm331_vm0, %v489_v25  ;;  %523 = vst.msk [vmem:[#allocation2 + $0xe1] sm:$0xff] %vm331_vm0, %v490_v26  ;;  %v635_v31 = vpack.c.bf16 %v605_v28, %v604_v27  ;;  %v734_v32 = vld [vmem:[#allocation2 + $0x22] sm:$0xff]  ;;  %6553 = vmatprep.subr.bf16.mxu0 %v6722_v12 }
  0x38   : > { %v860_v33 = vld [vmem:[#allocation2 + $0x18] sm:$0xff]  ;;  %v861_v34 = vld [vmem:[#allocation2 + $0x20] sm:$0xff]  ;;  %v764_v35 = vpack.c.bf16 %v734_v32, %v733_v29  ;;  %v862_v37 = vld [vmem:[#allocation2 + $0x30] sm:$0xff]  ;;  %586 = vst.msk [vmem:[#allocation6] sm:$0xff] %vm331_vm0, %v570_v30 }
  0x39   : > { %v892_v36 = vpack.c.bf16 %v861_v34, %v860_v33  ;;  %v863_v38 = vld [vmem:[#allocation2 + $0x38] sm:$0xff]  ;;  %668 = vrot.lane.b32.xlu0 %v635_v31, %s6935_s26  ;;  %v1250_v40 = vld [vmem:[#allocation2 + $0x48] sm:$0xff]  ;;  %v1251_v41 = vld [vmem:[#allocation2 + $0x50] sm:$0xff]  ;;  %524 = vst.msk [vmem:[#allocation2 + $0xf1] sm:$0xff] %vm331_vm0, %v491_v5 }
  0x3a   : > { %v893_v39 = vpack.c.bf16 %v863_v38, %v862_v37  ;;  %797 = vrot.lane.b32.xlu1 %v764_v35, %s6936_s27  ;;  %v991_v42 = vld [vmem:[#allocation2 + $0x31] sm:$0xff]  ;;  %v992_v43 = vld [vmem:[#allocation2 + $0x39] sm:$0xff]  ;;  %v7197_v44 = vpack.c.bf16 %v1251_v41, %v1250_v40  ;;  %v867_v46 = vld [vmem:[#allocation2 + $0x68] sm:$0xff]  ;;  %525 = vst.msk [vmem:[#allocation2 + $0xf9] sm:$0xff] %vm331_vm0, %v492_v6  ;;  %6554 = vmatpush3.bf16.msra.mxu0 %v6722_v12 }
  0x3b   : > { %587 = vst.msk [vmem:[#allocation6 + $0x8] sm:$0xff] %vm331_vm0, %v892_v36  ;;  %v866_v45 = vld [vmem:[#allocation2 + $0x60] sm:$0xff]  ;;  %v7206_v48 = vpack.c.bf16 %v992_v43, %v991_v42  ;;  %v1254_v49 = vld [vmem:[#allocation2 + $0x78] sm:$0xff]  ;;  %v870_v54 = vld [vmem:[#allocation2 + $0x90] sm:$0xff]  ;;  %6555 = vmatprep.subr.bf16.mxu0 %v6723_v14 }
  0x3c   : > { %588 = vst.msk [vmem:[#allocation6 + $0x10] sm:$0xff] %vm331_vm0, %v893_v39  ;;  %v7201_v47 = vpack.c.bf16 %v867_v46, %v866_v45  ;;  %589 = vst.msk [vmem:[#allocation6 + $0x18] sm:$0xff] %vm331_vm0, %v7197_v44  ;;  %v1255_v50 = vld [vmem:[#allocation2 + $0x80] sm:$0xff]  ;;  %v1120_v51 = vld [vmem:[#allocation2 + $0x32] sm:$0xff] }
  0x3d   : > { %924 = vrot.lane.b32.xlu0 %v892_v36, %s6937_s28  ;;  %v1121_v52 = vld [vmem:[#allocation2 + $0x3a] sm:$0xff]  ;;  %v7208_v53 = vpack.c.bf16 %v1255_v50, %v1254_v49  ;;  %v1258_v58 = vld [vmem:[#allocation2 + $0xa8] sm:$0xff]  ;;  %v1259_v59 = vld [vmem:[#allocation2 + $0xb0] sm:$0xff]  ;;  %526 = vst.msk [vmem:[#allocation2 + $0x109] sm:$0xff] %vm331_vm0, %v493_v9 }
  0x3e   : > { %926 = vrot.lane.b32.xlu1 %v893_v39, %s6937_s28  ;;  %590 = vst.msk [vmem:[#allocation6 + $0x20] sm:$0xff] %vm331_vm0, %v7201_v47  ;;  %v871_v55 = vld [vmem:[#allocation2 + $0x98] sm:$0xff]  ;;  %v7219_v57 = vpack.c.bf16 %v1121_v52, %v1120_v51  ;;  %v7221_v60 = vpack.c.bf16 %v1259_v59, %v1258_v58  ;;  %v1263_v62 = vld [vmem:[#allocation2 + $0xe0] sm:$0xff]  ;;  %v1379_v63 = vld [vmem:[#allocation2 + $0x49] sm:$0xff]  ;;  %6556 = vmatpush3.bf16.msra.mxu0 %v6723_v14 }
  0x3f   : > { %v7213_v56 = vpack.c.bf16 %v871_v55, %v870_v54  ;;  %591 = vst.msk [vmem:[#allocation6 + $0x28] sm:$0xff] %vm331_vm0, %v7208_v53  ;;  %v1262_v61 = vld [vmem:[#allocation2 + $0xd8] sm:$0xff]  ;;  %v1508_v8 = vld [vmem:[#allocation2 + $0x4a] sm:$0xff]  ;;  %527 = vst.msk [vmem:[#allocation2 + $0x111] sm:$0xff] %vm331_vm0, %v494_v10  ;;  %6671 = vmatprep.subr.msk.bf16.mxu0 %vm1743_vm3, %v6724_v16 }
  0x40   : > { %593 = vst.msk [vmem:[#allocation6 + $0x38] sm:$0xff] %vm331_vm0, %v7221_v60  ;;  %v1380_v1 = vld [vmem:[#allocation2 + $0x51] sm:$0xff]  ;;  %v7230_v2 = vpack.c.bf16 %v1263_v62, %v1262_v61  ;;  %528 = vst.msk [vmem:[#allocation2 + $0x121] sm:$0xff] %vm331_vm0, %v495_v23  ;;  %v995_v25 = vld [vmem:[#allocation2 + $0x61] sm:$0xff] }
  0x41   : > { %1053 = vrot.lane.b32.xlu0 %v635_v31, %s6938_s29  ;;  %592 = vst.msk [vmem:[#allocation6 + $0x30] sm:$0xff] %vm331_vm0, %v7213_v56  ;;  %v1410_v7 = vpack.c.bf16 %v1380_v1, %v1379_v63  ;;  %v1509_v11 = vld [vmem:[#allocation2 + $0x52] sm:$0xff]  ;;  %529 = vst.msk [vmem:[#allocation2 + $0x129] sm:$0xff] %vm331_vm0, %v496_v24  ;;  %v996_v26 = vld [vmem:[#allocation2 + $0x69] sm:$0xff] }
  0x42   : > { %1055 = vrot.lane.b32.xlu1 %v7206_v48, %s6938_s29  ;;  %595 = vst.msk [vmem:[#allocation6 + $0x48] sm:$0xff] %vm331_vm0, %v7230_v2  ;;  %v1539_v13 = vpack.c.bf16 %v1509_v11, %v1508_v8  ;;  %v878_v15 = vld [vmem:[#allocation2 + $0xf0] sm:$0xff]  ;;  %v879_v17 = vld [vmem:[#allocation2 + $0xf8] sm:$0xff]  ;;  %6558 = vmatpush3.bf16.msra.mxu0 %v1745_v22  ;;  %v1024_v30 = vpack.c.bf16 %v996_v26, %v995_v25  ;;  %v1124_v31 = vld [vmem:[#allocation2 + $0x62] sm:$0xff] }
  0x43   : > { %v7266_v18 = vpack.c.bf16 %v879_v17, %v878_v15  ;;  %v1125_v32 = vld [vmem:[#allocation2 + $0x6a] sm:$0xff]  ;;  %v497_v33 = vld [vmem:[%s7153_s25 + $0xc0] sm:$0xff]  ;;  %v500_v46 = vld [vmem:[%s7153_s25 + $0xd8] sm:$0xff]  ;;  %378 = vst.msk [vmem:[#allocation3] sm:$0xff] %vm377_vm13, %v6934_v0 }
  0x44   : > { %v1266_v19 = vld [vmem:[#allocation2 + $0x108] sm:$0xff]  ;;  %530 = vst.msk [vmem:[#allocation2 + $0x139] sm:$0xff] %vm331_vm0, %v497_v33  ;;  %v1383_v36 = vld [vmem:[#allocation2 + $0x79] sm:$0xff]  ;;  %v499_v45 = vld [vmem:[%s7153_s25 + $0xd0] sm:$0xff] }
  0x45   : > { %1182 = vrot.lane.b32.xlu0 %v764_v35, %s9131_s14  ;;  %596 = vst.msk [vmem:[#allocation6 + $0x50] sm:$0xff] %vm331_vm0, %v7266_v18  ;;  %v498_v34 = vld [vmem:[%s7153_s25 + $0xc8] sm:$0xff]  ;;  %v1153_v35 = vpack.c.bf16 %v1125_v32, %v1124_v31  ;;  %v1512_v42 = vld [vmem:[#allocation2 + $0x7a] sm:$0xff]  ;;  %532 = vst.msk [vmem:[#allocation2 + $0x151] sm:$0xff] %vm331_vm0, %v499_v45 }
  0x46   : > { %1184 = vrot.lane.b32.xlu1 %v7219_v57, %s9131_s14  ;;  %v1267_v20 = vld [vmem:[#allocation2 + $0x110] sm:$0xff]  ;;  %531 = vst.msk [vmem:[#allocation2 + $0x141] sm:$0xff] %vm331_vm0, %v498_v34  ;;  %s9135_s14 = smov 40   ;;  %v1384_v37 = vld [vmem:[#allocation2 + $0x81] sm:$0xff]  ;;  %533 = vst.msk [vmem:[#allocation2 + $0x159] sm:$0xff] %vm331_vm0, %v500_v46 }
  0x47   : > { %v7268_v21 = vpack.c.bf16 %v1267_v20, %v1266_v19  ;;  %v882_v27 = vld [vmem:[#allocation2 + $0x120] sm:$0xff]  ;;  %v1412_v41 = vpack.c.bf16 %v1384_v37, %v1383_v36  ;;  %v1128_v54 = vld [vmem:[#allocation2 + $0x92] sm:$0xff]  ;;  %v502_v58 = vld [vmem:[%s7153_s25 + $0xe8] sm:$0xff]  ;;  %379 = vst.msk [vmem:[#allocation3 + $0x8] sm:$0xff] %vm377_vm13, %v6934_v0 }
  0x48   : > { %v883_v28 = vld [vmem:[#allocation2 + $0x128] sm:$0xff]  ;;  %v1129_v55 = vld [vmem:[#allocation2 + $0x9a] sm:$0xff]  ;;  %535 = vst.msk [vmem:[#allocation2 + $0x171] sm:$0xff] %vm331_vm0, %v502_v58  ;;  %v1388_v61 = vld [vmem:[#allocation2 + $0xb1] sm:$0xff] }
  0x49   : > { %1312 = vrot.lane.b32.xlu0 %v893_v39, %s9129_s23  ;;  %597 = vst.msk [vmem:[#allocation6 + $0x58] sm:$0xff] %vm331_vm0, %v7268_v21  ;;  %v7288_v29 = vpack.c.bf16 %v883_v28, %v882_v27  ;;  %v1513_v43 = vld [vmem:[#allocation2 + $0x82] sm:$0xff]  ;;  %v1516_v4 = vld [vmem:[#allocation2 + $0xaa] sm:$0xff]  ;;  %v1517_v5 = vld [vmem:[#allocation2 + $0xb2] sm:$0xff] }
  0x4a   : > { %1314 = vrot.lane.b32.xlu1 %v7197_v44, %s9129_s23  ;;  %s9136_s23 = smov 48   ;;  %v1387_v59 = vld [vmem:[#allocation2 + $0xa9] sm:$0xff]  ;;  %v1543_v6 = vpack.c.bf16 %v1517_v5, %v1516_v4  ;;  %v874_v8 = vld [vmem:[#allocation2 + $0xc0] sm:$0xff]  ;;  %v1136_v45 = vld [vmem:[#allocation2 + $0xf2] sm:$0xff]  ;;  %383 = vst.msk [vmem:[#allocation3 + $0x198] sm:$0xff] %vm377_vm13, %v6934_v0 }
  0x4b   : > { %598 = vst.msk [vmem:[#allocation6 + $0x60] sm:$0xff] %vm331_vm0, %v7288_v29  ;;  %v1270_v38 = vld [vmem:[#allocation2 + $0x138] sm:$0xff]  ;;  %v1414_v3 = vpack.c.bf16 %v1388_v61, %v1387_v59  ;;  %v875_v9 = vld [vmem:[#allocation2 + $0xc8] sm:$0xff]  ;;  %v554_v19 = vld [vmem:[#allocation2 + $0xc0] sm:$0xff] }
  0x4c   : > { %v886_v49 = vld [vmem:[#allocation2 + $0x150] sm:$0xff]  ;;  %v899_v10 = vpack.c.bf16 %v875_v9, %v874_v8  ;;  %v1003_v11 = vld [vmem:[#allocation2 + $0xc1] sm:$0xff]  ;;  %v1391_v23 = vld [vmem:[#allocation2 + $0xd9] sm:$0xff]  ;;  %384 = vst.msk [vmem:[#allocation3 + $0x1a0] sm:$0xff] %vm377_vm13, %v6934_v0 }
  0x4d   : > { %1441 = vrot.lane.b32.xlu0 %v7206_v48, %s6941_s17  ;;  %v1271_v39 = vld [vmem:[#allocation2 + $0x140] sm:$0xff]  ;;  %v887_v50 = vld [vmem:[#allocation2 + $0x158] sm:$0xff]  ;;  %v1004_v12 = vld [vmem:[#allocation2 + $0xc9] sm:$0xff]  ;;  %423 = vst.msk [vmem:[#allocation4] sm:$0xff] %vm377_vm13, %v6934_v0 }
  0x4e   : > { %1443 = vrot.lane.b32.xlu1 %v1410_v7, %s6941_s17  ;;  %v7304_v40 = vpack.c.bf16 %v1271_v39, %v1270_v38  ;;  %v7322_v51 = vpack.c.bf16 %v887_v50, %v886_v49  ;;  %v1132_v14 = vld [vmem:[#allocation2 + $0xc2] sm:$0xff]  ;;  %v1133_v15 = vld [vmem:[#allocation2 + $0xca] sm:$0xff]  ;;  %v1520_v27 = vld [vmem:[#allocation2 + $0xda] sm:$0xff]  ;;  %426 = vst.msk [vmem:[#allocation4 + $0x90] sm:$0xff] %vm377_vm13, %v6934_v0 }
  0x4f   : > { %v1157_v16 = vpack.c.bf16 %v1133_v15, %v1132_v14  ;;  %v555_v20 = vld [vmem:[#allocation2 + $0xc8] sm:$0xff]  ;;  %v1007_v38 = vld [vmem:[#allocation2 + $0xf1] sm:$0xff]  ;;  %v1008_v39 = vld [vmem:[#allocation2 + $0xf9] sm:$0xff]  ;;  %381 = vst.msk [vmem:[#allocation3 + $0x10] sm:$0x3] %vm380_vm14, %v6934_v0 }
  0x50   : > { %599 = vst.msk [vmem:[#allocation6 + $0x68] sm:$0xff] %vm331_vm0, %v7304_v40  ;;  %600 = vst.msk [vmem:[#allocation6 + $0x70] sm:$0xff] %vm331_vm0, %v7322_v51  ;;  %v578_v22 = vpack.c.bf16 %v555_v20, %v554_v19  ;;  %v1392_v24 = vld [vmem:[#allocation2 + $0xe1] sm:$0xff]  ;;  %v1524_v59 = vld [vmem:[#allocation2 + $0x10a] sm:$0xff] }
  0x51   : > { %1570 = vrot.lane.b32.xlu0 %v7219_v57, %s6942_s24  ;;  %v1416_v25 = vpack.c.bf16 %v1392_v24, %v1391_v23  ;;  %v1521_v28 = vld [vmem:[#allocation2 + $0xe2] sm:$0xff]  ;;  %v1137_v46 = vld [vmem:[#allocation2 + $0xfa] sm:$0xff]  ;;  %v1525_v61 = vld [vmem:[#allocation2 + $0x112] sm:$0xff]  ;;  %385 = vst.msk [vmem:[#allocation3 + $0x1a8] sm:$0x3] %vm380_vm14, %v6934_v0 }
  0x52   : > { %1572 = vrot.lane.b32.xlu1 %v1539_v13, %s6942_s24  ;;  %594 = vst.msk [vmem:[#allocation6 + $0x40] sm:$0xff] %vm331_vm0, %v578_v22  ;;  %v1545_v31 = vpack.c.bf16 %v1521_v28, %v1520_v27  ;;  %v1011_v9 = vld [vmem:[#allocation2 + $0x121] sm:$0xff]  ;;  %v1141_v15 = vld [vmem:[#allocation2 + $0x12a] sm:$0xff] }
  0x53   : > { %v1140_v14 = vld [vmem:[#allocation2 + $0x122] sm:$0xff]  ;;  %v1528_v27 = vld [vmem:[#allocation2 + $0x13a] sm:$0xff]  ;;  %424 = vst.msk [vmem:[#allocation4 + $0x8] sm:$0x3] %vm380_vm14, %v6934_v0  ;;  %427 = vst.msk [vmem:[#allocation4 + $0x98] sm:$0x3] %vm380_vm14, %v6934_v0 }
  0x54   : > { %v1400_v22 = vld [vmem:[#allocation2 + $0x141] sm:$0xff]  ;;  %407 = vst.msk [vmem:[#allocation3 + $0x41] sm:$0x1] %vm386_vm15, %v6934_v0  ;;  %387 = vst.msk [vmem:[#allocation3] sm:$0x1] %vm386_vm15, %v6934_v0 }
  0x55   : > { %670 = vrot.lane.b32.xlu0 %v7206_v48, %s6935_s26  ;;  %v1000_v48 = vld [vmem:[#allocation2 + $0x99] sm:$0xff]  ;;  %v1529_v28 = vld [vmem:[#allocation2 + $0x142] sm:$0xff]  ;;  %388 = vst.msk [vmem:[#allocation3 + $0x18] sm:$0x1] %vm386_vm15, %v6934_v0  ;;  %389 = vst.msk [vmem:[#allocation3 + $0x30] sm:$0x1] %vm386_vm15, %v6934_v0 }
  0x56   : > { %672 = vrot.lane.b32.xlu1 %v1410_v7, %s6935_s26  ;;  %390 = vst.msk [vmem:[#allocation3 + $0x48] sm:$0x1] %vm386_vm15, %v6934_v0  ;;  %391 = vst.msk [vmem:[#allocation3 + $0x60] sm:$0x1] %vm386_vm15, %v6934_v0 }
  0x57   : > { %392 = vst.msk [vmem:[#allocation3 + $0x78] sm:$0x1] %vm386_vm15, %v6934_v0  ;;  %393 = vst.msk [vmem:[#allocation3 + $0x90] sm:$0x1] %vm386_vm15, %v6934_v0 }
  0x58   : > { %394 = vst.msk [vmem:[#allocation3 + $0xa8] sm:$0x1] %vm386_vm15, %v6934_v0  ;;  %395 = vst.msk [vmem:[#allocation3 + $0xc0] sm:$0x1] %vm386_vm15, %v6934_v0 }
  0x59   : > { %799 = vrot.lane.b32.xlu0 %v7219_v57, %s6936_s27  ;;  %v501_v57 = vld [vmem:[%s7153_s25 + $0xe0] sm:$0xff]  ;;  %396 = vst.msk [vmem:[#allocation3 + $0xd8] sm:$0x1] %vm386_vm15, %v6934_v0  ;;  %397 = vst.msk [vmem:[#allocation3 + $0xf0] sm:$0x1] %vm386_vm15, %v6934_v0 }
  0x5a   : > { %801 = vrot.lane.b32.xlu1 %v1539_v13, %s6936_s27  ;;  %534 = vst.msk [vmem:[#allocation2 + $0x169] sm:$0xff] %vm331_vm0, %v501_v57 }
  0x5b   : > { %398 = vst.msk [vmem:[#allocation3 + $0x108] sm:$0x1] %vm386_vm15, %v6934_v0  ;;  %399 = vst.msk [vmem:[#allocation3 + $0x120] sm:$0x1] %vm386_vm15, %v6934_v0 }
  0x5c   : > { %400 = vst.msk [vmem:[#allocation3 + $0x138] sm:$0x1] %vm386_vm15, %v6934_v0  ;;  %401 = vst.msk [vmem:[#allocation3 + $0x150] sm:$0x1] %vm386_vm15, %v6934_v0 }
  0x5d   : > { %928 = vrot.lane.b32.xlu0 %v7197_v44, %s6937_s28  ;;  %v1541_v44 = vpack.c.bf16 %v1513_v43, %v1512_v42  ;;  %v1030_v43 = vpack.c.bf16 %v1008_v39, %v1007_v38  ;;  %v1015_v39 = vld [vmem:[#allocation2 + $0x151] sm:$0xff]  ;;  %402 = vst.msk [vmem:[#allocation3 + $0x168] sm:$0x1] %vm386_vm15, %v6934_v0  ;;  %403 = vst.msk [vmem:[#allocation3 + $0x180] sm:$0x1] %vm386_vm15, %v6934_v0 }
  0x5e   : > { %930 = vrot.lane.b32.xlu1 %v7201_v47, %s6937_s28  ;;  %404 = vst.msk [vmem:[#allocation3 + $0x198] sm:$0x1] %vm386_vm15, %v6934_v0  ;;  %406 = vst.msk [vmem:[#allocation3 + $0x29] sm:$0x1] %vm386_vm15, %v6934_v0 }
  0x5f   : > { %408 = vst.msk [vmem:[#allocation3 + $0x59] sm:$0x1] %vm386_vm15, %v6934_v0  ;;  %409 = vst.msk [vmem:[#allocation3 + $0x71] sm:$0x1] %vm386_vm15, %v6934_v0 }
  0x60   : > { %410 = vst.msk [vmem:[#allocation3 + $0x89] sm:$0x1] %vm386_vm15, %v6934_v0  ;;  %411 = vst.msk [vmem:[#allocation3 + $0xa1] sm:$0x1] %vm386_vm15, %v6934_v0 }
  0x61   : > { %1057 = vrot.lane.b32.xlu0 %v1410_v7, %s6938_s29  ;;  %v1274_v62 = vld [vmem:[#allocation2 + $0x168] sm:$0xff]  ;;  %v1275_v63 = vld [vmem:[#allocation2 + $0x170] sm:$0xff]  ;;  %v504_v7 = vld [vmem:[%s7153_s25 + $0xf8] sm:$0xff]  ;;  %412 = vst.msk [vmem:[#allocation3 + $0xb9] sm:$0x1] %vm386_vm15, %v6934_v0 }
  0x62   : > { %1059 = vrot.lane.b32.xlu1 %v1024_v30, %s6938_s29  ;;  %v7340_v1 = vpack.c.bf16 %v1275_v63, %v1274_v62  ;;  %537 = vst.msk [vmem:[#allocation2 + $0x189] sm:$0xff] %vm331_vm0, %v504_v7 }
  0x63   : > { %413 = vst.msk [vmem:[#allocation3 + $0xd1] sm:$0x1] %vm386_vm15, %v6934_v0  ;;  %414 = vst.msk [vmem:[#allocation3 + $0xe9] sm:$0x1] %vm386_vm15, %v6934_v0 }
  0x64   : > { %601 = vst.msk [vmem:[#allocation6 + $0x78] sm:$0xff] %vm331_vm0, %v7340_v1 }
  0x65   : > { %1186 = vrot.lane.b32.xlu0 %v1539_v13, %s9135_s14  ;;  %v1028_v13 = vpack.c.bf16 %v1004_v12, %v1003_v11  ;;  %415 = vst.msk [vmem:[#allocation3 + $0x101] sm:$0x1] %vm386_vm15, %v6934_v0  ;;  %416 = vst.msk [vmem:[#allocation3 + $0x119] sm:$0x1] %vm386_vm15, %v6934_v0 }
  0x66   : > { %1188 = vrot.lane.b32.xlu1 %v1153_v35, %s9135_s14  ;;  %417 = vst.msk [vmem:[#allocation3 + $0x131] sm:$0x1] %vm386_vm15, %v6934_v0  ;;  %418 = vst.msk [vmem:[#allocation3 + $0x149] sm:$0x1] %vm386_vm15, %v6934_v0 }
  0x67   : > { %419 = vst.msk [vmem:[#allocation3 + $0x161] sm:$0x1] %vm386_vm15, %v6934_v0  ;;  %420 = vst.msk [vmem:[#allocation3 + $0x179] sm:$0x1] %vm386_vm15, %v6934_v0 }
  0x68   : > { %421 = vst.msk [vmem:[#allocation3 + $0x191] sm:$0x1] %vm386_vm15, %v6934_v0  ;;  %428 = vst.msk [vmem:[#allocation4] sm:$0x1] %vm386_vm15, %v6934_v0 }
  0x69   : > { %1316 = vrot.lane.b32.xlu0 %v7201_v47, %s9136_s23  ;;  %v999_v47 = vld [vmem:[#allocation2 + $0x91] sm:$0xff]  ;;  %429 = vst.msk [vmem:[#allocation4 + $0x10] sm:$0x1] %vm386_vm15, %v6934_v0  ;;  %430 = vst.msk [vmem:[#allocation4 + $0x20] sm:$0x1] %vm386_vm15, %v6934_v0 }
  0x6a   : > { %1318 = vrot.lane.b32.xlu1 %v7208_v53, %s9136_s23  ;;  %v1026_v52 = vpack.c.bf16 %v1000_v48, %v999_v47  ;;  %v1159_v48 = vpack.c.bf16 %v1137_v46, %v1136_v45  ;;  %v1144_v45 = vld [vmem:[#allocation2 + $0x152] sm:$0xff]  ;;  %v1145_v46 = vld [vmem:[#allocation2 + $0x15a] sm:$0xff]  ;;  %431 = vst.msk [vmem:[#allocation4 + $0x30] sm:$0x1] %vm386_vm15, %v6934_v0  ;;  %432 = vst.msk [vmem:[#allocation4 + $0x40] sm:$0x1] %vm386_vm15, %v6934_v0 }
  0x6b   : > { %433 = vst.msk [vmem:[#allocation4 + $0x50] sm:$0x1] %vm386_vm15, %v6934_v0  ;;  %434 = vst.msk [vmem:[#allocation4 + $0x60] sm:$0x1] %vm386_vm15, %v6934_v0 }
  0x6c   : > { %435 = vst.msk [vmem:[#allocation4 + $0x70] sm:$0x1] %vm386_vm15, %v6934_v0  ;;  %436 = vst.msk [vmem:[#allocation4 + $0x80] sm:$0x1] %vm386_vm15, %v6934_v0 }
  0x6d   : > { %1445 = vrot.lane.b32.xlu0 %v1024_v30, %s6941_s17  ;;  %437 = vst.msk [vmem:[#allocation4 + $0x90] sm:$0x1] %vm386_vm15, %v6934_v0  ;;  %439 = vst.msk [vmem:[#allocation4 + $0x19] sm:$0x1] %vm386_vm15, %v6934_v0 }
  0x6e   : > { %1447 = vrot.lane.b32.xlu1 %v1412_v41, %s6941_s17  ;;  %440 = vst.msk [vmem:[#allocation4 + $0x29] sm:$0x1] %vm386_vm15, %v6934_v0  ;;  %441 = vst.msk [vmem:[#allocation4 + $0x39] sm:$0x1] %vm386_vm15, %v6934_v0 }
  0x6f   : > { %442 = vst.msk [vmem:[#allocation4 + $0x49] sm:$0x1] %vm386_vm15, %v6934_v0  ;;  %443 = vst.msk [vmem:[#allocation4 + $0x59] sm:$0x1] %vm386_vm15, %v6934_v0 }
  0x70   : > { %444 = vst.msk [vmem:[#allocation4 + $0x69] sm:$0x1] %vm386_vm15, %v6934_v0  ;;  %445 = vst.msk [vmem:[#allocation4 + $0x79] sm:$0x1] %vm386_vm15, %v6934_v0 }
  0x71   : > { %1574 = vrot.lane.b32.xlu0 %v1153_v35, %s6942_s24  ;;  %446 = vst.msk [vmem:[#allocation4 + $0x89] sm:$0x1] %vm386_vm15, %v6934_v0  ;;  %405 = vst.msk [vmem:[#allocation3 + $0x11] sm:$0x1] %vm386_vm15, %v6934_v0 }
  0x72   : > { %1576 = vrot.lane.b32.xlu1 %v1541_v44, %s6942_s24  ;;  %422 = vst.msk [vmem:[#allocation3 + $0x1a9] sm:$0x1] %vm386_vm15, %v6934_v0  ;;  %438 = vst.msk [vmem:[#allocation4 + $0x9] sm:$0x1] %vm386_vm15, %v6934_v0 }
  0x73   : > { %447 = vst.msk [vmem:[#allocation4 + $0x99] sm:$0x1] %vm386_vm15, %v6934_v0 }
  0x75   : > { %674 = vrot.lane.b32.xlu0 %v1024_v30, %s6935_s26 }
  0x76   : > { %676 = vrot.lane.b32.xlu1 %v1412_v41, %s6935_s26 }
  0x79   : > { %803 = vrot.lane.b32.xlu0 %v1153_v35, %s6936_s27 }
  0x7a   : > { %805 = vrot.lane.b32.xlu1 %v1541_v44, %s6936_s27 }
  0x7d   : > { %932 = vrot.lane.b32.xlu0 %v7208_v53, %s6937_s28  ;;  %v1155_v53 = vpack.c.bf16 %v1129_v55, %v1128_v54  ;;  %v1396_v54 = vld [vmem:[#allocation2 + $0x111] sm:$0xff] }
  0x7e   : > { %934 = vrot.lane.b32.xlu1 %v7213_v56, %s6937_s28 }
  0x81   : > { %1061 = vrot.lane.b32.xlu0 %v1412_v41, %s6938_s29 }
  0x82   : > { %1063 = vrot.lane.b32.xlu1 %v1026_v52, %s6938_s29 }
  0x85   : > { %1190 = vrot.lane.b32.xlu0 %v1541_v44, %s9135_s14 }
  0x86   : > { %1192 = vrot.lane.b32.xlu1 %v1155_v53, %s9135_s14 }
  0x89   : > { %1320 = vrot.lane.b32.xlu0 %v7213_v56, %s9136_s23  ;;  %v503_v56 = vld [vmem:[%s7153_s25 + $0xf0] sm:$0xff]  ;;  %s6020_s25 = sshll.u32 %s7015_s13, 4  ;;  %s6943_s13 = smov [#allocation11]  }
  0x8a   : > { %1322 = vrot.lane.b32.xlu1 %v7221_v60, %s9136_s23  ;;  %536 = vst.msk [vmem:[#allocation2 + $0x181] sm:$0xff] %vm331_vm0, %v503_v56  ;;  %vm2149_vm0 = vcmask 1048064   ;;  %s6874_s21 = sshll.u32 %s6943_s13, 4  ;;  %s6875_s21 = int_to_ptr.vmem [resolvable:$false] %s6874_s21 }
  0x8b   : > { %v667_v17 = vpop.permute.xlu0 %666  ;;  %s6876_s22 = scalar_lea.vmem %s6875_s21, 32 }
  0x8c   : > { %715 = vst.msk [vmem:[#allocation6] sm:$0xff] %vm714_vm4, %v667_v17  ;;  %v1161_v17 = vpack.c.bf16 %v1141_v15, %v1140_v14 }
  0x8d   : > { %1449 = vrot.lane.b32.xlu0 %v1026_v52, %s6941_s17 }
  0x8e   : > { %1451 = vrot.lane.b32.xlu1 %v1414_v3, %s6941_s17 }
  0x91   : > { %1578 = vrot.lane.b32.xlu0 %v1155_v53, %s6942_s24  ;;  %v1148_v15 = vld [vmem:[#allocation2 + $0x182] sm:$0xff] }
  0x92   : > { %1580 = vrot.lane.b32.xlu1 %v1543_v6, %s6942_s24 }
  0x95   : > { %678 = vrot.lane.b32.xlu0 %v1026_v52, %s6935_s26  ;;  %v1395_v52 = vld [vmem:[#allocation2 + $0x109] sm:$0xff] }
  0x96   : > { %680 = vrot.lane.b32.xlu1 %v1414_v3, %s6935_s26  ;;  %v1418_v57 = vpack.c.bf16 %v1396_v54, %v1395_v52  ;;  %v1404_v52 = vld [vmem:[#allocation2 + $0x171] sm:$0xff] }
  0x99   : > { %807 = vrot.lane.b32.xlu0 %v1155_v53, %s6936_s27 }
  0x9a   : > { %809 = vrot.lane.b32.xlu1 %v1543_v6, %s6936_s27 }
  0x9d   : > { %936 = vrot.lane.b32.xlu0 %v7221_v60, %s6937_s28 }
  0x9e   : > { %938 = vrot.lane.b32.xlu1 %v899_v10, %s6937_s28 }
  0xa1   : > { %1065 = vrot.lane.b32.xlu0 %v1414_v3, %s6938_s29 }
  0xa2   : > { %1067 = vrot.lane.b32.xlu1 %v1028_v13, %s6938_s29 }
  0xa5   : > { %1194 = vrot.lane.b32.xlu0 %v1543_v6, %s9135_s14 }
  0xa6   : > { %1196 = vrot.lane.b32.xlu1 %v1157_v16, %s9135_s14 }
  0xa8   : > { %v796_v60 = vpop.permute.xlu1 %795 }
  0xa9   : > { %844 = vst.msk [vmem:[#allocation6] sm:$0xff] %vm843_vm5, %v796_v60  ;;  %1324 = vrot.lane.b32.xlu0 %v899_v10, %s9136_s23  ;;  %v1012_v10 = vld [vmem:[#allocation2 + $0x129] sm:$0xff]  ;;  %v1399_v60 = vld [vmem:[#allocation2 + $0x139] sm:$0xff] }
  0xaa   : > { %1326 = vrot.lane.b32.xlu1 %v7230_v2, %s9136_s23  ;;  %v1032_v12 = vpack.c.bf16 %v1012_v10, %v1011_v9  ;;  %v1420_v24 = vpack.c.bf16 %v1400_v22, %v1399_v60  ;;  %v1019_v10 = vld [vmem:[#allocation2 + $0x181] sm:$0xff] }
  0xab   : > { %v669_v26 = vpop.permute.xlu0 %668 }
  0xac   : > { %716 = vst.msk [vmem:[#allocation6 + $0x8] sm:$0xff] %vm714_vm4, %v669_v26  ;;  %v798_v30 = vpop.permute.xlu1 %797 }
  0xad   : > { %845 = vst.msk [vmem:[#allocation6 + $0x8] sm:$0xff] %vm843_vm5, %v798_v30  ;;  %1453 = vrot.lane.b32.xlu0 %v1028_v13, %s6941_s17 }
  0xae   : > { %1455 = vrot.lane.b32.xlu1 %v1416_v25, %s6941_s17 }
  0xaf   : > { %v925_v32 = vpop.permute.xlu0 %924 }
  0xb0   : > { %973 = vst.msk [vmem:[#allocation6] sm:$0xff] %vm972_vm6, %v925_v32  ;;  %v927_v33 = vpop.permute.xlu1 %926 }
  0xb1   : > { %974 = vst.msk [vmem:[#allocation6 + $0x8] sm:$0xff] %vm972_vm6, %v927_v33  ;;  %1582 = vrot.lane.b32.xlu0 %v1157_v16, %s6942_s24 }
  0xb2   : > { %1584 = vrot.lane.b32.xlu1 %v1545_v31, %s6942_s24 }
  0xb3   : > { %v1054_v34 = vpop.permute.xlu0 %1053 }
  0xb4   : > { %1102 = vst.msk [vmem:[#allocation6] sm:$0xff] %vm1101_vm7, %v1054_v34  ;;  %v1056_v35 = vpop.permute.xlu1 %1055 }
  0xb5   : > { %1103 = vst.msk [vmem:[#allocation6 + $0x8] sm:$0xff] %vm1101_vm7, %v1056_v35  ;;  %682 = vrot.lane.b32.xlu0 %v1028_v13, %s6935_s26 }
  0xb6   : > { %684 = vrot.lane.b32.xlu1 %v1416_v25, %s6935_s26 }
  0xb7   : > { %v1183_v36 = vpop.permute.xlu0 %1182 }
  0xb8   : > { %1231 = vst.msk [vmem:[#allocation6] sm:$0xff] %vm1230_vm8, %v1183_v36  ;;  %v1185_v37 = vpop.permute.xlu1 %1184 }
  0xb9   : > { %1232 = vst.msk [vmem:[#allocation6 + $0x8] sm:$0xff] %vm1230_vm8, %v1185_v37  ;;  %811 = vrot.lane.b32.xlu0 %v1157_v16, %s6936_s27 }
  0xba   : > { %813 = vrot.lane.b32.xlu1 %v1545_v31, %s6936_s27 }
  0xbb   : > { %v1313_v41 = vpop.permute.xlu0 %1312 }
  0xbc   : > { %1361 = vst.msk [vmem:[#allocation6] sm:$0xff] %vm1360_vm9, %v1313_v41  ;;  %v1315_v42 = vpop.permute.xlu1 %1314  ;;  %v1016_v41 = vld [vmem:[#allocation2 + $0x159] sm:$0xff] }
  0xbd   : > { %1362 = vst.msk [vmem:[#allocation6 + $0x8] sm:$0xff] %vm1360_vm9, %v1315_v42  ;;  %940 = vrot.lane.b32.xlu0 %v7230_v2, %s6937_s28 }
  0xbe   : > { %942 = vrot.lane.b32.xlu1 %v7266_v18, %s6937_s28 }
  0xbf   : > { %v1442_v44 = vpop.permute.xlu0 %1441 }
  0xc0   : > { %1490 = vst.msk [vmem:[#allocation6] sm:$0xff] %vm1489_vm10, %v1442_v44  ;;  %v1444_v47 = vpop.permute.xlu1 %1443 }
  0xc1   : > { %1491 = vst.msk [vmem:[#allocation6 + $0x8] sm:$0xff] %vm1489_vm10, %v1444_v47  ;;  %1069 = vrot.lane.b32.xlu0 %v1416_v25, %s6938_s29 }
  0xc2   : > { %1071 = vrot.lane.b32.xlu1 %v1030_v43, %s6938_s29 }
  0xc3   : > { %v1571_v49 = vpop.permute.xlu0 %1570 }
  0xc4   : > { %1619 = vst.msk [vmem:[#allocation6] sm:$0xff] %vm1618_vm11, %v1571_v49  ;;  %v1573_v2 = vpop.permute.xlu1 %1572 }
  0xc5   : > { %1620 = vst.msk [vmem:[#allocation6 + $0x8] sm:$0xff] %vm1618_vm11, %v1573_v2  ;;  %1198 = vrot.lane.b32.xlu0 %v1545_v31, %s9135_s14 }
  0xc6   : > { %1200 = vrot.lane.b32.xlu1 %v1159_v48, %s9135_s14 }
  0xc7   : > { %v671_v50 = vpop.permute.xlu0 %670 }
  0xc8   : > { %717 = vst.msk [vmem:[#allocation6 + $0x10] sm:$0xff] %vm714_vm4, %v671_v50  ;;  %v673_v55 = vpop.permute.xlu1 %672  ;;  %v1403_v50 = vld [vmem:[#allocation2 + $0x169] sm:$0xff] }
  0xc9   : > { %718 = vst.msk [vmem:[#allocation6 + $0x18] sm:$0xff] %vm714_vm4, %v673_v55  ;;  %1328 = vrot.lane.b32.xlu0 %v7266_v18, %s9136_s23  ;;  %v1547_v18 = vpack.c.bf16 %v1525_v61, %v1524_v59  ;;  %v1422_v55 = vpack.c.bf16 %v1404_v52, %v1403_v50  ;;  %v1533_v59 = vld [vmem:[#allocation2 + $0x172] sm:$0xff] }
  0xca   : > { %1330 = vrot.lane.b32.xlu1 %v7268_v21, %s9136_s23 }
  0xcb   : > { %v800_v58 = vpop.permute.xlu0 %799  ;;  %v1635_v53 = vld [vmem:[#allocation6] sm:$0xff] }
  0xcc   : > { %846 = vst.msk [vmem:[#allocation6 + $0x10] sm:$0xff] %vm843_vm5, %v800_v58  ;;  %v802_v62 = vpop.permute.xlu1 %801  ;;  %6559 = vmatprep.mubr.msk.bf16.mxu0 %vm1694_vm12, %v1635_v53  ;;  %v1636_v63 = vld [vmem:[#allocation6 + $0x8] sm:$0xff] }
  0xcd   : > { %847 = vst.msk [vmem:[#allocation6 + $0x18] sm:$0xff] %vm843_vm5, %v802_v62  ;;  %1457 = vrot.lane.b32.xlu0 %v1030_v43, %s6941_s17  ;;  %6560 = vmatmul.mubr.msk.bf16.vlgmr.msra.gmra.mrb[0].mxu0 %vm1694_vm12, %v1636_v63  ;;  %v1532_v53 = vld [vmem:[#allocation2 + $0x16a] sm:$0xff] }
  0xce   : > { %1459 = vrot.lane.b32.xlu1 %v1418_v57, %s6941_s17 }
  0xcf   : > { %v929_v3 = vpop.permute.xlu0 %928 }
  0xd0   : > { %975 = vst.msk [vmem:[#allocation6 + $0x10] sm:$0xff] %vm972_vm6, %v929_v3  ;;  %v931_v4 = vpop.permute.xlu1 %930 }
  0xd1   : > { %976 = vst.msk [vmem:[#allocation6 + $0x18] sm:$0xff] %vm972_vm6, %v931_v4  ;;  %1586 = vrot.lane.b32.xlu0 %v1159_v48, %s6942_s24 }
  0xd2   : > { %1588 = vrot.lane.b32.xlu1 %v1547_v18, %s6942_s24 }
  0xd3   : > { %v1058_v5 = vpop.permute.xlu0 %1057 }
  0xd4   : > { %1104 = vst.msk [vmem:[#allocation6 + $0x10] sm:$0xff] %vm1101_vm7, %v1058_v5  ;;  %v1060_v6 = vpop.permute.xlu1 %1059 }
  0xd5   : > { %1105 = vst.msk [vmem:[#allocation6 + $0x18] sm:$0xff] %vm1101_vm7, %v1060_v6  ;;  %686 = vrot.lane.b32.xlu0 %v1030_v43, %s6935_s26  ;;  %v1034_v43 = vpack.c.bf16 %v1016_v41, %v1015_v39  ;;  %v890_v6 = vld [vmem:[#allocation2 + $0x180] sm:$0xff] }
  0xd6   : > { %688 = vrot.lane.b32.xlu1 %v1418_v57, %s6935_s26 }
  0xd7   : > { %v1187_v56 = vpop.permute.xlu0 %1186 }
  0xd8   : > { %1233 = vst.msk [vmem:[#allocation6 + $0x10] sm:$0xff] %vm1230_vm8, %v1187_v56  ;;  %v1189_v7 = vpop.permute.xlu1 %1188  ;;  %v891_v56 = vld [vmem:[#allocation2 + $0x188] sm:$0xff] }
  0xd9   : > { %1234 = vst.msk [vmem:[#allocation6 + $0x18] sm:$0xff] %vm1230_vm8, %v1189_v7  ;;  %815 = vrot.lane.b32.xlu0 %v1159_v48, %s6936_s27  ;;  %v1163_v48 = vpack.c.bf16 %v1145_v46, %v1144_v45 }
  0xda   : > { %817 = vrot.lane.b32.xlu1 %v1547_v18, %s6936_s27 }
  0xdb   : > { %v1317_v8 = vpop.permute.xlu0 %1316 }
  0xdc   : > { %1363 = vst.msk [vmem:[#allocation6 + $0x10] sm:$0xff] %vm1360_vm9, %v1317_v8  ;;  %v1319_v11 = vpop.permute.xlu1 %1318  ;;  %v7501_v8 = vpack.c.bf16 %v891_v56, %v890_v6 }
  0xdd   : > { %1364 = vst.msk [vmem:[#allocation6 + $0x18] sm:$0xff] %vm1360_vm9, %v1319_v11  ;;  %944 = vrot.lane.b32.xlu0 %v7268_v21, %s6937_s28  ;;  %v1020_v11 = vld [vmem:[#allocation2 + $0x189] sm:$0xff] }
  0xde   : > { %946 = vrot.lane.b32.xlu1 %v7288_v29, %s6937_s28 }
  0xdf   : > { %v1446_v13 = vpop.permute.xlu0 %1445 }
  0xe0   : > { %1492 = vst.msk [vmem:[#allocation6 + $0x10] sm:$0xff] %vm1489_vm10, %v1446_v13  ;;  %v1448_v16 = vpop.permute.xlu1 %1447  ;;  %v7509_v13 = vpack.c.bf16 %v1020_v11, %v1019_v10 }
  0xe1   : > { %1493 = vst.msk [vmem:[#allocation6 + $0x18] sm:$0xff] %vm1489_vm10, %v1448_v16  ;;  %1073 = vrot.lane.b32.xlu0 %v1418_v57, %s6938_s29  ;;  %v1149_v16 = vld [vmem:[#allocation2 + $0x18a] sm:$0xff] }
  0xe2   : > { %1075 = vrot.lane.b32.xlu1 %v1032_v12, %s6938_s29 }
  0xe3   : > { %v1575_v19 = vpop.permute.xlu0 %1574 }
  0xe4   : > { %1621 = vst.msk [vmem:[#allocation6 + $0x10] sm:$0xff] %vm1618_vm11, %v1575_v19  ;;  %v1577_v21 = vpop.permute.xlu1 %1576 }
  0xe5   : > { %1622 = vst.msk [vmem:[#allocation6 + $0x18] sm:$0xff] %vm1618_vm11, %v1577_v21  ;;  %1202 = vrot.lane.b32.xlu0 %v1547_v18, %s9135_s14  ;;  %v7530_v21 = vld [vmem:[#allocation2 + $0x198] sm:$0xff] }
  0xe6   : > { %1204 = vrot.lane.b32.xlu1 %v1161_v17, %s9135_s14 }
  0xe7   : > { %v675_v20 = vpop.permute.xlu0 %674 }
  0xe8   : > { %719 = vst.msk [vmem:[#allocation6 + $0x20] sm:$0xff] %vm714_vm4, %v675_v20  ;;  %v677_v23 = vpop.permute.xlu1 %676  ;;  %v7532_v20 = vld [vmem:[#allocation2 + $0x1a0] sm:$0xff] }
  0xe9   : > { %720 = vst.msk [vmem:[#allocation6 + $0x28] sm:$0xff] %vm714_vm4, %v677_v23  ;;  %1332 = vrot.lane.b32.xlu0 %v7288_v29, %s9136_s23  ;;  %v1549_v29 = vpack.c.bf16 %v1529_v28, %v1528_v27  ;;  %v1295_v22 = vpack.c.bf16 %v7532_v20, %v7530_v21 }
  0xea   : > { %1334 = vrot.lane.b32.xlu1 %v7304_v40, %s9136_s23 }
  0xeb   : > { %v804_v25 = vpop.permute.xlu0 %803  ;;  %v1637_v26 = vld [vmem:[#allocation6 + $0x10] sm:$0xff] }
  0xec   : > { %848 = vst.msk [vmem:[#allocation6 + $0x20] sm:$0xff] %vm843_vm5, %v804_v25  ;;  %v806_v30 = vpop.permute.xlu1 %805  ;;  %6563 = vmatprep.mubr.msk.bf16.mxu0 %vm1694_vm12, %v1637_v26  ;;  %v1638_v31 = vld [vmem:[#allocation6 + $0x18] sm:$0xff]  ;;  %v1408_v25 = vld [vmem:[#allocation2 + $0x1a1] sm:$0xff] }
  0xed   : > { %849 = vst.msk [vmem:[#allocation6 + $0x28] sm:$0xff] %vm843_vm5, %v806_v30  ;;  %1461 = vrot.lane.b32.xlu0 %v1032_v12, %s6941_s17  ;;  %6564 = vmatmul.mubr.msk.bf16.gmra.mrb[4].mxu0 %vm1694_vm12, %v1638_v31  ;;  %v1536_v30 = vld [vmem:[#allocation2 + $0x19a] sm:$0xff]  ;;  %v1537_v31 = vld [vmem:[#allocation2 + $0x1a2] sm:$0xff] }
  0xee   : > { %1463 = vrot.lane.b32.xlu1 %v1420_v24, %s6941_s17 }
  0xef   : > { %v933_v32 = vpop.permute.xlu0 %932 }
  0xf0   : > { %977 = vst.msk [vmem:[#allocation6 + $0x20] sm:$0xff] %vm972_vm6, %v933_v32  ;;  %v935_v33 = vpop.permute.xlu1 %934 }
  0xf1   : > { %978 = vst.msk [vmem:[#allocation6 + $0x28] sm:$0xff] %vm972_vm6, %v935_v33  ;;  %1590 = vrot.lane.b32.xlu0 %v1161_v17, %s6942_s24  ;;  %v1553_v33 = vpack.c.bf16 %v1537_v31, %v1536_v30  ;;  %v6726_v30 = vld [vmem:[%s9122_s3] sm:$0xff]  }
  0xf2   : > { %1592 = vrot.lane.b32.xlu1 %v1549_v29, %s6942_s24 }
  0xf3   : > { %v1062_v34 = vpop.permute.xlu0 %1061 }
  0xf4   : > { %1106 = vst.msk [vmem:[#allocation6 + $0x20] sm:$0xff] %vm1101_vm7, %v1062_v34  ;;  %v1064_v35 = vpop.permute.xlu1 %1063 }
  0xf5   : > { %1107 = vst.msk [vmem:[#allocation6 + $0x28] sm:$0xff] %vm1101_vm7, %v1064_v35  ;;  %690 = vrot.lane.b32.xlu0 %v1032_v12, %s6935_s26  ;;  %v2037_v35 = vld [vmem:[#allocation3 + $0x1] sm:$0xff] }
  0xf6   : > { %692 = vrot.lane.b32.xlu1 %v1420_v24, %s6935_s26 }
  0xf7   : > { %v1191_v36 = vpop.permute.xlu0 %1190 }
  0xf8   : > { %1235 = vst.msk [vmem:[#allocation6 + $0x20] sm:$0xff] %vm1230_vm8, %v1191_v36  ;;  %v1193_v37 = vpop.permute.xlu1 %1192  ;;  %v2038_v36 = vld [vmem:[#allocation3 + $0x9] sm:$0xff] }
  0xf9   : > { %1236 = vst.msk [vmem:[#allocation6 + $0x28] sm:$0xff] %vm1230_vm8, %v1193_v37  ;;  %819 = vrot.lane.b32.xlu0 %v1161_v17, %s6936_s27 }
  0xfa   : > { %821 = vrot.lane.b32.xlu1 %v1549_v29, %s6936_s27 }
  0xfb   : > { %v1321_v38 = vpop.permute.xlu0 %1320 }
  0xfc   : > { %1365 = vst.msk [vmem:[#allocation6 + $0x20] sm:$0xff] %vm1360_vm9, %v1321_v38  ;;  %v1323_v42 = vpop.permute.xlu1 %1322  ;;  %v2069_v38 = vpack.c.bf16 %v2038_v36, %v2037_v35 }
  0xfd   : > { %1366 = vst.msk [vmem:[#allocation6 + $0x28] sm:$0xff] %vm1360_vm9, %v1323_v42  ;;  %948 = vrot.lane.b32.xlu0 %v7304_v40, %s6937_s28 }
  0xfe   : > { %950 = vrot.lane.b32.xlu1 %v7322_v51, %s6937_s28 }
  0xff   : > { %v1450_v44 = vpop.permute.xlu0 %1449 }
 0x100   : > { %1494 = vst.msk [vmem:[#allocation6 + $0x20] sm:$0xff] %vm1489_vm10, %v1450_v44  ;;  %v1452_v47 = vpop.permute.xlu1 %1451 }
 0x101   : > { %1495 = vst.msk [vmem:[#allocation6 + $0x28] sm:$0xff] %vm1489_vm10, %v1452_v47  ;;  %1077 = vrot.lane.b32.xlu0 %v1420_v24, %s6938_s29  ;;  %v1407_v24 = vld [vmem:[#allocation2 + $0x199] sm:$0xff] }
 0x102   : > { %1079 = vrot.lane.b32.xlu1 %v1034_v43, %s6938_s29  ;;  %v1424_v0 = vpack.c.bf16 %v1408_v25, %v1407_v24 }
 0x103   : > { %v1579_v49 = vpop.permute.xlu0 %1578 }
 0x104   : > { %1623 = vst.msk [vmem:[#allocation6 + $0x20] sm:$0xff] %vm1618_vm11, %v1579_v49  ;;  %v1581_v40 = vpop.permute.xlu1 %1580 }
 0x105   : > { %1624 = vst.msk [vmem:[#allocation6 + $0x28] sm:$0xff] %vm1618_vm11, %v1581_v40  ;;  %1206 = vrot.lane.b32.xlu0 %v1549_v29, %s9135_s14 }
 0x106   : > { %1208 = vrot.lane.b32.xlu1 %v1163_v48, %s9135_s14 }
 0x107   : > { %v679_v2 = vpop.permute.xlu0 %678 }
 0x108   : > { %721 = vst.msk [vmem:[#allocation6 + $0x30] sm:$0xff] %vm714_vm4, %v679_v2  ;;  %v681_v54 = vpop.permute.xlu1 %680 }
 0x109   : > { %722 = vst.msk [vmem:[#allocation6 + $0x38] sm:$0xff] %vm714_vm4, %v681_v54  ;;  %1336 = vrot.lane.b32.xlu0 %v7322_v51, %s9136_s23  ;;  %v1551_v51 = vpack.c.bf16 %v1533_v59, %v1532_v53 }
 0x10a   : > { %1338 = vrot.lane.b32.xlu1 %v7340_v1, %s9136_s23 }
 0x10b   : > { %v808_v57 = vpop.permute.xlu0 %807  ;;  %v1639_v58 = vld [vmem:[#allocation6 + $0x20] sm:$0xff] }
 0x10c   : > { %850 = vst.msk [vmem:[#allocation6 + $0x30] sm:$0xff] %vm843_vm5, %v808_v57  ;;  %v810_v61 = vpop.permute.xlu1 %809  ;;  %6567 = vmatprep.mubr.msk.bf16.mxu0 %vm1694_vm12, %v1639_v58  ;;  %v1640_v62 = vld [vmem:[#allocation6 + $0x28] sm:$0xff] }
 0x10d   : > { %851 = vst.msk [vmem:[#allocation6 + $0x38] sm:$0xff] %vm843_vm5, %v810_v61  ;;  %1465 = vrot.lane.b32.xlu0 %v1034_v43, %s6941_s17  ;;  %6568 = vmatmul.mubr.msk.bf16.gmra.mrb[8].mxu0 %vm1694_vm12, %v1640_v62 }
 0x10e   : > { %1467 = vrot.lane.b32.xlu1 %v1422_v55, %s6941_s17 }
 0x10f   : > { %v937_v63 = vpop.permute.xlu0 %936 }
 0x110   : > { %979 = vst.msk [vmem:[#allocation6 + $0x30] sm:$0xff] %vm972_vm6, %v937_v63  ;;  %v939_v18 = vpop.permute.xlu1 %938 }
 0x111   : > { %980 = vst.msk [vmem:[#allocation6 + $0x38] sm:$0xff] %vm972_vm6, %v939_v18  ;;  %1594 = vrot.lane.b32.xlu0 %v1163_v48, %s6942_s24 }
 0x112   : > { %1596 = vrot.lane.b32.xlu1 %v1551_v51, %s6942_s24 }
 0x113   : > { %v1066_v3 = vpop.permute.xlu0 %1065 }
 0x114   : > { %1108 = vst.msk [vmem:[#allocation6 + $0x30] sm:$0xff] %vm1101_vm7, %v1066_v3  ;;  %v1068_v4 = vpop.permute.xlu1 %1067 }
 0x115   : > { %1109 = vst.msk [vmem:[#allocation6 + $0x38] sm:$0xff] %vm1101_vm7, %v1068_v4  ;;  %694 = vrot.lane.b32.xlu0 %v1034_v43, %s6935_s26 }
 0x116   : > { %696 = vrot.lane.b32.xlu1 %v1422_v55, %s6935_s26 }
 0x117   : > { %v1195_v5 = vpop.permute.xlu0 %1194 }
 0x118   : > { %1237 = vst.msk [vmem:[#allocation6 + $0x30] sm:$0xff] %vm1230_vm8, %v1195_v5  ;;  %v1197_v7 = vpop.permute.xlu1 %1196 }
 0x119   : > { %1238 = vst.msk [vmem:[#allocation6 + $0x38] sm:$0xff] %vm1230_vm8, %v1197_v7  ;;  %823 = vrot.lane.b32.xlu0 %v1163_v48, %s6936_s27 }
 0x11a   : > { %825 = vrot.lane.b32.xlu1 %v1551_v51, %s6936_s27 }
 0x11b   : > { %v1325_v9 = vpop.permute.xlu0 %1324 }
 0x11c   : > { %1367 = vst.msk [vmem:[#allocation6 + $0x30] sm:$0xff] %vm1360_vm9, %v1325_v9  ;;  %v1327_v12 = vpop.permute.xlu1 %1326 }
 0x11d   : > { %1368 = vst.msk [vmem:[#allocation6 + $0x38] sm:$0xff] %vm1360_vm9, %v1327_v12  ;;  %952 = vrot.lane.b32.xlu0 %v7340_v1, %s6937_s28  ;;  %v7516_v1 = vpack.c.bf16 %v1149_v16, %v1148_v15 }
 0x11e   : > { %954 = vrot.lane.b32.xlu1 %v7501_v8, %s6937_s28 }
 0x11f   : > { %v1454_v14 = vpop.permute.xlu0 %1453 }
 0x120   : > { %1496 = vst.msk [vmem:[#allocation6 + $0x30] sm:$0xff] %vm1489_vm10, %v1454_v14  ;;  %v1456_v17 = vpop.permute.xlu1 %1455 }
 0x121   : > { %1497 = vst.msk [vmem:[#allocation6 + $0x38] sm:$0xff] %vm1489_vm10, %v1456_v17  ;;  %1081 = vrot.lane.b32.xlu0 %v1422_v55, %s6938_s29 }
 0x122   : > { %1083 = vrot.lane.b32.xlu1 %v7509_v13, %s6938_s29  ;;  %s9077_s29 = scalar_lea.hbm %s9128_s9, %s6020_s25 }
 0x123   : > { %v1583_v19 = vpop.permute.xlu0 %1582 }
 0x124   : > { %1625 = vst.msk [vmem:[#allocation6 + $0x30] sm:$0xff] %vm1618_vm11, %v1583_v19  ;;  %v1585_v60 = vpop.permute.xlu1 %1584 }
 0x125   : > { %1626 = vst.msk [vmem:[#allocation6 + $0x38] sm:$0xff] %vm1618_vm11, %v1585_v60  ;;  %1210 = vrot.lane.b32.xlu0 %v1551_v51, %s9135_s14 }
 0x126   : > { %1212 = vrot.lane.b32.xlu1 %v7516_v1, %s9135_s14 }
 0x127   : > { %v683_v23 = vpop.permute.xlu0 %682 }
 0x128   : > { %723 = vst.msk [vmem:[#allocation6 + $0x40] sm:$0xff] %vm714_vm4, %v683_v23  ;;  %v685_v26 = vpop.permute.xlu1 %684 }
 0x129   : > { %724 = vst.msk [vmem:[#allocation6 + $0x48] sm:$0xff] %vm714_vm4, %v685_v26  ;;  %1340 = vrot.lane.b32.xlu0 %v7501_v8, %s9136_s23 }
 0x12a   : > { %1342 = vrot.lane.b32.xlu1 %v1295_v22, %s9136_s23  ;;  %s323_s23 = sand.u32 1, %s6924_s10  }
 0x12b   : > { %v812_v27 = vpop.permute.xlu0 %811  ;;  %v1641_v28 = vld [vmem:[#allocation6 + $0x30] sm:$0xff]  ;;  %s324_s26 = scalar_lea.vmem [#allocation11], %s323_s23  ;;  %s5743_s16 = scalar_lea.sflag [#allocation12], %s323_s23 }
 0x12c   : > { %852 = vst.msk [vmem:[#allocation6 + $0x40] sm:$0xff] %vm843_vm5, %v812_v27  ;;  %v814_v29 = vpop.permute.xlu1 %813  ;;  %6571 = vmatprep.mubr.msk.bf16.mxu0 %vm1694_vm12, %v1641_v28  ;;  %v1642_v32 = vld [vmem:[#allocation6 + $0x38] sm:$0xff]  ;;  %v6725_v27 = vld [vmem:[%s9122_s3 + $0x40] sm:$0xff]   ;;  %s5755_s27 = sshll.u32 %s324_s26, 4  ;;  %s9079_s27 = int_to_ptr.vmem [resolvable:$true] %s5755_s27 }
 0x12d   : > { %853 = vst.msk [vmem:[#allocation6 + $0x48] sm:$0xff] %vm843_vm5, %v814_v29  ;;  %1469 = vrot.lane.b32.xlu0 %v7509_v13, %s6941_s17  ;;  %6572 = vmatmul.mubr.msk.bf16.gmra.mrb[12].mxu0 %vm1694_vm12, %v1642_v32  ;;  %v6727_v29 = vld [vmem:[%s9122_s3 + $0x48] sm:$0xff]   ;;  %p6877_p0 = scmp.lt.s32.totalorder %s9079_s27, %s6875_s21 }
 0x12e   : > { %1471 = vrot.lane.b32.xlu1 %v1424_v0, %s6941_s17  ;;  %6045 = vmatprep.subr.bf16.mxu1 %v6725_v27  ;;  %s6870_s17 = scalar_lea.vmem %s9079_s27, 16 }
 0x12f   : > { %v941_v34 = vpop.permute.xlu0 %940  ;;  %6046 = vmatpush3.bf16.msra.mxu1 %v6726_v30  ;;  %p6871_p11 = scmp.ne.s32.totalorder %s9079_s27, %s6870_s17  ;;  %p6878_p1 = scmp.lt.s32.totalorder %s6876_s22, %s6870_s17 }
 0x130   : > { %981 = vst.msk [vmem:[#allocation6 + $0x40] sm:$0xff] %vm972_vm6, %v941_v34  ;;  %v943_v37 = vpop.permute.xlu1 %942  ;;  %v6729_v34 = vld [vmem:[%s9122_s3 + $0x50] sm:$0xff]   ;;  %6047 = vmatprep.subr.bf16.mxu1 %v6727_v29 }
 0x131   : > { %982 = vst.msk [vmem:[#allocation6 + $0x48] sm:$0xff] %vm972_vm6, %v943_v37  ;;  %1598 = vrot.lane.b32.xlu0 %v7516_v1, %s6942_s24  ;;  %v6730_v37 = vld [vmem:[%s9122_s3 + $0x10] sm:$0xff]   ;;  %p6872_p12 = pnand %p6871_p11, %p7032_p5  ;;  %p6879_p2 = por %p6878_p1, %p6877_p0 }
 0x132   : > { %1600 = vrot.lane.b32.xlu1 %v1553_v33, %s6942_s24  ;;  %v6728_v33 = vld [vmem:[%s9122_s3 + $0x8] sm:$0xff]  }
 0x133   : > { %v1070_v39 = vpop.permute.xlu0 %1069  ;;  %6048 = vmatpush3.bf16.msra.mxu1 %v6728_v33  ;;  %p6873_p13 = pneg %p6872_p12 }
 0x134   : > { %1110 = vst.msk [vmem:[#allocation6 + $0x40] sm:$0xff] %vm1101_vm7, %v1070_v39  ;;  %v1072_v41 = vpop.permute.xlu1 %1071  ;;  %6049 = vmatprep.subr.bf16.mxu1 %v6729_v34 }
 0x135   : > { %1111 = vst.msk [vmem:[#allocation6 + $0x48] sm:$0xff] %vm1101_vm7, %v1072_v41  ;;  %p6880_p3 = pnand %p6879_p2, %p6873_p13 }
 0x136   : > { %2101 = vrot.lane.b32.xlu1 %v2069_v38, %s6942_s24  ;;  %v6731_v38 = vld [vmem:[%s9122_s3 + $0x58] sm:$0xff]  }
 0x137   : > { %v1199_v42 = vpop.permute.xlu0 %1198  ;;  %6050 = vmatpush3.bf16.msra.mxu1 %v6730_v37 }
 0x138   : > { %1239 = vst.msk [vmem:[#allocation6 + $0x40] sm:$0xff] %vm1230_vm8, %v1199_v42  ;;  %v1201_v43 = vpop.permute.xlu1 %1200  ;;  %6051 = vmatprep.subr.bf16.mxu1 %v6731_v38  ;;  %v6732_v42 = vld [vmem:[%s9122_s3 + $0x18] sm:$0xff]  }
 0x139   : > { %1240 = vst.msk [vmem:[#allocation6 + $0x48] sm:$0xff] %vm1230_vm8, %v1201_v43  ;;  %v6733_v43 = vld [vmem:[%s9122_s3 + $0x60] sm:$0xff]  }
 0x13b   : > { %v1329_v44 = vpop.permute.xlu0 %1328  ;;  %6052 = vmatpush3.bf16.msra.mxu1 %v6732_v42 }
 0x13c   : > { %1369 = vst.msk [vmem:[#allocation6 + $0x40] sm:$0xff] %vm1360_vm9, %v1329_v44  ;;  %v1331_v45 = vpop.permute.xlu1 %1330  ;;  %6053 = vmatprep.subr.bf16.mxu1 %v6733_v43 }
 0x13d   : > { %1370 = vst.msk [vmem:[#allocation6 + $0x48] sm:$0xff] %vm1360_vm9, %v1331_v45  ;;  %v7765_v45 = vld [vmem:[%s9121_s2] ss:$0 sm:$0xff] }
 0x13f   : > { %v1458_v46 = vpop.permute.xlu0 %1457 }
 0x140   : > { %1498 = vst.msk [vmem:[#allocation6 + $0x40] sm:$0xff] %vm1489_vm10, %v1458_v46  ;;  %v1460_v47 = vpop.permute.xlu1 %1459 }
 0x141   : > { %1499 = vst.msk [vmem:[#allocation6 + $0x48] sm:$0xff] %vm1489_vm10, %v1460_v47  ;;  %v6734_v47 = vld [vmem:[%s9122_s3 + $0x20] sm:$0xff]  }
 0x142   : > { %6054 = vmatpush3.bf16.msra.mxu1 %v6734_v47 }
 0x143   : > { %v1587_v48 = vpop.permute.xlu0 %1586 }
 0x144   : > { %1627 = vst.msk [vmem:[#allocation6 + $0x40] sm:$0xff] %vm1618_vm11, %v1587_v48  ;;  %v1589_v49 = vpop.permute.xlu1 %1588  ;;  %v1973_v48 = vld [vmem:[#allocation3] sm:$0xff] }
 0x145   : > { %1628 = vst.msk [vmem:[#allocation6 + $0x48] sm:$0xff] %vm1618_vm11, %v1589_v49  ;;  %v1974_v49 = vld [vmem:[#allocation3 + $0x8] sm:$0xff] }
 0x147   : > { %v687_v40 = vpop.permute.xlu0 %686 }
 0x148   : > { %725 = vst.msk [vmem:[#allocation6 + $0x50] sm:$0xff] %vm714_vm4, %v687_v40  ;;  %v689_v2 = vpop.permute.xlu1 %688 }
 0x149   : > { %726 = vst.msk [vmem:[#allocation6 + $0x58] sm:$0xff] %vm714_vm4, %v689_v2 }
 0x14b   : > { %v816_v50 = vpop.permute.xlu0 %815  ;;  %v1643_v52 = vld [vmem:[#allocation6 + $0x40] sm:$0xff] }
 0x14c   : > { %854 = vst.msk [vmem:[#allocation6 + $0x50] sm:$0xff] %vm843_vm5, %v816_v50  ;;  %v818_v54 = vpop.permute.xlu1 %817  ;;  %6575 = vmatprep.mubr.msk.bf16.mxu0 %vm1694_vm12, %v1643_v52  ;;  %v1644_v55 = vld [vmem:[#allocation6 + $0x48] sm:$0xff]  ;;  %v2005_v50 = vpack.c.bf16 %v1974_v49, %v1973_v48 }
 0x14d   : > { %855 = vst.msk [vmem:[#allocation6 + $0x58] sm:$0xff] %vm843_vm5, %v818_v54  ;;  %6576 = vmatmul.mubr.msk.bf16.gmra.mrb[16].mxu0 %vm1694_vm12, %v1644_v55 }
 0x14e   : > { %2021 = vst.msk [vmem:[#allocation7] sm:$0xff] %vm377_vm13, %v2005_v50 }
 0x14f   : > { %v945_v57 = vpop.permute.xlu0 %944 }
 0x150   : > { %983 = vst.msk [vmem:[#allocation6 + $0x50] sm:$0xff] %vm972_vm6, %v945_v57  ;;  %v947_v58 = vpop.permute.xlu1 %946 }
 0x151   : > { %984 = vst.msk [vmem:[#allocation6 + $0x58] sm:$0xff] %vm972_vm6, %v947_v58  ;;  %v6735_v58 = vld [vmem:[%s9122_s3 + $0x68] sm:$0xff]  }
 0x152   : > { %6055 = vmatprep.subr.bf16.mxu1 %v6735_v58 }
 0x153   : > { %v1074_v53 = vpop.permute.xlu0 %1073 }
 0x154   : > { %1112 = vst.msk [vmem:[#allocation6 + $0x50] sm:$0xff] %vm1101_vm7, %v1074_v53  ;;  %v1076_v59 = vpop.permute.xlu1 %1075 }
 0x155   : > { %1113 = vst.msk [vmem:[#allocation6 + $0x58] sm:$0xff] %vm1101_vm7, %v1076_v59 }
 0x157   : > { %v1203_v61 = vpop.permute.xlu0 %1202 }
 0x158   : > { %1241 = vst.msk [vmem:[#allocation6 + $0x50] sm:$0xff] %vm1230_vm8, %v1203_v61  ;;  %v1205_v62 = vpop.permute.xlu1 %1204 }
 0x159   : > { %1242 = vst.msk [vmem:[#allocation6 + $0x58] sm:$0xff] %vm1230_vm8, %v1205_v62 }
 0x15b   : > { %v1333_v51 = vpop.permute.xlu0 %1332 }
 0x15c   : > { %1371 = vst.msk [vmem:[#allocation6 + $0x50] sm:$0xff] %vm1360_vm9, %v1333_v51  ;;  %v1335_v63 = vpop.permute.xlu1 %1334  ;;  %v6736_v51 = vld [vmem:[%s9122_s3 + $0x28] sm:$0xff]  }
 0x15d   : > { %1372 = vst.msk [vmem:[#allocation6 + $0x58] sm:$0xff] %vm1360_vm9, %v1335_v63  ;;  %v2166_v63 = vld [vmem:[#allocation3 + $0x2] sm:$0xff]  ;;  %6056 = vmatpush3.bf16.msra.mxu1 %v6736_v51 }
 0x15f   : > { %v1462_v18 = vpop.permute.xlu0 %1461 }
 0x160   : > { %1500 = vst.msk [vmem:[#allocation6 + $0x50] sm:$0xff] %vm1489_vm10, %v1462_v18  ;;  %v1464_v3 = vpop.permute.xlu1 %1463  ;;  %v2167_v18 = vld [vmem:[#allocation3 + $0xa] sm:$0xff] }
 0x161   : > { %1501 = vst.msk [vmem:[#allocation6 + $0x58] sm:$0xff] %vm1489_vm10, %v1464_v3 }
 0x163   : > { %v1591_v4 = vpop.permute.xlu0 %1590 }
 0x164   : > { %1629 = vst.msk [vmem:[#allocation6 + $0x50] sm:$0xff] %vm1618_vm11, %v1591_v4  ;;  %v1593_v5 = vpop.permute.xlu1 %1592 }
 0x165   : > { %1630 = vst.msk [vmem:[#allocation6 + $0x58] sm:$0xff] %vm1618_vm11, %v1593_v5 }
 0x167   : > { %v691_v6 = vpop.permute.xlu0 %690 }
 0x168   : > { %727 = vst.msk [vmem:[#allocation6 + $0x60] sm:$0xff] %vm714_vm4, %v691_v6  ;;  %v693_v56 = vpop.permute.xlu1 %692  ;;  %v2198_v6 = vpack.c.bf16 %v2167_v18, %v2166_v63 }
 0x169   : > { %728 = vst.msk [vmem:[#allocation6 + $0x68] sm:$0xff] %vm714_vm4, %v693_v56 }
 0x16a   : > { %2214 = vst.msk [vmem:[#allocation7 + $0x8] sm:$0xff] %vm377_vm13, %v2198_v6 }
 0x16b   : > { %v820_v7 = vpop.permute.xlu0 %819  ;;  %v1645_v8 = vld [vmem:[#allocation6 + $0x50] sm:$0xff] }
 0x16c   : > { %856 = vst.msk [vmem:[#allocation6 + $0x60] sm:$0xff] %vm843_vm5, %v820_v7  ;;  %v822_v9 = vpop.permute.xlu1 %821  ;;  %6579 = vmatprep.mubr.msk.bf16.mxu0 %vm1694_vm12, %v1645_v8  ;;  %v1646_v10 = vld [vmem:[#allocation6 + $0x58] sm:$0xff]  ;;  %v6737_v8 = vld [vmem:[%s9122_s3 + $0x70] sm:$0xff]  }
 0x16d   : > { %857 = vst.msk [vmem:[#allocation6 + $0x68] sm:$0xff] %vm843_vm5, %v822_v9  ;;  %6580 = vmatmul.mubr.msk.bf16.gmra.mrb[20].mxu0 %vm1694_vm12, %v1646_v10  ;;  %v6738_v9 = vld [vmem:[%s9122_s3 + $0x30] sm:$0xff]   ;;  %6057 = vmatprep.subr.bf16.mxu1 %v6737_v8 }
 0x16e   : > { %6058 = vmatpush3.bf16.msra.mxu1 %v6738_v9 }
 0x16f   : > { %v949_v11 = vpop.permute.xlu0 %948 }
 0x170   : > { %985 = vst.msk [vmem:[#allocation6 + $0x60] sm:$0xff] %vm972_vm6, %v949_v11  ;;  %v951_v12 = vpop.permute.xlu1 %950  ;;  %v6739_v11 = vld [vmem:[%s9122_s3 + $0x78] sm:$0xff]  }
 0x171   : > { %986 = vst.msk [vmem:[#allocation6 + $0x68] sm:$0xff] %vm972_vm6, %v951_v12  ;;  %6059 = vmatprep.subr.bf16.mxu1 %v6739_v11 }
 0x173   : > { %v1078_v13 = vpop.permute.xlu0 %1077 }
 0x174   : > { %1114 = vst.msk [vmem:[#allocation6 + $0x60] sm:$0xff] %vm1101_vm7, %v1078_v13  ;;  %v1080_v14 = vpop.permute.xlu1 %1079  ;;  %v6740_v13 = vld [vmem:[%s9122_s3 + $0x38] sm:$0xff]  }
 0x175   : > { %1115 = vst.msk [vmem:[#allocation6 + $0x68] sm:$0xff] %vm1101_vm7, %v1080_v14  ;;  %6060 = vmatpush3.bf16.msra.mxu1 %v6740_v13 }
 0x177   : > { %v1207_v15 = vpop.permute.xlu0 %1206 }
 0x178   : > { %1243 = vst.msk [vmem:[#allocation6 + $0x60] sm:$0xff] %vm1230_vm8, %v1207_v15  ;;  %v1209_v16 = vpop.permute.xlu1 %1208 }
 0x179   : > { %1244 = vst.msk [vmem:[#allocation6 + $0x68] sm:$0xff] %vm1230_vm8, %v1209_v16 }
 0x17b   : > { %v1337_v17 = vpop.permute.xlu0 %1336 }
 0x17c   : > { %1373 = vst.msk [vmem:[#allocation6 + $0x60] sm:$0xff] %vm1360_vm9, %v1337_v17  ;;  %v1339_v1 = vpop.permute.xlu1 %1338 }
 0x17d   : > { %1374 = vst.msk [vmem:[#allocation6 + $0x68] sm:$0xff] %vm1360_vm9, %v1339_v1 }
 0x17f   : > { %v1466_v19 = vpop.permute.xlu0 %1465 }
 0x180   : > { %1502 = vst.msk [vmem:[#allocation6 + $0x60] sm:$0xff] %vm1489_vm10, %v1466_v19  ;;  %v1468_v21 = vpop.permute.xlu1 %1467 }
 0x181   : > { %1503 = vst.msk [vmem:[#allocation6 + $0x68] sm:$0xff] %vm1489_vm10, %v1468_v21 }
 0x183   : > { %v1595_v20 = vpop.permute.xlu0 %1594 }
 0x184   : > { %1631 = vst.msk [vmem:[#allocation6 + $0x60] sm:$0xff] %vm1618_vm11, %v1595_v20  ;;  %v1597_v60 = vpop.permute.xlu1 %1596 }
 0x185   : > { %1632 = vst.msk [vmem:[#allocation6 + $0x68] sm:$0xff] %vm1618_vm11, %v1597_v60 }
 0x187   : > { %v695_v22 = vpop.permute.xlu0 %694 }
 0x188   : > { %729 = vst.msk [vmem:[#allocation6 + $0x70] sm:$0xff] %vm714_vm4, %v695_v22  ;;  %v697_v23 = vpop.permute.xlu1 %696 }
 0x189   : > { %730 = vst.msk [vmem:[#allocation6 + $0x78] sm:$0xff] %vm714_vm4, %v697_v23 }
 0x18b   : > { %v824_v24 = vpop.permute.xlu0 %823  ;;  %v1647_v25 = vld [vmem:[#allocation6 + $0x60] sm:$0xff] }
 0x18c   : > { %858 = vst.msk [vmem:[#allocation6 + $0x70] sm:$0xff] %vm843_vm5, %v824_v24  ;;  %v826_v26 = vpop.permute.xlu1 %825  ;;  %6583 = vmatprep.mubr.msk.bf16.mxu0 %vm1694_vm12, %v1647_v25  ;;  %v1648_v0 = vld [vmem:[#allocation6 + $0x68] sm:$0xff] }
 0x18d   : > { %859 = vst.msk [vmem:[#allocation6 + $0x78] sm:$0xff] %vm843_vm5, %v826_v26  ;;  %6584 = vmatmul.mubr.msk.bf16.gmra.mrb[24].mxu0 %vm1694_vm12, %v1648_v0 }
 0x18f   : > { %v953_v28 = vpop.permute.xlu0 %952 }
 0x190   : > { %987 = vst.msk [vmem:[#allocation6 + $0x70] sm:$0xff] %vm972_vm6, %v953_v28  ;;  %v955_v31 = vpop.permute.xlu1 %954 }
 0x191   : > { %988 = vst.msk [vmem:[#allocation6 + $0x78] sm:$0xff] %vm972_vm6, %v955_v31 }
 0x193   : > { %v1082_v32 = vpop.permute.xlu0 %1081 }
 0x194   : > { %1116 = vst.msk [vmem:[#allocation6 + $0x70] sm:$0xff] %vm1101_vm7, %v1082_v32  ;;  %v1084_v35 = vpop.permute.xlu1 %1083 }
 0x195   : > { %1117 = vst.msk [vmem:[#allocation6 + $0x78] sm:$0xff] %vm1101_vm7, %v1084_v35 }
 0x197   : > { %v1211_v36 = vpop.permute.xlu0 %1210 }
 0x198   : > { %1245 = vst.msk [vmem:[#allocation6 + $0x70] sm:$0xff] %vm1230_vm8, %v1211_v36  ;;  %v1213_v39 = vpop.permute.xlu1 %1212 }
 0x199   : > { %1246 = vst.msk [vmem:[#allocation6 + $0x78] sm:$0xff] %vm1230_vm8, %v1213_v39 }
 0x19b   : > { %v1341_v41 = vpop.permute.xlu0 %1340 }
 0x19c   : > { %1375 = vst.msk [vmem:[#allocation6 + $0x70] sm:$0xff] %vm1360_vm9, %v1341_v41  ;;  %v1343_v44 = vpop.permute.xlu1 %1342 }
 0x19d   : > { %1376 = vst.msk [vmem:[#allocation6 + $0x78] sm:$0xff] %vm1360_vm9, %v1343_v44 }
 0x19f   : > { %v1470_v46 = vpop.permute.xlu0 %1469 }
 0x1a0   : > { %1504 = vst.msk [vmem:[#allocation6 + $0x70] sm:$0xff] %vm1489_vm10, %v1470_v46  ;;  %v1472_v40 = vpop.permute.xlu1 %1471  ;;  %v6561_v2 = vpop.f32.mrb[0].mxu0 }
 0x1a1   : > { %1505 = vst.msk [vmem:[#allocation6 + $0x78] sm:$0xff] %vm1489_vm10, %v1472_v40  ;;  %v1790_v52 = vadd.f32 %v6561_v2, %v7765_v45  ;;  %v1781_v54 = vpop.f32.mrb[1].mxu0 }
 0x1a2   : > { %v1782_v55 = vadd.f32 %v7765_v45, %v1781_v54  ;;  %v6562_v57 = vpop.f32.mrb[2].mxu0 }
 0x1a3   : > { %v1910_v53 = vmax.f32 %v1790_v52, 0.0  ;;  %v1793_v59 = vadd.f32 %v6562_v57, %v7765_v45  ;;  %v1599_v61 = vpop.permute.xlu0 %1598  ;;  %v1784_v62 = vpop.f32.mrb[3].mxu0 }
 0x1a4   : > { %v1908_v3 = vmax.f32 %v1782_v55, 0.0  ;;  %1633 = vst.msk [vmem:[#allocation6 + $0x70] sm:$0xff] %vm1618_vm11, %v1599_v61  ;;  %v1785_v4 = vadd.f32 %v7765_v45, %v1784_v62  ;;  %v1601_v5 = vpop.permute.xlu1 %1600 }
 0x1a5   : > { %1943 = vst.msk [vmem:[#allocation3 + $0x31] sm:$0xff] %vm377_vm13, %v1910_v53  ;;  %v1911_v56 = vmax.f32 %v1793_v59, 0.0 }
 0x1a6   : > { %1634 = vst.msk [vmem:[#allocation6 + $0x78] sm:$0xff] %vm1618_vm11, %v1601_v5  ;;  %v1909_v7 = vmax.f32 %v1785_v4, 0.0 }
 0x1a7   : > { %1941 = vst.msk [vmem:[#allocation3 + $0x19] sm:$0xff] %vm377_vm13, %v1908_v3  ;;  %1944 = vst.msk [vmem:[#allocation3 + $0x39] sm:$0xff] %vm377_vm13, %v1911_v56 }
 0x1a8   : > { %1942 = vst.msk [vmem:[#allocation3 + $0x21] sm:$0xff] %vm377_vm13, %v1909_v7  ;;  %v2102_v10 = vpop.permute.xlu1 %2101 }
 0x1a9   : > { %2150 = vst.msk [vmem:[#allocation7] sm:$0xff] %vm2149_vm0, %v2102_v10 }
 0x1ab   : > { %v1649_v12 = vld [vmem:[#allocation6 + $0x70] sm:$0xff] }
 0x1ac   : > { %6587 = vmatprep.mubr.msk.bf16.mxu0 %vm1694_vm12, %v1649_v12  ;;  %v2232_v17 = vld [vmem:[#allocation3 + $0x30] sm:$0xff] }
 0x1ad   : > { %v1650_v14 = vld [vmem:[#allocation6 + $0x78] sm:$0xff]  ;;  %v2551_v29 = vld [vmem:[#allocation3 + $0x30] sm:$0xff] }
 0x1ae   : > { %6588 = vmatmul.mubr.msk.bf16.gmra.mrb[28].mxu0 %vm1694_vm12, %v1650_v14  ;;  %v2230_v15 = vld [vmem:[#allocation3 + $0x18] sm:$0xff] }
 0x1af   : > { %v2039_v16 = vld [vmem:[#allocation3 + $0x19] sm:$0xff]  ;;  %v2040_v22 = vld [vmem:[#allocation3 + $0x21] sm:$0xff]  ;;  %v2360_v35 = vld [vmem:[#allocation3 + $0x31] sm:$0xff] }
 0x1b0   : > { %v2743_v1 = vld [vmem:[#allocation3 + $0x32] sm:$0xff]  ;;  %v2744_v19 = vld [vmem:[#allocation3 + $0x3a] sm:$0xff]  ;;  %v2070_v26 = vpack.c.bf16 %v2040_v22, %v2039_v16  ;;  %v2423_v28 = vld [vmem:[#allocation3 + $0x22] sm:$0xff] }
 0x1b1   : > { %v2233_v21 = vld [vmem:[#allocation3 + $0x38] sm:$0xff]  ;;  %v7805_v20 = vpack.c.bf16 %v2744_v19, %v2743_v1  ;;  %v2231_v60 = vld [vmem:[#allocation3 + $0x20] sm:$0xff] }
 0x1b2   : > { %v2263_v23 = vpack.c.bf16 %v2233_v21, %v2232_v17  ;;  %v2358_v24 = vld [vmem:[#allocation3 + $0x19] sm:$0xff]  ;;  %v2262_v25 = vpack.c.bf16 %v2231_v60, %v2230_v15  ;;  %v2359_v31 = vld [vmem:[#allocation3 + $0x21] sm:$0xff]  ;;  %2103 = vrot.lane.b32.xlu1 %v2070_v26, %s6942_s24  ;;  %v2041_v37 = vld [vmem:[#allocation3 + $0x31] sm:$0xff] }
 0x1b3   : > { %v2042_v0 = vld [vmem:[#allocation3 + $0x39] sm:$0xff]  ;;  %2791 = vst.msk [vmem:[#allocation7 + $0x20] sm:$0xff] %vm377_vm13, %v7805_v20  ;;  %2216 = vst.msk [vmem:[#allocation7 + $0x58] sm:$0xff] %vm377_vm13, %v7805_v20  ;;  %v2390_v33 = vpack.c.bf16 %v2359_v31, %v2358_v24 }
 0x1b4   : > { %v2422_v27 = vld [vmem:[#allocation3 + $0x1a] sm:$0xff]  ;;  %2023 = vst.msk [vmem:[#allocation7 + $0x50] sm:$0xff] %vm377_vm13, %v2263_v23  ;;  %2294 = vrot.lane.b32.xlu0 %v2262_v25, %s6942_s24  ;;  %2022 = vst.msk [vmem:[#allocation7 + $0x28] sm:$0xff] %vm377_vm13, %v2262_v25  ;;  %v7819_v39 = vpack.c.bf16 %v2042_v0, %v2041_v37 }
 0x1b5   : > { %v7809_v30 = vpack.c.bf16 %v2423_v28, %v2422_v27  ;;  %v2552_v32 = vld [vmem:[#allocation3 + $0x38] sm:$0xff]  ;;  %2406 = vst.msk [vmem:[#allocation7 + $0x10] sm:$0xff] %vm377_vm13, %v2390_v33 }
 0x1b6   : > { %v2583_v34 = vpack.c.bf16 %v2552_v32, %v2551_v29  ;;  %v2361_v36 = vld [vmem:[#allocation3 + $0x39] sm:$0xff]  ;;  %2105 = vrot.lane.b32.xlu1 %v7819_v39, %s6942_s24 }
 0x1b7   : > { %2215 = vst.msk [vmem:[#allocation7 + $0x30] sm:$0xff] %vm377_vm13, %v7809_v30  ;;  %v2391_v38 = vpack.c.bf16 %v2361_v36, %v2360_v35 }
 0x1b8   : > { %2599 = vst.msk [vmem:[#allocation7 + $0x18] sm:$0xff] %vm377_vm13, %v2583_v34  ;;  %2296 = vrot.lane.b32.xlu0 %v2263_v23, %s6942_s24 }
 0x1b9   : > { %2407 = vst.msk [vmem:[#allocation7 + $0x38] sm:$0xff] %vm377_vm13, %v2391_v38 }
 0x1c0   : > { %v6565_v41 = vpop.f32.mrb[4].mxu0 }
 0x1c1   : > { %v1806_v42 = vadd.f32 %v6565_v41, %v7765_v45  ;;  %v1797_v43 = vpop.f32.mrb[5].mxu0 }
 0x1c2   : > { %v1798_v44 = vadd.f32 %v7765_v45, %v1797_v43  ;;  %v6566_v46 = vpop.f32.mrb[6].mxu0 }
 0x1c3   : > { %v1914_v47 = vmax.f32 %v1806_v42, 0.0  ;;  %v1809_v48 = vadd.f32 %v6566_v46, %v7765_v45  ;;  %v1800_v49 = vpop.f32.mrb[7].mxu0 }
 0x1c4   : > { %v1912_v40 = vmax.f32 %v1798_v44, 0.0  ;;  %v1801_v2 = vadd.f32 %v7765_v45, %v1800_v49 }
 0x1c5   : > { %1947 = vst.msk [vmem:[#allocation3 + $0x61] sm:$0xff] %vm377_vm13, %v1914_v47  ;;  %v1915_v50 = vmax.f32 %v1809_v48, 0.0 }
 0x1c6   : > { %1945 = vst.msk [vmem:[#allocation3 + $0x49] sm:$0xff] %vm377_vm13, %v1912_v40  ;;  %v1913_v52 = vmax.f32 %v1801_v2, 0.0 }
 0x1c7   : > { %1948 = vst.msk [vmem:[#allocation3 + $0x69] sm:$0xff] %vm377_vm13, %v1915_v50 }
 0x1c8   : > { %1946 = vst.msk [vmem:[#allocation3 + $0x51] sm:$0xff] %vm377_vm13, %v1913_v52 }
 0x1cc   : > { %v2236_v55 = vld [vmem:[#allocation3 + $0x60] sm:$0xff] }
 0x1cd   : > { %v2234_v54 = vld [vmem:[#allocation3 + $0x48] sm:$0xff]  ;;  %v2555_v3 = vld [vmem:[#allocation3 + $0x60] sm:$0xff] }
 0x1ce   : > { %v2747_v57 = vld [vmem:[#allocation3 + $0x62] sm:$0xff]  ;;  %v2748_v58 = vld [vmem:[#allocation3 + $0x6a] sm:$0xff] }
 0x1cf   : > { %v2043_v53 = vld [vmem:[#allocation3 + $0x49] sm:$0xff]  ;;  %v7835_v61 = vpack.c.bf16 %v2748_v58, %v2747_v57  ;;  %v2746_v51 = vld [vmem:[#allocation3 + $0x52] sm:$0xff]  ;;  %v2364_v16 = vld [vmem:[#allocation3 + $0x61] sm:$0xff] }
 0x1d0   : > { %v2237_v59 = vld [vmem:[#allocation3 + $0x68] sm:$0xff]  ;;  %v2235_v63 = vld [vmem:[#allocation3 + $0x50] sm:$0xff] }
 0x1d1   : > { %v2745_v62 = vld [vmem:[#allocation3 + $0x4a] sm:$0xff]  ;;  %v2265_v18 = vpack.c.bf16 %v2237_v59, %v2236_v55  ;;  %v2264_v5 = vpack.c.bf16 %v2235_v63, %v2234_v54  ;;  %2793 = vst.msk [vmem:[#allocation7 + $0x70] sm:$0xff] %vm377_vm13, %v7835_v61  ;;  %2218 = vst.msk [vmem:[#allocation7 + $0xa8] sm:$0xff] %vm377_vm13, %v7835_v61  ;;  %v2045_v19 = vld [vmem:[#allocation3 + $0x61] sm:$0xff] }
 0x1d2   : > { %v7837_v4 = vpack.c.bf16 %v2746_v51, %v2745_v62  ;;  %v2044_v6 = vld [vmem:[#allocation3 + $0x51] sm:$0xff]  ;;  %v2553_v56 = vld [vmem:[#allocation3 + $0x48] sm:$0xff] }
 0x1d3   : > { %v2554_v7 = vld [vmem:[#allocation3 + $0x50] sm:$0xff]  ;;  %v7841_v8 = vpack.c.bf16 %v2044_v6, %v2043_v53  ;;  %2025 = vst.msk [vmem:[#allocation7 + $0xa0] sm:$0xff] %vm377_vm13, %v2265_v18  ;;  %v2556_v12 = vld [vmem:[#allocation3 + $0x68] sm:$0xff]  ;;  %2298 = vrot.lane.b32.xlu0 %v2264_v5, %s6942_s24  ;;  %2024 = vst.msk [vmem:[#allocation7 + $0x78] sm:$0xff] %vm377_vm13, %v2264_v5 }
 0x1d4   : > { %v2584_v9 = vpack.c.bf16 %v2554_v7, %v2553_v56  ;;  %v2362_v10 = vld [vmem:[#allocation3 + $0x49] sm:$0xff]  ;;  %v2363_v11 = vld [vmem:[#allocation3 + $0x51] sm:$0xff]  ;;  %2792 = vst.msk [vmem:[#allocation7 + $0x48] sm:$0xff] %vm377_vm13, %v7837_v4  ;;  %2217 = vst.msk [vmem:[#allocation7 + $0x80] sm:$0xff] %vm377_vm13, %v7837_v4  ;;  %v2585_v15 = vpack.c.bf16 %v2556_v12, %v2555_v3 }
 0x1d5   : > { %v2046_v13 = vld [vmem:[#allocation3 + $0x69] sm:$0xff]  ;;  %v2392_v14 = vpack.c.bf16 %v2363_v11, %v2362_v10  ;;  %2107 = vrot.lane.b32.xlu1 %v7841_v8, %s6942_s24  ;;  %v6743_v7 = vld [vmem:[%s9122_s3 + $0xc8] sm:$0xff]   ;;  %v6745_v10 = vld [vmem:[%s9122_s3 + $0xd0] sm:$0xff]  }
 0x1d6   : > { %v2365_v17 = vld [vmem:[#allocation3 + $0x69] sm:$0xff]  ;;  %2600 = vst.msk [vmem:[#allocation7 + $0x40] sm:$0xff] %vm377_vm13, %v2584_v9  ;;  %2601 = vst.msk [vmem:[#allocation7 + $0x68] sm:$0xff] %vm377_vm13, %v2585_v15  ;;  %v7857_v21 = vpack.c.bf16 %v2046_v13, %v2045_v19  ;;  %v6744_v9 = vld [vmem:[%s9122_s3 + $0x88] sm:$0xff]  }
 0x1d7   : > { %v2393_v1 = vpack.c.bf16 %v2365_v17, %v2364_v16  ;;  %2408 = vst.msk [vmem:[#allocation7 + $0x60] sm:$0xff] %vm377_vm13, %v2392_v14  ;;  %2300 = vrot.lane.b32.xlu0 %v2265_v18, %s6942_s24  ;;  %v6741_v18 = vld [vmem:[%s9122_s3 + $0xc0] sm:$0xff]   ;;  %v6746_v11 = vld [vmem:[%s9122_s3 + $0x90] sm:$0xff]   ;;  %v6747_v17 = vld [vmem:[%s9122_s3 + $0xd8] sm:$0xff]  }
 0x1d8   : > { %6157 = vmatprep.subr.bf16.mxu0 %v6741_v18  ;;  %v6742_v56 = vld [vmem:[%s9122_s3 + $0x80] sm:$0xff]  }
 0x1d9   : > { %2409 = vst.msk [vmem:[#allocation7 + $0x88] sm:$0xff] %vm377_vm13, %v2393_v1  ;;  %2109 = vrot.lane.b32.xlu1 %v7857_v21, %s6942_s24  ;;  %6158 = vmatpush3.bf16.msra.mxu0 %v6742_v56 }
 0x1da   : > { %6159 = vmatprep.subr.bf16.mxu0 %v6743_v7 }
 0x1dd   : > { %6160 = vmatpush3.bf16.msra.mxu0 %v6744_v9 }
 0x1de   : > { %6161 = vmatprep.subr.bf16.mxu0 %v6745_v10 }
 0x1e0   : > { %v6569_v60 = vpop.f32.mrb[8].mxu0 }
 0x1e1   : > { %v1822_v22 = vadd.f32 %v6569_v60, %v7765_v45  ;;  %v1813_v23 = vpop.f32.mrb[9].mxu0  ;;  %6162 = vmatpush3.bf16.msra.mxu0 %v6746_v11 }
 0x1e2   : > { %v1814_v24 = vadd.f32 %v7765_v45, %v1813_v23  ;;  %v6570_v25 = vpop.f32.mrb[10].mxu0  ;;  %6163 = vmatprep.subr.bf16.mxu0 %v6747_v17 }
 0x1e3   : > { %v1918_v26 = vmax.f32 %v1822_v22, 0.0  ;;  %v1825_v0 = vadd.f32 %v6570_v25, %v7765_v45  ;;  %v1816_v27 = vpop.f32.mrb[11].mxu0  ;;  %v6748_v22 = vld [vmem:[%s9122_s3 + $0x98] sm:$0xff]  }
 0x1e4   : > { %v1916_v28 = vmax.f32 %v1814_v24, 0.0  ;;  %v1817_v31 = vadd.f32 %v7765_v45, %v1816_v27  ;;  %v6750_v27 = vld [vmem:[%s9122_s3 + $0xa0] sm:$0xff]  }
 0x1e5   : > { %1951 = vst.msk [vmem:[#allocation3 + $0x91] sm:$0xff] %vm377_vm13, %v1918_v26  ;;  %v1919_v29 = vmax.f32 %v1825_v0, 0.0  ;;  %6164 = vmatpush3.bf16.msra.mxu0 %v6748_v22  ;;  %v6749_v0 = vld [vmem:[%s9122_s3 + $0xe0] sm:$0xff]  }
 0x1e6   : > { %1949 = vst.msk [vmem:[#allocation3 + $0x79] sm:$0xff] %vm377_vm13, %v1916_v28  ;;  %v1917_v32 = vmax.f32 %v1817_v31, 0.0  ;;  %6165 = vmatprep.subr.bf16.mxu0 %v6749_v0  ;;  %v6751_v28 = vld [vmem:[%s9122_s3 + $0xe8] sm:$0xff]  }
 0x1e7   : > { %1952 = vst.msk [vmem:[#allocation3 + $0x99] sm:$0xff] %vm377_vm13, %v1919_v29  ;;  %v6752_v31 = vld [vmem:[%s9122_s3 + $0xa8] sm:$0xff]  }
 0x1e8   : > { %1950 = vst.msk [vmem:[#allocation3 + $0x81] sm:$0xff] %vm377_vm13, %v1917_v32 }
 0x1e9   : > { %6166 = vmatpush3.bf16.msra.mxu0 %v6750_v27 }
 0x1ea   : > { %6167 = vmatprep.subr.bf16.mxu0 %v6751_v28 }
 0x1ec   : > { %v2240_v34 = vld [vmem:[#allocation3 + $0x90] sm:$0xff] }
 0x1ed   : > { %v2238_v33 = vld [vmem:[#allocation3 + $0x78] sm:$0xff]  ;;  %v2559_v47 = vld [vmem:[#allocation3 + $0x90] sm:$0xff]  ;;  %6168 = vmatpush3.bf16.msra.mxu0 %v6752_v31 }
 0x1ee   : > { %v2751_v35 = vld [vmem:[#allocation3 + $0x92] sm:$0xff]  ;;  %v2752_v36 = vld [vmem:[#allocation3 + $0x9a] sm:$0xff] }
 0x1ef   : > { %v2047_v37 = vld [vmem:[#allocation3 + $0x79] sm:$0xff]  ;;  %v7871_v41 = vpack.c.bf16 %v2752_v36, %v2751_v35  ;;  %v2750_v43 = vld [vmem:[#allocation3 + $0x82] sm:$0xff]  ;;  %v2368_v51 = vld [vmem:[#allocation3 + $0x91] sm:$0xff] }
 0x1f0   : > { %v2241_v38 = vld [vmem:[#allocation3 + $0x98] sm:$0xff]  ;;  %v2239_v44 = vld [vmem:[#allocation3 + $0x80] sm:$0xff]  ;;  %v2807_v31 = vld [vmem:[#allocation7] sm:$0xff] }
 0x1f1   : > { %v2749_v42 = vld [vmem:[#allocation3 + $0x7a] sm:$0xff]  ;;  %v2267_v46 = vpack.c.bf16 %v2241_v38, %v2240_v34  ;;  %v2266_v49 = vpack.c.bf16 %v2239_v44, %v2238_v33  ;;  %2795 = vst.msk [vmem:[#allocation7 + $0xc0] sm:$0xff] %vm377_vm13, %v7871_v41  ;;  %2220 = vst.msk [vmem:[#allocation7 + $0xf8] sm:$0xff] %vm377_vm13, %v7871_v41  ;;  %v2049_v5 = vld [vmem:[#allocation3 + $0x91] sm:$0xff] }
 0x1f2   : > { %v7873_v48 = vpack.c.bf16 %v2750_v43, %v2749_v42  ;;  %v2048_v40 = vld [vmem:[#allocation3 + $0x81] sm:$0xff]  ;;  %v2557_v2 = vld [vmem:[#allocation3 + $0x78] sm:$0xff] }
 0x1f3   : > { %v2558_v50 = vld [vmem:[#allocation3 + $0x80] sm:$0xff]  ;;  %v7877_v52 = vpack.c.bf16 %v2048_v40, %v2047_v37  ;;  %2027 = vst.msk [vmem:[#allocation7 + $0xf0] sm:$0xff] %vm377_vm13, %v2267_v46  ;;  %v2560_v58 = vld [vmem:[#allocation3 + $0x98] sm:$0xff]  ;;  %2302 = vrot.lane.b32.xlu0 %v2266_v49, %s6942_s24  ;;  %2026 = vst.msk [vmem:[#allocation7 + $0xc8] sm:$0xff] %vm377_vm13, %v2266_v49 }
 0x1f4   : > { %v2586_v54 = vpack.c.bf16 %v2558_v50, %v2557_v2  ;;  %v2366_v55 = vld [vmem:[#allocation3 + $0x79] sm:$0xff]  ;;  %v2367_v57 = vld [vmem:[#allocation3 + $0x81] sm:$0xff]  ;;  %2794 = vst.msk [vmem:[#allocation7 + $0x98] sm:$0xff] %vm377_vm13, %v7873_v48  ;;  %2219 = vst.msk [vmem:[#allocation7 + $0xd0] sm:$0xff] %vm377_vm13, %v7873_v48  ;;  %v2587_v62 = vpack.c.bf16 %v2560_v58, %v2559_v47 }
 0x1f5   : > { %v2050_v53 = vld [vmem:[#allocation3 + $0x99] sm:$0xff]  ;;  %v2394_v59 = vpack.c.bf16 %v2367_v57, %v2366_v55  ;;  %2111 = vrot.lane.b32.xlu1 %v7877_v52, %s6942_s24 }
 0x1f6   : > { %v2369_v63 = vld [vmem:[#allocation3 + $0x99] sm:$0xff]  ;;  %2602 = vst.msk [vmem:[#allocation7 + $0x90] sm:$0xff] %vm377_vm13, %v2586_v54  ;;  %2603 = vst.msk [vmem:[#allocation7 + $0xb8] sm:$0xff] %vm377_vm13, %v2587_v62  ;;  %v7896_v6 = vpack.c.bf16 %v2050_v53, %v2049_v5  ;;  %v6755_v53 = vld [vmem:[%s9122_s3 + $0xf8] sm:$0xff]  }
 0x1f7   : > { %v2395_v3 = vpack.c.bf16 %v2369_v63, %v2368_v51  ;;  %2410 = vst.msk [vmem:[#allocation7 + $0xb0] sm:$0xff] %vm377_vm13, %v2394_v59  ;;  %2304 = vrot.lane.b32.xlu0 %v2267_v46, %s6942_s24  ;;  %v6753_v54 = vld [vmem:[%s9122_s3 + $0xf0] sm:$0xff]   ;;  %v6756_v5 = vld [vmem:[%s9122_s3 + $0xb8] sm:$0xff]  }
 0x1f8   : > { %v6754_v58 = vld [vmem:[%s9122_s3 + $0xb0] sm:$0xff]   ;;  %6169 = vmatprep.subr.bf16.mxu0 %v6753_v54 }
 0x1f9   : > { %2411 = vst.msk [vmem:[#allocation7 + $0xd8] sm:$0xff] %vm377_vm13, %v2395_v3  ;;  %2113 = vrot.lane.b32.xlu1 %v7896_v6, %s6942_s24  ;;  %6170 = vmatpush3.bf16.msra.mxu0 %v6754_v58 }
 0x1fa   : > { %6171 = vmatprep.subr.bf16.mxu0 %v6755_v53 }
 0x1fd   : > { %6172 = vmatpush3.bf16.msra.mxu0 %v6756_v5 }
 0x200   : > { %v6573_v12 = vpop.f32.mrb[12].mxu0 }
 0x201   : > { %v1838_v13 = vadd.f32 %v6573_v12, %v7765_v45  ;;  %v1829_v14 = vpop.f32.mrb[13].mxu0 }
 0x202   : > { %v1830_v15 = vadd.f32 %v7765_v45, %v1829_v14  ;;  %v6574_v16 = vpop.f32.mrb[14].mxu0 }
 0x203   : > { %v1922_v1 = vmax.f32 %v1838_v13, 0.0  ;;  %v1841_v19 = vadd.f32 %v6574_v16, %v7765_v45  ;;  %v1832_v60 = vpop.f32.mrb[15].mxu0 }
 0x204   : > { %v1920_v23 = vmax.f32 %v1830_v15, 0.0  ;;  %v1833_v24 = vadd.f32 %v7765_v45, %v1832_v60  ;;  %v6757_v15 = vld [vmem:[%s9122_s3 + $0x100] sm:$0xff]  }
 0x205   : > { %1955 = vst.msk [vmem:[#allocation3 + $0xc1] sm:$0xff] %vm377_vm13, %v1922_v1  ;;  %v1923_v25 = vmax.f32 %v1841_v19, 0.0  ;;  %6591 = vmatprep.subr.bf16.mxu1 %v6757_v15 }
 0x206   : > { %1953 = vst.msk [vmem:[#allocation3 + $0xa9] sm:$0xff] %vm377_vm13, %v1920_v23  ;;  %v1921_v26 = vmax.f32 %v1833_v24, 0.0 }
 0x207   : > { %1956 = vst.msk [vmem:[#allocation3 + $0xc9] sm:$0xff] %vm377_vm13, %v1923_v25 }
 0x208   : > { %1954 = vst.msk [vmem:[#allocation3 + $0xb1] sm:$0xff] %vm377_vm13, %v1921_v26 }
 0x20c   : > { %v2244_v32 = vld [vmem:[#allocation3 + $0xc0] sm:$0xff] }
 0x20d   : > { %v2242_v29 = vld [vmem:[#allocation3 + $0xa8] sm:$0xff]  ;;  %v2563_v51 = vld [vmem:[#allocation3 + $0xc0] sm:$0xff] }
 0x20e   : > { %v2755_v33 = vld [vmem:[#allocation3 + $0xc2] sm:$0xff]  ;;  %v2756_v34 = vld [vmem:[#allocation3 + $0xca] sm:$0xff] }
 0x20f   : > { %v2051_v35 = vld [vmem:[#allocation3 + $0xa9] sm:$0xff]  ;;  %v7943_v37 = vpack.c.bf16 %v2756_v34, %v2755_v33  ;;  %v2754_v42 = vld [vmem:[#allocation3 + $0xb2] sm:$0xff]  ;;  %v2372_v9 = vld [vmem:[#allocation3 + $0xc1] sm:$0xff] }
 0x210   : > { %v2245_v36 = vld [vmem:[#allocation3 + $0xc8] sm:$0xff]  ;;  %v2243_v43 = vld [vmem:[#allocation3 + $0xb0] sm:$0xff] }
 0x211   : > { %v2753_v38 = vld [vmem:[#allocation3 + $0xaa] sm:$0xff]  ;;  %v2269_v44 = vpack.c.bf16 %v2245_v36, %v2244_v32  ;;  %v2268_v47 = vpack.c.bf16 %v2243_v43, %v2242_v29  ;;  %v2182_v40 = vld [vmem:[#allocation3 + $0xc2] sm:$0xff]  ;;  %2797 = vst.msk [vmem:[#allocation7 + $0x110] sm:$0xff] %vm377_vm13, %v7943_v37 }
 0x212   : > { %v7945_v46 = vpack.c.bf16 %v2754_v42, %v2753_v38  ;;  %v2052_v49 = vld [vmem:[#allocation3 + $0xb1] sm:$0xff]  ;;  %v2561_v2 = vld [vmem:[#allocation3 + $0xa8] sm:$0xff] }
 0x213   : > { %v7949_v50 = vpack.c.bf16 %v2052_v49, %v2051_v35  ;;  %2029 = vst.msk [vmem:[#allocation7 + $0x140] sm:$0xff] %vm377_vm13, %v2269_v44  ;;  %v2183_v55 = vld [vmem:[#allocation3 + $0xca] sm:$0xff]  ;;  %2306 = vrot.lane.b32.xlu0 %v2268_v47, %s6942_s24  ;;  %2028 = vst.msk [vmem:[#allocation7 + $0x118] sm:$0xff] %vm377_vm13, %v2268_v47  ;;  %v2053_v13 = vld [vmem:[#allocation3 + $0xc1] sm:$0xff] }
 0x214   : > { %v2562_v57 = vld [vmem:[#allocation3 + $0xb0] sm:$0xff]  ;;  %2796 = vst.msk [vmem:[#allocation7 + $0xe8] sm:$0xff] %vm377_vm13, %v7945_v46  ;;  %2221 = vst.msk [vmem:[#allocation7 + $0x120] sm:$0xff] %vm377_vm13, %v7945_v46  ;;  %v2206_v59 = vpack.c.bf16 %v2183_v55, %v2182_v40  ;;  %v2564_v3 = vld [vmem:[#allocation3 + $0xc8] sm:$0xff] }
 0x215   : > { %v2588_v62 = vpack.c.bf16 %v2562_v57, %v2561_v2  ;;  %2115 = vrot.lane.b32.xlu1 %v7949_v50, %s6942_s24  ;;  %v2370_v63 = vld [vmem:[#allocation3 + $0xa9] sm:$0xff]  ;;  %v2371_v18 = vld [vmem:[#allocation3 + $0xb1] sm:$0xff]  ;;  %v2589_v7 = vpack.c.bf16 %v2564_v3, %v2563_v51 }
 0x216   : > { %2222 = vst.msk [vmem:[#allocation7 + $0x148] sm:$0xff] %vm377_vm13, %v2206_v59  ;;  %v2396_v56 = vpack.c.bf16 %v2371_v18, %v2370_v63  ;;  %v2373_v10 = vld [vmem:[#allocation3 + $0xc9] sm:$0xff] }
 0x217   : > { %2604 = vst.msk [vmem:[#allocation7 + $0xe0] sm:$0xff] %vm377_vm13, %v2588_v62  ;;  %v2397_v11 = vpack.c.bf16 %v2373_v10, %v2372_v9  ;;  %2308 = vrot.lane.b32.xlu0 %v2269_v44, %s6942_s24  ;;  %v2054_v12 = vld [vmem:[#allocation3 + $0xc9] sm:$0xff]  ;;  %2605 = vst.msk [vmem:[#allocation7 + $0x108] sm:$0xff] %vm377_vm13, %v2589_v7 }
 0x218   : > { %2412 = vst.msk [vmem:[#allocation7 + $0x100] sm:$0xff] %vm377_vm13, %v2396_v56  ;;  %v7980_v14 = vpack.c.bf16 %v2054_v12, %v2053_v13 }
 0x219   : > { %2486 = vrot.lane.b32.xlu1 %v7809_v30, %s6942_s24  ;;  %2413 = vst.msk [vmem:[#allocation7 + $0x128] sm:$0xff] %vm377_vm13, %v2397_v11 }
 0x21b   : > { %2679 = vrot.lane.b32.xlu0 %v7819_v39, %s6942_s24 }
 0x21d   : > { %2117 = vrot.lane.b32.xlu1 %v7980_v14, %s6942_s24 }
 0x220   : > { %v6577_v30 = vpop.f32.mrb[16].mxu0 }
 0x221   : > { %2488 = vrot.lane.b32.xlu1 %v7805_v20, %s6942_s24  ;;  %v1854_v16 = vadd.f32 %v6577_v30, %v7765_v45  ;;  %v1845_v17 = vpop.f32.mrb[17].mxu0 }
 0x222   : > { %v1846_v1 = vadd.f32 %v7765_v45, %v1845_v17  ;;  %v6578_v19 = vpop.f32.mrb[18].mxu0 }
 0x223   : > { %v1926_v60 = vmax.f32 %v1854_v16, 0.0  ;;  %v1857_v39 = vadd.f32 %v6578_v19, %v7765_v45  ;;  %v1848_v22 = vpop.f32.mrb[19].mxu0 }
 0x224   : > { %v1924_v23 = vmax.f32 %v1846_v1, 0.0  ;;  %v1849_v24 = vadd.f32 %v7765_v45, %v1848_v22  ;;  %v2104_v26 = vpop.permute.xlu1 %2103 }
 0x225   : > { %1959 = vst.msk [vmem:[#allocation3 + $0xf1] sm:$0xff] %vm377_vm13, %v1926_v60  ;;  %v1927_v0 = vmax.f32 %v1857_v39, 0.0 }
 0x226   : > { %v2295_v25 = vpop.permute.xlu0 %2294  ;;  %2151 = vst.msk [vmem:[#allocation7 + $0x28] sm:$0xff] %vm2149_vm0, %v2104_v26  ;;  %v1925_v20 = vmax.f32 %v1849_v24, 0.0 }
 0x227   : > { %2342 = vst.msk [vmem:[#allocation7 + $0x8] sm:$0xff] %vm2149_vm0, %v2295_v25 }
 0x228   : > { %1957 = vst.msk [vmem:[#allocation3 + $0xd9] sm:$0xff] %vm377_vm13, %v1924_v23  ;;  %1960 = vst.msk [vmem:[#allocation3 + $0xf9] sm:$0xff] %vm377_vm13, %v1927_v0  ;;  %v2106_v28 = vpop.permute.xlu1 %2105 }
 0x229   : > { %1958 = vst.msk [vmem:[#allocation3 + $0xe1] sm:$0xff] %vm377_vm13, %v1925_v20 }
 0x22a   : > { %v2297_v27 = vpop.permute.xlu0 %2296  ;;  %2152 = vst.msk [vmem:[#allocation7 + $0x50] sm:$0xff] %vm2149_vm0, %v2106_v28 }
 0x22b   : > { %2343 = vst.msk [vmem:[#allocation7 + $0x30] sm:$0xff] %vm2149_vm0, %v2297_v27 }
 0x22c   : > { %v2248_v33 = vld [vmem:[#allocation3 + $0xf0] sm:$0xff] }
 0x22d   : > { %v2376_v5 = vld [vmem:[#allocation3 + $0xf1] sm:$0xff] }
 0x22e   : > { %v2808_v29 = vld [vmem:[#allocation7 + $0x8] sm:$0xff]  ;;  %v2567_v10 = vld [vmem:[#allocation3 + $0xf0] sm:$0xff] }
 0x22f   : > { %3262 = vmatprep.mubr.bf16.mxu1 %v2808_v29  ;;  %v2246_v32 = vld [vmem:[#allocation3 + $0xd8] sm:$0xff] }
 0x230   : > { %v2759_v34 = vld [vmem:[#allocation3 + $0xf2] sm:$0xff]  ;;  %v2760_v35 = vld [vmem:[#allocation3 + $0xfa] sm:$0xff]  ;;  %3263 = vmatmul.mubr.bf16.vlgmr.msra.gmra.mrb[0].mxu1 %v2807_v31  ;;  %v2758_v43 = vld [vmem:[#allocation3 + $0xe2] sm:$0xff] }
 0x231   : > { %v2249_v36 = vld [vmem:[#allocation3 + $0xf8] sm:$0xff]  ;;  %v8003_v38 = vpack.c.bf16 %v2760_v35, %v2759_v34  ;;  %v2247_v44 = vld [vmem:[#allocation3 + $0xe0] sm:$0xff]  ;;  %6592 = vmatpush3.bf16.msra.mxu1 %v6757_v15 }
 0x232   : > { %v2757_v42 = vld [vmem:[#allocation3 + $0xda] sm:$0xff]  ;;  %v2271_v47 = vpack.c.bf16 %v2249_v36, %v2248_v33  ;;  %v2270_v2 = vpack.c.bf16 %v2247_v44, %v2246_v32  ;;  %v2186_v58 = vld [vmem:[#allocation3 + $0xf2] sm:$0xff] }
 0x233   : > { %v8005_v49 = vpack.c.bf16 %v2758_v43, %v2757_v42  ;;  %v2813_v40 = vld [vmem:[#allocation7 + $0x30] sm:$0xff]  ;;  %2799 = vst.msk [vmem:[#allocation7 + $0x160] sm:$0xff] %vm377_vm13, %v8003_v38  ;;  %v2565_v62 = vld [vmem:[#allocation3 + $0xd8] sm:$0xff] }
 0x234   : > { %v2055_v54 = vld [vmem:[#allocation3 + $0xd9] sm:$0xff]  ;;  %v2056_v55 = vld [vmem:[#allocation3 + $0xe1] sm:$0xff]  ;;  %3270 = vmatprep.mubr.bf16.mxu1 %v2813_v40  ;;  %2031 = vst.msk [vmem:[#allocation7 + $0x190] sm:$0xff] %vm377_vm13, %v2271_v47  ;;  %2310 = vrot.lane.b32.xlu0 %v2270_v2, %s6942_s24  ;;  %2030 = vst.msk [vmem:[#allocation7 + $0x168] sm:$0xff] %vm377_vm13, %v2270_v2 }
 0x235   : > { %v8009_v57 = vpack.c.bf16 %v2056_v55, %v2055_v54  ;;  %v2187_v53 = vld [vmem:[#allocation3 + $0xfa] sm:$0xff]  ;;  %2798 = vst.msk [vmem:[#allocation7 + $0x138] sm:$0xff] %vm377_vm13, %v8005_v49  ;;  %2223 = vst.msk [vmem:[#allocation7 + $0x170] sm:$0xff] %vm377_vm13, %v8005_v49  ;;  %v2057_v30 = vld [vmem:[#allocation3 + $0xf1] sm:$0xff] }
 0x236   : > { %v2208_v59 = vpack.c.bf16 %v2187_v53, %v2186_v58  ;;  %v2566_v51 = vld [vmem:[#allocation3 + $0xe0] sm:$0xff]  ;;  %v2568_v11 = vld [vmem:[#allocation3 + $0xf8] sm:$0xff] }
 0x237   : > { %v2374_v63 = vld [vmem:[#allocation3 + $0xd9] sm:$0xff]  ;;  %2119 = vrot.lane.b32.xlu1 %v8009_v57, %s6942_s24  ;;  %v2590_v18 = vpack.c.bf16 %v2566_v51, %v2565_v62  ;;  %v2375_v3 = vld [vmem:[#allocation3 + $0xe1] sm:$0xff]  ;;  %v2591_v13 = vpack.c.bf16 %v2568_v11, %v2567_v10 }
 0x238   : > { %v2377_v56 = vld [vmem:[#allocation3 + $0xf9] sm:$0xff]  ;;  %2224 = vst.msk [vmem:[#allocation7 + $0x198] sm:$0xff] %vm377_vm13, %v2208_v59  ;;  %v2398_v7 = vpack.c.bf16 %v2375_v3, %v2374_v63  ;;  %2681 = vrot.lane.b32.xlu0 %v7841_v8, %s6942_s24 }
 0x239   : > { %v2399_v9 = vpack.c.bf16 %v2377_v56, %v2376_v5  ;;  %v2812_v12 = vld [vmem:[#allocation7 + $0x28] sm:$0xff]  ;;  %2606 = vst.msk [vmem:[#allocation7 + $0x130] sm:$0xff] %vm377_vm13, %v2590_v18  ;;  %2607 = vst.msk [vmem:[#allocation7 + $0x158] sm:$0xff] %vm377_vm13, %v2591_v13  ;;  %v2817_v31 = vld [vmem:[#allocation7 + $0x50] sm:$0xff] }
 0x23a   : > { %3271 = vmatmul.mubr.bf16.gmra.mrb[4].mxu1 %v2812_v12  ;;  %v2058_v15 = vld [vmem:[#allocation3 + $0xf9] sm:$0xff]  ;;  %2414 = vst.msk [vmem:[#allocation7 + $0x150] sm:$0xff] %vm377_vm13, %v2398_v7 }
 0x23b   : > { %2415 = vst.msk [vmem:[#allocation7 + $0x178] sm:$0xff] %vm377_vm13, %v2399_v9  ;;  %2490 = vrot.lane.b32.xlu1 %v7837_v4, %s6942_s24  ;;  %v8029_v16 = vpack.c.bf16 %v2058_v15, %v2057_v30  ;;  %v6758_v8 = vld [vmem:[%s9122_s3 + $0x108] sm:$0xff]  }
 0x23c   : > { %2312 = vrot.lane.b32.xlu0 %v2271_v47, %s6942_s24  ;;  %6593 = vmatprep.subr.bf16.mxu1 %v6758_v8 }
 0x23d   : > { %6594 = vmatpush3.bf16.msra.mxu1 %v6758_v8 }
 0x23f   : > { %2121 = vrot.lane.b32.xlu1 %v8029_v16, %s6942_s24 }
 0x240   : > { %2683 = vrot.lane.b32.xlu0 %v7857_v21, %s6942_s24  ;;  %v6581_v4 = vpop.f32.mrb[20].mxu0 }
 0x241   : > { %v1870_v17 = vadd.f32 %v6581_v4, %v7765_v45  ;;  %v1861_v1 = vpop.f32.mrb[21].mxu0 }
 0x242   : > { %v1862_v19 = vadd.f32 %v7765_v45, %v1861_v1  ;;  %v6582_v60 = vpop.f32.mrb[22].mxu0 }
 0x243   : > { %2492 = vrot.lane.b32.xlu1 %v7835_v61, %s6942_s24  ;;  %v1930_v39 = vmax.f32 %v1870_v17, 0.0  ;;  %v1873_v22 = vadd.f32 %v6582_v60, %v7765_v45  ;;  %v1864_v23 = vpop.f32.mrb[23].mxu0 }
 0x244   : > { %v1928_v24 = vmax.f32 %v1862_v19, 0.0  ;;  %v1865_v25 = vadd.f32 %v7765_v45, %v1864_v23 }
 0x245   : > { %v2299_v26 = vpop.permute.xlu0 %2298  ;;  %1963 = vst.msk [vmem:[#allocation3 + $0x121] sm:$0xff] %vm377_vm13, %v1930_v39  ;;  %v1931_v21 = vmax.f32 %v1873_v22, 0.0 }
 0x246   : > { %2344 = vst.msk [vmem:[#allocation7 + $0x58] sm:$0xff] %vm2149_vm0, %v2299_v26  ;;  %v1929_v0 = vmax.f32 %v1865_v25, 0.0 }
 0x247   : > { %v2108_v61 = vpop.permute.xlu1 %2107  ;;  %1961 = vst.msk [vmem:[#allocation3 + $0x109] sm:$0xff] %vm377_vm13, %v1928_v24  ;;  %1964 = vst.msk [vmem:[#allocation3 + $0x129] sm:$0xff] %vm377_vm13, %v1931_v21 }
 0x248   : > { %2153 = vst.msk [vmem:[#allocation7 + $0x78] sm:$0xff] %vm2149_vm0, %v2108_v61 }
 0x249   : > { %1962 = vst.msk [vmem:[#allocation3 + $0x111] sm:$0xff] %vm377_vm13, %v1929_v0  ;;  %v2301_v20 = vpop.permute.xlu0 %2300 }
 0x24a   : > { %2345 = vst.msk [vmem:[#allocation7 + $0x80] sm:$0xff] %vm2149_vm0, %v2301_v20 }
 0x24b   : > { %v2110_v27 = vpop.permute.xlu1 %2109 }
 0x24c   : > { %2154 = vst.msk [vmem:[#allocation7 + $0xa0] sm:$0xff] %vm2149_vm0, %v2110_v27  ;;  %v2252_v32 = vld [vmem:[#allocation3 + $0x120] sm:$0xff] }
 0x24d   : > { %v2818_v28 = vld [vmem:[#allocation7 + $0x58] sm:$0xff]  ;;  %v2571_v12 = vld [vmem:[#allocation3 + $0x120] sm:$0xff] }
 0x24e   : > { %3278 = vmatprep.mubr.bf16.mxu1 %v2818_v28  ;;  %v2250_v29 = vld [vmem:[#allocation3 + $0x108] sm:$0xff] }
 0x24f   : > { %v2763_v33 = vld [vmem:[#allocation3 + $0x122] sm:$0xff]  ;;  %v2764_v34 = vld [vmem:[#allocation3 + $0x12a] sm:$0xff]  ;;  %3279 = vmatmul.mubr.bf16.gmra.mrb[8].mxu1 %v2817_v31 }
 0x250   : > { %v2253_v35 = vld [vmem:[#allocation3 + $0x128] sm:$0xff]  ;;  %v8053_v36 = vpack.c.bf16 %v2764_v34, %v2763_v33  ;;  %v2762_v43 = vld [vmem:[#allocation3 + $0x112] sm:$0xff] }
 0x251   : > { %v2761_v42 = vld [vmem:[#allocation3 + $0x10a] sm:$0xff]  ;;  %v2273_v47 = vpack.c.bf16 %v2253_v35, %v2252_v32  ;;  %v2190_v59 = vld [vmem:[#allocation3 + $0x122] sm:$0xff] }
 0x252   : > { %v2251_v44 = vld [vmem:[#allocation3 + $0x110] sm:$0xff]  ;;  %v8055_v40 = vpack.c.bf16 %v2762_v43, %v2761_v42  ;;  %2801 = vst.msk [vmem:[#allocation7 + $0x1b0] sm:$0xff] %vm377_vm13, %v8053_v36  ;;  %v2569_v3 = vld [vmem:[#allocation3 + $0x108] sm:$0xff] }
 0x253   : > { %v2823_v2 = vld [vmem:[#allocation7 + $0x80] sm:$0xff]  ;;  %v2272_v54 = vpack.c.bf16 %v2251_v44, %v2250_v29  ;;  %2033 = vst.msk [vmem:[#allocation7 + $0x1e0] sm:$0xff] %vm377_vm13, %v2273_v47  ;;  %v2380_v7 = vld [vmem:[#allocation3 + $0x121] sm:$0xff] }
 0x254   : > { %v2059_v55 = vld [vmem:[#allocation3 + $0x109] sm:$0xff]  ;;  %v2060_v58 = vld [vmem:[#allocation3 + $0x111] sm:$0xff]  ;;  %3286 = vmatprep.mubr.bf16.mxu1 %v2823_v2  ;;  %2800 = vst.msk [vmem:[#allocation7 + $0x188] sm:$0xff] %vm377_vm13, %v8055_v40  ;;  %2225 = vst.msk [vmem:[#allocation7 + $0x1c0] sm:$0xff] %vm377_vm13, %v8055_v40 }
 0x255   : > { %v8059_v53 = vpack.c.bf16 %v2060_v58, %v2059_v55  ;;  %v2191_v62 = vld [vmem:[#allocation3 + $0x12a] sm:$0xff]  ;;  %2314 = vrot.lane.b32.xlu0 %v2272_v54, %s6942_s24  ;;  %2032 = vst.msk [vmem:[#allocation7 + $0x1b8] sm:$0xff] %vm377_vm13, %v2272_v54  ;;  %v2061_v4 = vld [vmem:[#allocation3 + $0x121] sm:$0xff] }
 0x256   : > { %v2210_v51 = vpack.c.bf16 %v2191_v62, %v2190_v59  ;;  %v2378_v63 = vld [vmem:[#allocation3 + $0x109] sm:$0xff]  ;;  %v2379_v18 = vld [vmem:[#allocation3 + $0x111] sm:$0xff] }
 0x257   : > { %2123 = vrot.lane.b32.xlu1 %v8059_v53, %s6942_s24  ;;  %v2400_v5 = vpack.c.bf16 %v2379_v18, %v2378_v63  ;;  %v2570_v56 = vld [vmem:[#allocation3 + $0x110] sm:$0xff]  ;;  %v2572_v13 = vld [vmem:[#allocation3 + $0x128] sm:$0xff] }
 0x258   : > { %v2381_v9 = vld [vmem:[#allocation3 + $0x129] sm:$0xff]  ;;  %2226 = vst.msk [vmem:[#allocation7 + $0x1e8] sm:$0xff] %vm377_vm13, %v2210_v51  ;;  %v2592_v10 = vpack.c.bf16 %v2570_v56, %v2569_v3  ;;  %v2593_v30 = vpack.c.bf16 %v2572_v13, %v2571_v12 }
 0x259   : > { %v2401_v11 = vpack.c.bf16 %v2381_v9, %v2380_v7  ;;  %v2822_v15 = vld [vmem:[#allocation7 + $0x78] sm:$0xff]  ;;  %2416 = vst.msk [vmem:[#allocation7 + $0x1a0] sm:$0xff] %vm377_vm13, %v2400_v5  ;;  %2685 = vrot.lane.b32.xlu0 %v7877_v52, %s6942_s24  ;;  %v6759_v52 = vld [vmem:[%s9122_s3 + $0x110] sm:$0xff]   ;;  %v2827_v27 = vld [vmem:[#allocation7 + $0xa0] sm:$0xff] }
 0x25a   : > { %3287 = vmatmul.mubr.bf16.gmra.mrb[12].mxu1 %v2822_v15  ;;  %v2062_v8 = vld [vmem:[#allocation3 + $0x129] sm:$0xff]  ;;  %2608 = vst.msk [vmem:[#allocation7 + $0x180] sm:$0xff] %vm377_vm13, %v2592_v10  ;;  %2609 = vst.msk [vmem:[#allocation7 + $0x1a8] sm:$0xff] %vm377_vm13, %v2593_v30  ;;  %6595 = vmatprep.subr.bf16.mxu1 %v6759_v52 }
 0x25b   : > { %2417 = vst.msk [vmem:[#allocation7 + $0x1c8] sm:$0xff] %vm377_vm13, %v2401_v11  ;;  %2494 = vrot.lane.b32.xlu1 %v7873_v48, %s6942_s24  ;;  %v8079_v17 = vpack.c.bf16 %v2062_v8, %v2061_v4  ;;  %6596 = vmatpush3.bf16.msra.mxu1 %v6759_v52  ;;  %v6760_v4 = vld [vmem:[%s9122_s3 + $0x118] sm:$0xff]  }
 0x25c   : > { %6597 = vmatprep.subr.bf16.mxu1 %v6760_v4 }
 0x25d   : > { %2316 = vrot.lane.b32.xlu0 %v2273_v47, %s6942_s24 }
 0x25f   : > { %2125 = vrot.lane.b32.xlu1 %v8079_v17, %s6942_s24  ;;  %6598 = vmatpush3.bf16.msra.mxu1 %v6760_v4 }
 0x260   : > { %v6585_v48 = vpop.f32.mrb[24].mxu0 }
 0x261   : > { %2687 = vrot.lane.b32.xlu0 %v7896_v6, %s6942_s24  ;;  %v1886_v1 = vadd.f32 %v6585_v48, %v7765_v45  ;;  %v1877_v19 = vpop.f32.mrb[25].mxu0 }
 0x262   : > { %v1878_v60 = vadd.f32 %v7765_v45, %v1877_v19  ;;  %v6586_v39 = vpop.f32.mrb[26].mxu0 }
 0x263   : > { %2496 = vrot.lane.b32.xlu1 %v7871_v41, %s6942_s24  ;;  %v1934_v22 = vmax.f32 %v1886_v1, 0.0  ;;  %v1889_v23 = vadd.f32 %v6586_v39, %v7765_v45  ;;  %v1880_v24 = vpop.f32.mrb[27].mxu0 }
 0x264   : > { %v1932_v25 = vmax.f32 %v1878_v60, 0.0  ;;  %v1881_v26 = vadd.f32 %v7765_v45, %v1880_v24 }
 0x265   : > { %v2303_v21 = vpop.permute.xlu0 %2302  ;;  %1967 = vst.msk [vmem:[#allocation3 + $0x151] sm:$0xff] %vm377_vm13, %v1934_v22  ;;  %v1935_v6 = vmax.f32 %v1889_v23, 0.0 }
 0x266   : > { %2346 = vst.msk [vmem:[#allocation7 + $0xa8] sm:$0xff] %vm2149_vm0, %v2303_v21  ;;  %v1933_v61 = vmax.f32 %v1881_v26, 0.0 }
 0x267   : > { %v2112_v41 = vpop.permute.xlu1 %2111  ;;  %1965 = vst.msk [vmem:[#allocation3 + $0x139] sm:$0xff] %vm377_vm13, %v1932_v25  ;;  %1968 = vst.msk [vmem:[#allocation3 + $0x159] sm:$0xff] %vm377_vm13, %v1935_v6 }
 0x268   : > { %2155 = vst.msk [vmem:[#allocation7 + $0xc8] sm:$0xff] %vm2149_vm0, %v2112_v41 }
 0x269   : > { %1966 = vst.msk [vmem:[#allocation3 + $0x141] sm:$0xff] %vm377_vm13, %v1933_v61  ;;  %v2305_v0 = vpop.permute.xlu0 %2304 }
 0x26a   : > { %2347 = vst.msk [vmem:[#allocation7 + $0xd0] sm:$0xff] %vm2149_vm0, %v2305_v0 }
 0x26b   : > { %v2114_v45 = vpop.permute.xlu1 %2113 }
 0x26c   : > { %2156 = vst.msk [vmem:[#allocation7 + $0xf0] sm:$0xff] %vm2149_vm0, %v2114_v45  ;;  %v2256_v31 = vld [vmem:[#allocation3 + $0x150] sm:$0xff] }
 0x26d   : > { %v2828_v20 = vld [vmem:[#allocation7 + $0xa8] sm:$0xff]  ;;  %v2575_v9 = vld [vmem:[#allocation3 + $0x150] sm:$0xff] }
 0x26e   : > { %3294 = vmatprep.mubr.bf16.mxu1 %v2828_v20  ;;  %v2254_v28 = vld [vmem:[#allocation3 + $0x138] sm:$0xff] }
 0x26f   : > { %v2767_v29 = vld [vmem:[#allocation3 + $0x152] sm:$0xff]  ;;  %v2768_v32 = vld [vmem:[#allocation3 + $0x15a] sm:$0xff]  ;;  %3295 = vmatmul.mubr.bf16.gmra.mrb[16].mxu1 %v2827_v27 }
 0x270   : > { %v2257_v33 = vld [vmem:[#allocation3 + $0x158] sm:$0xff]  ;;  %v8103_v34 = vpack.c.bf16 %v2768_v32, %v2767_v29  ;;  %v2766_v42 = vld [vmem:[#allocation3 + $0x142] sm:$0xff] }
 0x271   : > { %v2765_v35 = vld [vmem:[#allocation3 + $0x13a] sm:$0xff]  ;;  %v2275_v44 = vpack.c.bf16 %v2257_v33, %v2256_v31  ;;  %v2384_v5 = vld [vmem:[#allocation3 + $0x151] sm:$0xff] }
 0x272   : > { %v2255_v43 = vld [vmem:[#allocation3 + $0x140] sm:$0xff]  ;;  %v8105_v47 = vpack.c.bf16 %v2766_v42, %v2765_v35  ;;  %2803 = vst.msk [vmem:[#allocation7 + $0x200] sm:$0xff] %vm377_vm13, %v8103_v34  ;;  %2228 = vst.msk [vmem:[#allocation7 + $0x238] sm:$0xff] %vm377_vm13, %v8103_v34  ;;  %v2573_v18 = vld [vmem:[#allocation3 + $0x138] sm:$0xff] }
 0x273   : > { %v2833_v2 = vld [vmem:[#allocation7 + $0xd0] sm:$0xff]  ;;  %v2274_v54 = vpack.c.bf16 %v2255_v43, %v2254_v28  ;;  %2035 = vst.msk [vmem:[#allocation7 + $0x230] sm:$0xff] %vm377_vm13, %v2275_v44  ;;  %v2576_v10 = vld [vmem:[#allocation3 + $0x158] sm:$0xff] }
 0x274   : > { %v2063_v55 = vld [vmem:[#allocation3 + $0x139] sm:$0xff]  ;;  %v2064_v58 = vld [vmem:[#allocation3 + $0x141] sm:$0xff]  ;;  %3302 = vmatprep.mubr.bf16.mxu1 %v2833_v2  ;;  %2802 = vst.msk [vmem:[#allocation7 + $0x1d8] sm:$0xff] %vm377_vm13, %v8105_v47  ;;  %2227 = vst.msk [vmem:[#allocation7 + $0x210] sm:$0xff] %vm377_vm13, %v8105_v47  ;;  %v2595_v12 = vpack.c.bf16 %v2576_v10, %v2575_v9 }
 0x275   : > { %v8109_v59 = vpack.c.bf16 %v2064_v58, %v2063_v55  ;;  %v2382_v62 = vld [vmem:[#allocation3 + $0x139] sm:$0xff]  ;;  %v2383_v51 = vld [vmem:[#allocation3 + $0x141] sm:$0xff]  ;;  %2318 = vrot.lane.b32.xlu0 %v2274_v54, %s6942_s24  ;;  %2034 = vst.msk [vmem:[#allocation7 + $0x208] sm:$0xff] %vm377_vm13, %v2274_v54  ;;  %v2065_v30 = vld [vmem:[#allocation3 + $0x151] sm:$0xff] }
 0x276   : > { %v2402_v63 = vpack.c.bf16 %v2383_v51, %v2382_v62  ;;  %v2574_v3 = vld [vmem:[#allocation3 + $0x140] sm:$0xff]  ;;  %v2832_v13 = vld [vmem:[#allocation7 + $0xc8] sm:$0xff]  ;;  %2611 = vst.msk [vmem:[#allocation7 + $0x1f8] sm:$0xff] %vm377_vm13, %v2595_v12 }
 0x277   : > { %2127 = vrot.lane.b32.xlu1 %v8109_v59, %s6942_s24  ;;  %v2594_v56 = vpack.c.bf16 %v2574_v3, %v2573_v18  ;;  %v2385_v7 = vld [vmem:[#allocation3 + $0x159] sm:$0xff]  ;;  %3303 = vmatmul.mubr.bf16.gmra.mrb[20].mxu1 %v2832_v13 }
 0x278   : > { %2418 = vst.msk [vmem:[#allocation7 + $0x1f0] sm:$0xff] %vm377_vm13, %v2402_v63  ;;  %v2403_v11 = vpack.c.bf16 %v2385_v7, %v2384_v5  ;;  %v2066_v15 = vld [vmem:[#allocation3 + $0x159] sm:$0xff] }
 0x279   : > { %2610 = vst.msk [vmem:[#allocation7 + $0x1d0] sm:$0xff] %vm377_vm13, %v2594_v56  ;;  %2689 = vrot.lane.b32.xlu0 %v7949_v50, %s6942_s24  ;;  %v8130_v8 = vpack.c.bf16 %v2066_v15, %v2065_v30  ;;  %v6869_v50 = vld [vmem:[%s9121_s2] ss:$0 sm:$0xff]  ;;  %v2837_v45 = vld [vmem:[#allocation7 + $0xf0] sm:$0xff] }
 0x27a   : > { %2419 = vst.msk [vmem:[#allocation7 + $0x218] sm:$0xff] %vm377_vm13, %v2403_v11  ;;  %v2645_v10 = vld [vmem:[#allocation3 + $0x199] sm:$0xff]  ;;  %v2646_v11 = vld [vmem:[#allocation3 + $0x1a1] sm:$0xff] }
 0x27b   : > { %2498 = vrot.lane.b32.xlu1 %v7945_v46, %s6942_s24  ;;  %v2662_v15 = vpack.c.bf16 %v2646_v11, %v2645_v10 }
 0x27d   : > { %2320 = vrot.lane.b32.xlu0 %v2275_v44, %s6942_s24 }
 0x27f   : > { %2129 = vrot.lane.b32.xlu1 %v8130_v8, %s6942_s24 }
 0x281   : > { %2691 = vrot.lane.b32.xlu0 %v7980_v14, %s6942_s24  ;;  %v6589_v46 = vpop.f32.mrb[28].mxu0 }
 0x282   : > { %v1902_v52 = vadd.f32 %v6869_v50, %v6589_v46  ;;  %v1893_v48 = vpop.f32.mrb[29].mxu0 }
 0x283   : > { %2500 = vrot.lane.b32.xlu1 %v7943_v37, %s6942_s24  ;;  %v1894_v1 = vadd.f32 %v6869_v50, %v1893_v48  ;;  %v6590_v19 = vpop.f32.mrb[30].mxu0 }
 0x284   : > { %v1938_v60 = vmax.f32 %v1902_v52, 0.0  ;;  %v1905_v39 = vadd.f32 %v6869_v50, %v6590_v19  ;;  %v1896_v22 = vpop.f32.mrb[31].mxu0  ;;  %v2582_v52 = vld [vmem:[#allocation3 + $0x1a0] sm:$0xff] }
 0x285   : > { %v1936_v23 = vmax.f32 %v1894_v1, 0.0  ;;  %v1897_v24 = vadd.f32 %v6869_v50, %v1896_v22  ;;  %v2307_v25 = vpop.permute.xlu0 %2306  ;;  %v2581_v50 = vld [vmem:[#allocation3 + $0x198] sm:$0xff] }
 0x286   : > { %1971 = vst.msk [vmem:[#allocation3 + $0x181] sm:$0xff] %vm377_vm13, %v1938_v60  ;;  %v1939_v14 = vmax.f32 %v1905_v39, 0.0  ;;  %v2598_v1 = vpack.c.bf16 %v2582_v52, %v2581_v50  ;;  %v2811_v50 = vld [vmem:[#allocation7 + $0x20] sm:$0xff] }
 0x287   : > { %2348 = vst.msk [vmem:[#allocation7 + $0xf8] sm:$0xff] %vm2149_vm0, %v2307_v25  ;;  %v2116_v37 = vpop.permute.xlu1 %2115  ;;  %v1937_v26 = vmax.f32 %v1897_v24, 0.0 }
 0x288   : > { %1969 = vst.msk [vmem:[#allocation3 + $0x169] sm:$0xff] %vm377_vm13, %v1936_v23  ;;  %1972 = vst.msk [vmem:[#allocation3 + $0x189] sm:$0xff] %vm377_vm13, %v1939_v14 }
 0x289   : > { %2157 = vst.msk [vmem:[#allocation7 + $0x118] sm:$0xff] %vm2149_vm0, %v2116_v37  ;;  %v2309_v21 = vpop.permute.xlu0 %2308 }
 0x28a   : > { %1970 = vst.msk [vmem:[#allocation3 + $0x171] sm:$0xff] %vm377_vm13, %v1937_v26  ;;  %2614 = vst.msk [vmem:[#allocation7 + $0x270] sm:$0xff] %vm377_vm13, %v2598_v1  ;;  %v2773_v26 = vld [vmem:[#allocation3 + $0x19a] sm:$0xff] }
 0x28b   : > { %2349 = vst.msk [vmem:[#allocation7 + $0x120] sm:$0xff] %vm2149_vm0, %v2309_v21  ;;  %v2487_v6 = vpop.permute.xlu1 %2486  ;;  %v2774_v21 = vld [vmem:[#allocation3 + $0x1a2] sm:$0xff] }
 0x28c   : > { %2534 = vst.msk [vmem:[#allocation7 + $0x10] sm:$0xff] %vm2149_vm0, %v2487_v6  ;;  %v2790_v6 = vpack.c.bf16 %v2774_v21, %v2773_v26 }
 0x28d   : > { %v2680_v41 = vpop.permute.xlu0 %2679  ;;  %v2260_v27 = vld [vmem:[#allocation3 + $0x180] sm:$0xff] }
 0x28e   : > { %v2838_v61 = vld [vmem:[#allocation7 + $0xf8] sm:$0xff]  ;;  %2727 = vst.msk [vmem:[#allocation7 + $0x18] sm:$0xff] %vm2149_vm0, %v2680_v41 }
 0x28f   : > { %v2118_v0 = vpop.permute.xlu1 %2117  ;;  %3310 = vmatprep.mubr.bf16.mxu1 %v2838_v61  ;;  %v2258_v20 = vld [vmem:[#allocation3 + $0x168] sm:$0xff]  ;;  %2806 = vst.msk [vmem:[#allocation7 + $0x278] sm:$0xff] %vm377_vm13, %v2790_v6 }
 0x290   : > { %v2771_v28 = vld [vmem:[#allocation3 + $0x182] sm:$0xff]  ;;  %v2772_v31 = vld [vmem:[#allocation3 + $0x18a] sm:$0xff]  ;;  %2158 = vst.msk [vmem:[#allocation7 + $0x140] sm:$0xff] %vm2149_vm0, %v2118_v0  ;;  %3311 = vmatmul.mubr.bf16.gmra.mrb[24].mxu1 %v2837_v45 }
 0x291   : > { %v2067_v29 = vld [vmem:[#allocation3 + $0x169] sm:$0xff]  ;;  %v2643_v33 = vld [vmem:[#allocation3 + $0x181] sm:$0xff]  ;;  %v8155_v35 = vpack.c.bf16 %v2772_v31, %v2771_v28  ;;  %v2770_v43 = vld [vmem:[#allocation3 + $0x172] sm:$0xff] }
 0x292   : > { %v2261_v32 = vld [vmem:[#allocation3 + $0x188] sm:$0xff]  ;;  %v2259_v44 = vld [vmem:[#allocation3 + $0x170] sm:$0xff] }
 0x293   : > { %v2769_v42 = vld [vmem:[#allocation3 + $0x16a] sm:$0xff]  ;;  %v2277_v2 = vpack.c.bf16 %v2261_v32, %v2260_v27  ;;  %v2276_v58 = vpack.c.bf16 %v2259_v44, %v2258_v20  ;;  %2805 = vst.msk [vmem:[#allocation7 + $0x250] sm:$0xff] %vm377_vm13, %v8155_v35  ;;  %v2489_v63 = vpop.permute.xlu1 %2488  ;;  %v2809_v7 = vld [vmem:[#allocation7 + $0x10] sm:$0xff] }
 0x294   : > { %v2788_v54 = vpack.c.bf16 %v2770_v43, %v2769_v42  ;;  %v2843_v55 = vld [vmem:[#allocation7 + $0x120] sm:$0xff]  ;;  %2535 = vst.msk [vmem:[#allocation7 + $0x38] sm:$0xff] %vm2149_vm0, %v2489_v63  ;;  %v2842_v56 = vld [vmem:[#allocation7 + $0x118] sm:$0xff] }
 0x295   : > { %v2068_v62 = vld [vmem:[#allocation3 + $0x171] sm:$0xff]  ;;  %v2644_v51 = vld [vmem:[#allocation3 + $0x189] sm:$0xff]  ;;  %3318 = vmatprep.mubr.bf16.mxu1 %v2843_v55  ;;  %2613 = vst.msk [vmem:[#allocation7 + $0x248] sm:$0xff] %vm377_vm13, %v2277_v2  ;;  %2322 = vrot.lane.b32.xlu0 %v2276_v58, %s6942_s24  ;;  %2036 = vst.msk [vmem:[#allocation7 + $0x258] sm:$0xff] %vm377_vm13, %v2276_v58 }
 0x296   : > { %v2084_v18 = vpack.c.bf16 %v2068_v62, %v2067_v29  ;;  %v2661_v3 = vpack.c.bf16 %v2644_v51, %v2643_v33  ;;  %2804 = vst.msk [vmem:[#allocation7 + $0x228] sm:$0xff] %vm377_vm13, %v2788_v54  ;;  %2229 = vst.msk [vmem:[#allocation7 + $0x260] sm:$0xff] %vm377_vm13, %v2788_v54  ;;  %v2810_v5 = vld [vmem:[#allocation7 + $0x18] sm:$0xff] }
 0x297   : > { %2612 = vst.msk [vmem:[#allocation7 + $0x220] sm:$0xff] %vm377_vm13, %v2276_v58  ;;  %3423 = vmatprep.mubr.bf16.mxu0 %v2810_v5 }
 0x298   : > { %2131 = vrot.lane.b32.xlu1 %v2084_v18, %s6942_s24  ;;  %2420 = vst.msk [vmem:[#allocation7 + $0x240] sm:$0xff] %vm377_vm13, %v2084_v18  ;;  %2421 = vst.msk [vmem:[#allocation7 + $0x268] sm:$0xff] %vm377_vm13, %v2661_v3  ;;  %3319 = vmatmul.mubr.bf16.gmra.mrb[28].mxu1 %v2842_v56 }
 0x299   : > { %2693 = vrot.lane.b32.xlu0 %v8009_v57, %s6942_s24  ;;  %3424 = vmatmul.mubr.bf16.vlgmr.msra.gmra.mrb[32].mxu0 %v2809_v7 }
 0x29b   : > { %v2814_v9 = vld [vmem:[#allocation7 + $0x38] sm:$0xff] }
 0x29c   : > { %2502 = vrot.lane.b32.xlu1 %v8005_v49, %s6942_s24 }
 0x29d   : > { %2324 = vrot.lane.b32.xlu0 %v2277_v2, %s6942_s24 }
 0x2a0   : > { %2504 = vrot.lane.b32.xlu1 %v8003_v38, %s6942_s24 }
 0x2a1   : > { %2695 = vrot.lane.b32.xlu0 %v8029_v16, %s6942_s24 }
 0x2a4   : > { %2506 = vrot.lane.b32.xlu1 %v8055_v40, %s6942_s24 }
 0x2a5   : > { %2697 = vrot.lane.b32.xlu0 %v8059_v53, %s6942_s24 }
 0x2a6   : > { %v2311_v57 = vpop.permute.xlu0 %2310 }
 0x2a7   : > { %2350 = vst.msk [vmem:[#allocation7 + $0x148] sm:$0xff] %vm2149_vm0, %v2311_v57 }
 0x2a8   : > { %2508 = vrot.lane.b32.xlu1 %v8053_v36, %s6942_s24 }
 0x2a9   : > { %v2120_v49 = vpop.permute.xlu1 %2119  ;;  %2699 = vrot.lane.b32.xlu0 %v8079_v17, %s6942_s24  ;;  %v2847_v17 = vld [vmem:[#allocation7 + $0x140] sm:$0xff] }
 0x2aa   : > { %2159 = vst.msk [vmem:[#allocation7 + $0x168] sm:$0xff] %vm2149_vm0, %v2120_v49  ;;  %v2682_v38 = vpop.permute.xlu0 %2681 }
 0x2ab   : > { %2728 = vst.msk [vmem:[#allocation7 + $0x40] sm:$0xff] %vm2149_vm0, %v2682_v38 }
 0x2ac   : > { %2510 = vrot.lane.b32.xlu1 %v8105_v47, %s6942_s24 }
 0x2ad   : > { %v2491_v16 = vpop.permute.xlu1 %2490  ;;  %2701 = vrot.lane.b32.xlu0 %v8109_v59, %s6942_s24 }
 0x2ae   : > { %2536 = vst.msk [vmem:[#allocation7 + $0x60] sm:$0xff] %vm2149_vm0, %v2491_v16  ;;  %v2313_v36 = vpop.permute.xlu0 %2312  ;;  %v2848_v40 = vld [vmem:[#allocation7 + $0x148] sm:$0xff] }
 0x2af   : > { %2351 = vst.msk [vmem:[#allocation7 + $0x170] sm:$0xff] %vm2149_vm0, %v2313_v36  ;;  %3326 = vmatprep.mubr.bf16.mxu1 %v2848_v40 }
 0x2b0   : > { %2512 = vrot.lane.b32.xlu1 %v8103_v34, %s6942_s24  ;;  %3327 = vmatmul.mubr.bf16.gmra.mrb[32].mxu1 %v2847_v17 }
 0x2b1   : > { %v2122_v53 = vpop.permute.xlu1 %2121  ;;  %2703 = vrot.lane.b32.xlu0 %v8130_v8, %s6942_s24  ;;  %v2852_v13 = vld [vmem:[#allocation7 + $0x168] sm:$0xff] }
 0x2b2   : > { %2160 = vst.msk [vmem:[#allocation7 + $0x190] sm:$0xff] %vm2149_vm0, %v2122_v53  ;;  %v2684_v47 = vpop.permute.xlu0 %2683  ;;  %v2815_v59 = vld [vmem:[#allocation7 + $0x40] sm:$0xff] }
 0x2b3   : > { %2729 = vst.msk [vmem:[#allocation7 + $0x68] sm:$0xff] %vm2149_vm0, %v2684_v47  ;;  %3431 = vmatprep.mubr.bf16.mxu0 %v2815_v59 }
 0x2b4   : > { %2514 = vrot.lane.b32.xlu1 %v2788_v54, %s6942_s24  ;;  %3432 = vmatmul.mubr.bf16.gmra.mrb[36].mxu0 %v2814_v9 }
 0x2b5   : > { %v2493_v34 = vpop.permute.xlu1 %2492  ;;  %2705 = vrot.lane.b32.xlu0 %v2084_v18, %s6942_s24  ;;  %v2819_v8 = vld [vmem:[#allocation7 + $0x60] sm:$0xff] }
 0x2b6   : > { %2537 = vst.msk [vmem:[#allocation7 + $0x88] sm:$0xff] %vm2149_vm0, %v2493_v34  ;;  %v2853_v12 = vld [vmem:[#allocation7 + $0x170] sm:$0xff] }
 0x2b7   : > { %3334 = vmatprep.mubr.bf16.mxu1 %v2853_v12 }
 0x2b8   : > { %2516 = vrot.lane.b32.xlu1 %v8155_v35, %s6942_s24  ;;  %3335 = vmatmul.mubr.bf16.gmra.mrb[36].mxu1 %v2852_v13 }
 0x2b9   : > { %2707 = vrot.lane.b32.xlu0 %v2661_v3, %s6942_s24  ;;  %v2857_v23 = vld [vmem:[#allocation7 + $0x190] sm:$0xff] }
 0x2ba   : > { %v2820_v30 = vld [vmem:[#allocation7 + $0x68] sm:$0xff] }
 0x2bb   : > { %3439 = vmatprep.mubr.bf16.mxu0 %v2820_v30 }
 0x2bc   : > { %3440 = vmatmul.mubr.bf16.gmra.mrb[40].mxu0 %v2819_v8 }
 0x2bd   : > { %2709 = vrot.lane.b32.xlu0 %v2662_v15, %s6942_s24  ;;  %v2824_v37 = vld [vmem:[#allocation7 + $0x88] sm:$0xff] }
 0x2c7   : > { %v2315_v4 = vpop.permute.xlu0 %2314 }
 0x2c8   : > { %2352 = vst.msk [vmem:[#allocation7 + $0x198] sm:$0xff] %vm2149_vm0, %v2315_v4 }
 0x2c9   : > { %v2124_v46 = vpop.permute.xlu1 %2123 }
 0x2ca   : > { %2161 = vst.msk [vmem:[#allocation7 + $0x1b8] sm:$0xff] %vm2149_vm0, %v2124_v46 }
 0x2cb   : > { %v2686_v48 = vpop.permute.xlu0 %2685 }
 0x2cc   : > { %2730 = vst.msk [vmem:[#allocation7 + $0x90] sm:$0xff] %vm2149_vm0, %v2686_v48 }
 0x2cd   : > { %v2495_v19 = vpop.permute.xlu1 %2494 }
 0x2ce   : > { %2538 = vst.msk [vmem:[#allocation7 + $0xb0] sm:$0xff] %vm2149_vm0, %v2495_v19 }
 0x2cf   : > { %v2317_v60 = vpop.permute.xlu0 %2316  ;;  %v2858_v39 = vld [vmem:[#allocation7 + $0x198] sm:$0xff] }
 0x2d0   : > { %2353 = vst.msk [vmem:[#allocation7 + $0x1c0] sm:$0xff] %vm2149_vm0, %v2317_v60  ;;  %3342 = vmatprep.mubr.bf16.mxu1 %v2858_v39 }
 0x2d1   : > { %v2126_v22 = vpop.permute.xlu1 %2125  ;;  %3343 = vmatmul.mubr.bf16.gmra.mrb[40].mxu1 %v2857_v23  ;;  %v2862_v61 = vld [vmem:[#allocation7 + $0x1b8] sm:$0xff]  ;;  %v2816_v23 = vld [vmem:[#allocation7 + $0x48] sm:$0xff] }
 0x2d2   : > { %2162 = vst.msk [vmem:[#allocation7 + $0x1e0] sm:$0xff] %vm2149_vm0, %v2126_v22 }
 0x2d3   : > { %v2688_v24 = vpop.permute.xlu0 %2687  ;;  %v2825_v25 = vld [vmem:[#allocation7 + $0x90] sm:$0xff] }
 0x2d4   : > { %2731 = vst.msk [vmem:[#allocation7 + $0xb8] sm:$0xff] %vm2149_vm0, %v2688_v24  ;;  %3447 = vmatprep.mubr.bf16.mxu0 %v2825_v25  ;;  %v2821_v24 = vld [vmem:[#allocation7 + $0x70] sm:$0xff] }
 0x2d5   : > { %v2497_v14 = vpop.permute.xlu1 %2496  ;;  %3448 = vmatmul.mubr.bf16.gmra.mrb[44].mxu0 %v2824_v37  ;;  %v2829_v45 = vld [vmem:[#allocation7 + $0xb0] sm:$0xff] }
 0x2d6   : > { %2539 = vst.msk [vmem:[#allocation7 + $0xd8] sm:$0xff] %vm2149_vm0, %v2497_v14 }
 0x2d7   : > { %v2863_v41 = vld [vmem:[#allocation7 + $0x1c0] sm:$0xff] }
 0x2d8   : > { %3350 = vmatprep.mubr.bf16.mxu1 %v2863_v41 }
 0x2d9   : > { %3351 = vmatmul.mubr.bf16.gmra.mrb[44].mxu1 %v2862_v61  ;;  %v2867_v35 = vld [vmem:[#allocation7 + $0x1e0] sm:$0xff] }
 0x2db   : > { %v2830_v0 = vld [vmem:[#allocation7 + $0xb8] sm:$0xff] }
 0x2dc   : > { %3455 = vmatprep.mubr.bf16.mxu0 %v2830_v0 }
 0x2dd   : > { %3456 = vmatmul.mubr.bf16.gmra.mrb[48].mxu0 %v2829_v45  ;;  %v2834_v2 = vld [vmem:[#allocation7 + $0xd8] sm:$0xff] }
 0x2e7   : > { %v2319_v20 = vpop.permute.xlu0 %2318 }
 0x2e8   : > { %2354 = vst.msk [vmem:[#allocation7 + $0x1e8] sm:$0xff] %vm2149_vm0, %v2319_v20 }
 0x2e9   : > { %v2128_v27 = vpop.permute.xlu1 %2127 }
 0x2ea   : > { %2163 = vst.msk [vmem:[#allocation7 + $0x208] sm:$0xff] %vm2149_vm0, %v2128_v27 }
 0x2eb   : > { %v2690_v28 = vpop.permute.xlu0 %2689 }
 0x2ec   : > { %2732 = vst.msk [vmem:[#allocation7 + $0xe0] sm:$0xff] %vm2149_vm0, %v2690_v28  ;;  %v2826_v28 = vld [vmem:[#allocation7 + $0x98] sm:$0xff] }
 0x2ed   : > { %v2499_v31 = vpop.permute.xlu1 %2498 }
 0x2ee   : > { %2540 = vst.msk [vmem:[#allocation7 + $0x100] sm:$0xff] %vm2149_vm0, %v2499_v31  ;;  %v2831_v31 = vld [vmem:[#allocation7 + $0xc0] sm:$0xff] }
 0x2ef   : > { %v2321_v29 = vpop.permute.xlu0 %2320  ;;  %v2868_v32 = vld [vmem:[#allocation7 + $0x1e8] sm:$0xff] }
 0x2f0   : > { %2355 = vst.msk [vmem:[#allocation7 + $0x210] sm:$0xff] %vm2149_vm0, %v2321_v29  ;;  %3358 = vmatprep.mubr.bf16.mxu1 %v2868_v32 }
 0x2f1   : > { %v2130_v33 = vpop.permute.xlu1 %2129  ;;  %3359 = vmatmul.mubr.bf16.gmra.mrb[48].mxu1 %v2867_v35  ;;  %v2872_v55 = vld [vmem:[#allocation7 + $0x208] sm:$0xff] }
 0x2f2   : > { %2164 = vst.msk [vmem:[#allocation7 + $0x230] sm:$0xff] %vm2149_vm0, %v2130_v33 }
 0x2f3   : > { %v2692_v42 = vpop.permute.xlu0 %2691  ;;  %v2835_v43 = vld [vmem:[#allocation7 + $0xe0] sm:$0xff] }
 0x2f4   : > { %2733 = vst.msk [vmem:[#allocation7 + $0x108] sm:$0xff] %vm2149_vm0, %v2692_v42  ;;  %3463 = vmatprep.mubr.bf16.mxu0 %v2835_v43 }
 0x2f5   : > { %v2501_v44 = vpop.permute.xlu1 %2500  ;;  %3464 = vmatmul.mubr.bf16.gmra.mrb[52].mxu0 %v2834_v2  ;;  %v2839_v62 = vld [vmem:[#allocation7 + $0x100] sm:$0xff] }
 0x2f6   : > { %2541 = vst.msk [vmem:[#allocation7 + $0x128] sm:$0xff] %vm2149_vm0, %v2501_v44 }
 0x2f7   : > { %v2873_v54 = vld [vmem:[#allocation7 + $0x210] sm:$0xff] }
 0x2f8   : > { %3366 = vmatprep.mubr.bf16.mxu1 %v2873_v54 }
 0x2f9   : > { %3367 = vmatmul.mubr.bf16.gmra.mrb[52].mxu1 %v2872_v55  ;;  %v2877_v10 = vld [vmem:[#allocation7 + $0x230] sm:$0xff] }
 0x2fb   : > { %v2840_v58 = vld [vmem:[#allocation7 + $0x108] sm:$0xff] }
 0x2fc   : > { %3471 = vmatprep.mubr.bf16.mxu0 %v2840_v58  ;;  %v2836_v58 = vld [vmem:[#allocation7 + $0xe8] sm:$0xff] }
 0x2fd   : > { %3472 = vmatmul.mubr.bf16.gmra.mrb[56].mxu0 %v2839_v62  ;;  %v2844_v15 = vld [vmem:[#allocation7 + $0x128] sm:$0xff]  ;;  %v2841_v62 = vld [vmem:[#allocation7 + $0x110] sm:$0xff] }
 0x303   : > { %v6061_v51 = vpop.f32.mrb[0].mxu1 }
 0x304   : > { %v6062_v63 = vpop.f32.mrb[1].mxu1 }
 0x305   : > { %v8226_v18 = vadd.f32 %v6062_v63, %v6061_v51  ;;  %v6064_v3 = vpop.f32.mrb[2].mxu1 }
 0x306   : > { %v6065_v56 = vpop.f32.mrb[3].mxu1 }
 0x307   : > { %v2323_v5 = vpop.permute.xlu0 %2322  ;;  %v8229_v57 = vadd.f32 %v6065_v56, %v6064_v3  ;;  %v2846_v3 = vld [vmem:[#allocation7 + $0x138] sm:$0xff] }
 0x308   : > { %2356 = vst.msk [vmem:[#allocation7 + $0x238] sm:$0xff] %vm2149_vm0, %v2323_v5  ;;  %v2851_v5 = vld [vmem:[#allocation7 + $0x160] sm:$0xff] }
 0x30a   : > { %v2132_v7 = vpop.permute.xlu1 %2131 }
 0x30b   : > { %2165 = vst.msk [vmem:[#allocation7 + $0x258] sm:$0xff] %vm2149_vm0, %v2132_v7  ;;  %v2694_v49 = vpop.permute.xlu0 %2693 }
 0x30c   : > { %2734 = vst.msk [vmem:[#allocation7 + $0x130] sm:$0xff] %vm2149_vm0, %v2694_v49  ;;  %v2856_v49 = vld [vmem:[#allocation7 + $0x188] sm:$0xff] }
 0x30d   : > { %v6067_v16 = vpop.f32.mrb[4].mxu1 }
 0x30e   : > { %v2503_v38 = vpop.permute.xlu1 %2502  ;;  %v6068_v36 = vpop.f32.mrb[5].mxu1 }
 0x30f   : > { %2542 = vst.msk [vmem:[#allocation7 + $0x150] sm:$0xff] %vm2149_vm0, %v2503_v38  ;;  %v8234_v40 = vadd.f32 %v6068_v36, %v6067_v16  ;;  %v6070_v53 = vpop.f32.mrb[6].mxu1  ;;  %v2325_v17 = vpop.permute.xlu0 %2324  ;;  %v2878_v59 = vld [vmem:[#allocation7 + $0x238] sm:$0xff]  ;;  %v2861_v38 = vld [vmem:[#allocation7 + $0x1b0] sm:$0xff] }
 0x310   : > { %v6071_v47 = vpop.f32.mrb[7].mxu1  ;;  %2357 = vst.msk [vmem:[#allocation7 + $0x260] sm:$0xff] %vm2149_vm0, %v2325_v17  ;;  %3374 = vmatprep.mubr.bf16.mxu1 %v2878_v59 }
 0x311   : > { %v8237_v9 = vadd.f32 %v6071_v47, %v6070_v53  ;;  %3375 = vmatmul.mubr.bf16.gmra.mrb[56].mxu1 %v2877_v10 }
 0x312   : > { %v2505_v34 = vpop.permute.xlu1 %2504  ;;  %v2882_v46 = vld [vmem:[#allocation7 + $0x258] sm:$0xff] }
 0x313   : > { %2543 = vst.msk [vmem:[#allocation7 + $0x178] sm:$0xff] %vm2149_vm0, %v2505_v34  ;;  %v2696_v11 = vpop.permute.xlu0 %2695  ;;  %v2845_v12 = vld [vmem:[#allocation7 + $0x130] sm:$0xff] }
 0x314   : > { %2735 = vst.msk [vmem:[#allocation7 + $0x158] sm:$0xff] %vm2149_vm0, %v2696_v11  ;;  %3479 = vmatprep.mubr.bf16.mxu0 %v2845_v12  ;;  %v2866_v11 = vld [vmem:[#allocation7 + $0x1d8] sm:$0xff]  ;;  %v2871_v12 = vld [vmem:[#allocation7 + $0x200] sm:$0xff] }
 0x315   : > { %3480 = vmatmul.mubr.bf16.gmra.mrb[60].mxu0 %v2844_v15 }
 0x316   : > { %v2507_v13 = vpop.permute.xlu1 %2506  ;;  %v2849_v19 = vld [vmem:[#allocation7 + $0x150] sm:$0xff] }
 0x317   : > { %2544 = vst.msk [vmem:[#allocation7 + $0x1a0] sm:$0xff] %vm2149_vm0, %v2507_v13  ;;  %v2698_v30 = vpop.permute.xlu0 %2697  ;;  %v2883_v8 = vld [vmem:[#allocation7 + $0x260] sm:$0xff] }
 0x318   : > { %2736 = vst.msk [vmem:[#allocation7 + $0x180] sm:$0xff] %vm2149_vm0, %v2698_v30  ;;  %3382 = vmatprep.mubr.bf16.mxu1 %v2883_v8 }
 0x319   : > { %3383 = vmatmul.mubr.bf16.gmra.mrb[60].mxu1 %v2882_v46 }
 0x31a   : > { %v2509_v4 = vpop.permute.xlu1 %2508  ;;  %6599 = vmatprep.mubr.msk.bf16.mxu1 %vm377_vm13, %v2811_v50  ;;  %v2854_v26 = vld [vmem:[#allocation7 + $0x178] sm:$0xff] }
 0x31b   : > { %2545 = vst.msk [vmem:[#allocation7 + $0x1c8] sm:$0xff] %vm2149_vm0, %v2509_v4  ;;  %v2700_v52 = vpop.permute.xlu0 %2699  ;;  %v2850_v48 = vld [vmem:[#allocation7 + $0x158] sm:$0xff] }
 0x31c   : > { %2737 = vst.msk [vmem:[#allocation7 + $0x1a8] sm:$0xff] %vm2149_vm0, %v2700_v52  ;;  %3487 = vmatprep.mubr.bf16.mxu0 %v2850_v48  ;;  %v2876_v48 = vld [vmem:[#allocation7 + $0x228] sm:$0xff] }
 0x31d   : > { %3488 = vmatmul.mubr.bf16.gmra.mrb[64].mxu0 %v2849_v19 }
 0x31e   : > { %v2511_v1 = vpop.permute.xlu1 %2510  ;;  %v2859_v33 = vld [vmem:[#allocation7 + $0x1a0] sm:$0xff] }
 0x31f   : > { %2546 = vst.msk [vmem:[#allocation7 + $0x1f0] sm:$0xff] %vm2149_vm0, %v2511_v1  ;;  %v2702_v60 = vpop.permute.xlu0 %2701  ;;  %v2855_v39 = vld [vmem:[#allocation7 + $0x180] sm:$0xff]  ;;  %v2881_v1 = vld [vmem:[#allocation7 + $0x250] sm:$0xff] }
 0x320   : > { %2738 = vst.msk [vmem:[#allocation7 + $0x1d0] sm:$0xff] %vm2149_vm0, %v2702_v60  ;;  %3495 = vmatprep.mubr.bf16.mxu0 %v2855_v39  ;;  %v2886_v60 = vld [vmem:[#allocation7 + $0x278] sm:$0xff] }
 0x321   : > { %6600 = vmatmul.mubr.msk.bf16.vlgmr.msra.gmra.mrb[64].mxu1 %vm377_vm13, %v2816_v23 }
 0x322   : > { %v2513_v22 = vpop.permute.xlu1 %2512  ;;  %6603 = vmatprep.mubr.msk.bf16.mxu1 %vm377_vm13, %v2821_v24  ;;  %v6073_v37 = vpop.f32.mrb[8].mxu1  ;;  %v2864_v51 = vld [vmem:[#allocation7 + $0x1c8] sm:$0xff] }
 0x323   : > { %2547 = vst.msk [vmem:[#allocation7 + $0x218] sm:$0xff] %vm2149_vm0, %v2513_v22  ;;  %v2704_v25 = vpop.permute.xlu0 %2703  ;;  %v6074_v21 = vpop.f32.mrb[9].mxu1  ;;  %v2860_v6 = vld [vmem:[#allocation7 + $0x1a8] sm:$0xff] }
 0x324   : > { %2739 = vst.msk [vmem:[#allocation7 + $0x1f8] sm:$0xff] %vm2149_vm0, %v2704_v25  ;;  %v8253_v41 = vadd.f32 %v6074_v21, %v6073_v37  ;;  %v6076_v61 = vpop.f32.mrb[10].mxu1  ;;  %v8293_v37 = vld [vmem:[%s9123_s4] ss:$0 sm:$0xff] }
 0x325   : > { %3496 = vmatmul.mubr.bf16.gmra.mrb[68].mxu0 %v2854_v26  ;;  %v6077_v45 = vpop.f32.mrb[11].mxu1  ;;  %v3265_v21 = vadd.f32 %v8226_v18, %v8293_v37 }
 0x326   : > { %v2515_v14 = vpop.permute.xlu1 %2514  ;;  %3503 = vmatprep.mubr.bf16.mxu0 %v2860_v6  ;;  %v8256_v27 = vadd.f32 %v6077_v45, %v6076_v61  ;;  %v2869_v56 = vld [vmem:[#allocation7 + $0x1f0] sm:$0xff] }
 0x327   : > { %2548 = vst.msk [vmem:[#allocation7 + $0x240] sm:$0xff] %vm2149_vm0, %v2515_v14  ;;  %v2706_v0 = vpop.permute.xlu0 %2705  ;;  %v2865_v42 = vld [vmem:[#allocation7 + $0x1d0] sm:$0xff] }
 0x328   : > { %2740 = vst.msk [vmem:[#allocation7 + $0x220] sm:$0xff] %vm2149_vm0, %v2706_v0 }
 0x329   : > { %6604 = vmatmul.mubr.msk.bf16.gmra.mrb[68].mxu1 %vm377_vm13, %v2826_v28  ;;  %v3268_v28 = vadd.f32 %v8229_v57, %v8293_v37 }
 0x32a   : > { %v2517_v20 = vpop.permute.xlu1 %2516  ;;  %6607 = vmatprep.mubr.msk.bf16.mxu1 %vm377_vm13, %v2831_v31  ;;  %v2874_v36 = vld [vmem:[#allocation7 + $0x218] sm:$0xff] }
 0x32b   : > { %2549 = vst.msk [vmem:[#allocation7 + $0x268] sm:$0xff] %vm2149_vm0, %v2517_v20  ;;  %v2708_v29 = vpop.permute.xlu0 %2707  ;;  %v2870_v63 = vld [vmem:[#allocation7 + $0x1f8] sm:$0xff] }
 0x32c   : > { %2741 = vst.msk [vmem:[#allocation7 + $0x248] sm:$0xff] %vm2149_vm0, %v2708_v29 }
 0x32d   : > { %v6079_v32 = vpop.f32.mrb[12].mxu1  ;;  %3504 = vmatmul.mubr.bf16.gmra.mrb[72].mxu0 %v2859_v33 }
 0x32e   : > { %v6080_v35 = vpop.f32.mrb[13].mxu1  ;;  %3511 = vmatprep.mubr.bf16.mxu0 %v2865_v42  ;;  %v2879_v30 = vld [vmem:[#allocation7 + $0x240] sm:$0xff] }
 0x32f   : > { %v8262_v43 = vadd.f32 %v6080_v35, %v6079_v32  ;;  %v6082_v44 = vpop.f32.mrb[14].mxu1  ;;  %v2710_v54 = vpop.permute.xlu0 %2709  ;;  %v2875_v7 = vld [vmem:[#allocation7 + $0x220] sm:$0xff] }
 0x330   : > { %v6083_v2 = vpop.f32.mrb[15].mxu1  ;;  %2742 = vst.msk [vmem:[#allocation7 + $0x270] sm:$0xff] %vm2149_vm0, %v2710_v54 }
 0x331   : > { %v8264_v55 = vadd.f32 %v6083_v2, %v6082_v44  ;;  %6608 = vmatmul.mubr.msk.bf16.gmra.mrb[72].mxu1 %vm377_vm13, %v2836_v58 }
 0x332   : > { %6611 = vmatprep.mubr.msk.bf16.mxu1 %vm377_vm13, %v2841_v62  ;;  %v2884_v19 = vld [vmem:[#allocation7 + $0x268] sm:$0xff] }
 0x333   : > { %v2880_v17 = vld [vmem:[#allocation7 + $0x248] sm:$0xff] }
 0x335   : > { %3512 = vmatmul.mubr.bf16.gmra.mrb[76].mxu0 %v2864_v51 }
 0x336   : > { %3519 = vmatprep.mubr.bf16.mxu0 %v2870_v63 }
 0x337   : > { %v2885_v13 = vld [vmem:[#allocation7 + $0x270] sm:$0xff] }
 0x339   : > { %6612 = vmatmul.mubr.msk.bf16.gmra.mrb[76].mxu1 %vm377_vm13, %v2846_v3 }
 0x33a   : > { %6615 = vmatprep.mubr.msk.bf16.mxu1 %vm377_vm13, %v2851_v5  ;;  %v3273_v5 = vadd.f32 %v8234_v40, %v8293_v37 }
 0x33d   : > { %3520 = vmatmul.mubr.bf16.gmra.mrb[80].mxu0 %v2869_v56 }
 0x33e   : > { %3527 = vmatprep.mubr.bf16.mxu0 %v2875_v7 }
 0x341   : > { %6616 = vmatmul.mubr.msk.bf16.gmra.mrb[80].mxu1 %vm377_vm13, %v2856_v49 }
 0x342   : > { %6619 = vmatprep.mubr.msk.bf16.mxu1 %vm377_vm13, %v2861_v38  ;;  %v6085_v16 = vpop.f32.mrb[16].mxu1  ;;  %v3276_v38 = vadd.f32 %v8237_v9, %v8293_v37 }
 0x343   : > { %v6086_v53 = vpop.f32.mrb[17].mxu1 }
 0x344   : > { %v8273_v47 = vadd.f32 %v6086_v53, %v6085_v16  ;;  %v6088_v59 = vpop.f32.mrb[18].mxu1 }
 0x345   : > { %3528 = vmatmul.mubr.bf16.gmra.mrb[84].mxu0 %v2874_v36  ;;  %v6089_v34 = vpop.f32.mrb[19].mxu1 }
 0x346   : > { %3535 = vmatprep.mubr.bf16.mxu0 %v2880_v17  ;;  %v8275_v10 = vadd.f32 %v6089_v34, %v6088_v59 }
 0x349   : > { %6620 = vmatmul.mubr.msk.bf16.gmra.mrb[84].mxu1 %vm377_vm13, %v2866_v11 }
 0x34a   : > { %6623 = vmatprep.mubr.msk.bf16.mxu1 %vm377_vm13, %v2871_v12  ;;  %v6091_v15 = vpop.f32.mrb[20].mxu1 }
 0x34b   : > { %v6092_v8 = vpop.f32.mrb[21].mxu1 }
 0x34c   : > { %v8279_v4 = vadd.f32 %v6092_v8, %v6091_v15  ;;  %v6094_v46 = vpop.f32.mrb[22].mxu1 }
 0x34d   : > { %3536 = vmatmul.mubr.bf16.gmra.mrb[88].mxu0 %v2879_v30  ;;  %v6095_v50 = vpop.f32.mrb[23].mxu1  ;;  %v3281_v30 = vadd.f32 %v8253_v41, %v8293_v37 }
 0x34e   : > { %3543 = vmatprep.mubr.bf16.mxu0 %v2885_v13  ;;  %v8281_v52 = vadd.f32 %v6095_v50, %v6094_v46  ;;  %v3284_v50 = vadd.f32 %v8256_v27, %v8293_v37 }
 0x351   : > { %6624 = vmatmul.mubr.msk.bf16.gmra.mrb[88].mxu1 %vm377_vm13, %v2876_v48 }
 0x352   : > { %6627 = vmatprep.mubr.msk.bf16.mxu1 %vm377_vm13, %v2881_v1 }
 0x355   : > { %3544 = vmatmul.mubr.bf16.gmra.mrb[92].mxu0 %v2884_v19 }
 0x359   : > { %6628 = vmatmul.mubr.msk.bf16.gmra.mrb[92].mxu1 %vm377_vm13, %v2886_v60 }
 0x363   : > { %v6097_v39 = vpop.f32.mrb[24].mxu1 }
 0x364   : > { %v6098_v22 = vpop.f32.mrb[25].mxu1 }
 0x365   : > { %v8286_v23 = vadd.f32 %v6098_v22, %v6097_v39  ;;  %v6100_v24 = vpop.f32.mrb[26].mxu1 }
 0x366   : > { %v6101_v25 = vpop.f32.mrb[27].mxu1 }
 0x367   : > { %v8288_v14 = vadd.f32 %v6101_v25, %v6100_v24 }
 0x36b   : > { %v6103_v26 = vpop.f32.mrb[28].mxu1 }
 0x36c   : > { %v6173_v6 = vpop.f32.mrb[32].mxu0  ;;  %v6104_v61 = vpop.f32.mrb[29].mxu1 }
 0x36d   : > { %v8297_v0 = vadd.f32 %v6104_v61, %v6103_v26  ;;  %v6174_v45 = vpop.f32.mrb[33].mxu0  ;;  %v6106_v20 = vpop.f32.mrb[30].mxu1 }
 0x36e   : > { %v6175_v31 = vadd.f32 %v6174_v45, %v6173_v6  ;;  %v6176_v29 = vpop.f32.mrb[34].mxu0  ;;  %v6107_v32 = vpop.f32.mrb[31].mxu1  ;;  %v3289_v6 = vadd.f32 %v8262_v43, %v8293_v37 }
 0x36f   : > { %v8301_v33 = vadd.f32 %v6107_v32, %v6106_v20  ;;  %v6177_v35 = vpop.f32.mrb[35].mxu0  ;;  %v3292_v20 = vadd.f32 %v8264_v55, %v8293_v37 }
 0x370   : > { %v6178_v42 = vadd.f32 %v6177_v35, %v6176_v29  ;;  %v8303_v44 = vadd.f32 %v6175_v31, %v3265_v21 }
 0x372   : > { %v8305_v2 = vadd.f32 %v6178_v42, %v3268_v28 }
 0x383   : > { %v6109_v18 = vpop.f32.mrb[32].mxu1 }
 0x384   : > { %v6110_v54 = vpop.f32.mrb[33].mxu1 }
 0x385   : > { %v8307_v58 = vadd.f32 %v6110_v54, %v6109_v18  ;;  %v6112_v62 = vpop.f32.mrb[34].mxu1 }
 0x386   : > { %v6113_v51 = vpop.f32.mrb[35].mxu1 }
 0x387   : > { %v8309_v63 = vadd.f32 %v6113_v51, %v6112_v62  ;;  %v6179_v57 = vpop.f32.mrb[36].mxu0 }
 0x388   : > { %v6180_v3 = vpop.f32.mrb[37].mxu0 }
 0x389   : > { %v6181_v56 = vadd.f32 %v6180_v3, %v6179_v57  ;;  %v6182_v7 = vpop.f32.mrb[38].mxu0  ;;  %v3297_v57 = vadd.f32 %v8273_v47, %v8293_v37  ;;  %v6763_v47 = vld [vmem:[%s9124_s5 + $0x48] sm:$0xff]  }
 0x38a   : > { %v6183_v49 = vpop.f32.mrb[39].mxu0 }
 0x38b   : > { %v6184_v16 = vadd.f32 %v6183_v49, %v6182_v7  ;;  %v6115_v36 = vpop.f32.mrb[36].mxu1  ;;  %v8315_v53 = vadd.f32 %v6181_v56, %v3273_v5  ;;  %v3300_v56 = vadd.f32 %v8275_v10, %v8293_v37 }
 0x38c   : > { %v6116_v17 = vpop.f32.mrb[37].mxu1 }
 0x38d   : > { %v8317_v59 = vadd.f32 %v6116_v17, %v6115_v36  ;;  %v6118_v34 = vpop.f32.mrb[38].mxu1  ;;  %v8319_v11 = vadd.f32 %v6184_v16, %v3276_v38  ;;  %v6761_v16 = vld [vmem:[%s9124_s5 + $0x40] sm:$0xff]  }
 0x38e   : > { %v6119_v12 = vpop.f32.mrb[39].mxu1  ;;  %v6762_v36 = vld [vmem:[%s9124_s5] sm:$0xff]   ;;  %6289 = vmatprep.subr.bf16.mxu0 %v6761_v16 }
 0x38f   : > { %v8321_v13 = vadd.f32 %v6119_v12, %v6118_v34  ;;  %v6185_v40 = vpop.f32.mrb[40].mxu0  ;;  %6290 = vmatpush3.bf16.msra.mxu0 %v6762_v36  ;;  %v6772_v36 = vld [vmem:[%s9124_s5 + $0x28] sm:$0xff]  }
 0x390   : > { %v6186_v15 = vpop.f32.mrb[41].mxu0  ;;  %6291 = vmatprep.subr.bf16.mxu0 %v6763_v47 }
 0x391   : > { %v6187_v8 = vadd.f32 %v6186_v15, %v6185_v40  ;;  %v6188_v9 = vpop.f32.mrb[42].mxu0  ;;  %v6764_v40 = vld [vmem:[%s9124_s5 + $0x8] sm:$0xff]  }
 0x392   : > { %v6189_v46 = vpop.f32.mrb[43].mxu0 }
 0x393   : > { %v6190_v48 = vadd.f32 %v6189_v46, %v6188_v9  ;;  %v8327_v1 = vadd.f32 %v6187_v8, %v3281_v30  ;;  %v3305_v46 = vadd.f32 %v8279_v4, %v8293_v37  ;;  %6292 = vmatpush3.bf16.msra.mxu0 %v6764_v40  ;;  %v6766_v4 = vld [vmem:[%s9124_s5 + $0x10] sm:$0xff]  }
 0x395   : > { %v8329_v19 = vadd.f32 %v6190_v48, %v3284_v50 }
 0x3a4   : > { %v6121_v60 = vpop.f32.mrb[40].mxu1 }
 0x3a5   : > { %v6122_v39 = vpop.f32.mrb[41].mxu1 }
 0x3a6   : > { %v8331_v22 = vadd.f32 %v6122_v39, %v6121_v60  ;;  %v6124_v24 = vpop.f32.mrb[42].mxu1  ;;  %v3308_v39 = vadd.f32 %v8281_v52, %v8293_v37 }
 0x3a7   : > { %v6125_v25 = vpop.f32.mrb[43].mxu1 }
 0x3a8   : > { %v8333_v26 = vadd.f32 %v6125_v25, %v6124_v24  ;;  %v6191_v41 = vpop.f32.mrb[44].mxu0 }
 0x3a9   : > { %v6192_v21 = vpop.f32.mrb[45].mxu0 }
 0x3aa   : > { %v6193_v61 = vadd.f32 %v6192_v21, %v6191_v41  ;;  %v6194_v27 = vpop.f32.mrb[46].mxu0 }
 0x3ab   : > { %v6195_v45 = vpop.f32.mrb[47].mxu0 }
 0x3ac   : > { %v6196_v28 = vadd.f32 %v6195_v45, %v6194_v27  ;;  %v6127_v31 = vpop.f32.mrb[44].mxu1  ;;  %v8339_v29 = vadd.f32 %v6193_v61, %v3289_v6  ;;  %v6765_v6 = vld [vmem:[%s9124_s5 + $0x50] sm:$0xff]  }
 0x3ad   : > { %v6128_v32 = vpop.f32.mrb[45].mxu1  ;;  %6293 = vmatprep.subr.bf16.mxu0 %v6765_v6 }
 0x3ae   : > { %v8341_v35 = vadd.f32 %v6128_v32, %v6127_v31  ;;  %v6130_v42 = vpop.f32.mrb[46].mxu1  ;;  %v8343_v18 = vadd.f32 %v6196_v28, %v3292_v20  ;;  %6294 = vmatpush3.bf16.msra.mxu0 %v6766_v4  ;;  %v3313_v32 = vadd.f32 %v8286_v23, %v8293_v37  ;;  %v6769_v23 = vld [vmem:[%s9124_s5 + $0x60] sm:$0xff]  }
 0x3af   : > { %v6131_v54 = vpop.f32.mrb[47].mxu1 }
 0x3b0   : > { %v8345_v62 = vadd.f32 %v6131_v54, %v6130_v42  ;;  %v6197_v43 = vpop.f32.mrb[48].mxu0 }
 0x3b1   : > { %v6198_v51 = vpop.f32.mrb[49].mxu0 }
 0x3b2   : > { %v6199_v3 = vadd.f32 %v6198_v51, %v6197_v43  ;;  %v6200_v55 = vpop.f32.mrb[50].mxu0  ;;  %v3316_v51 = vadd.f32 %v8288_v14, %v8293_v37  ;;  %v6770_v14 = vld [vmem:[%s9124_s5 + $0x20] sm:$0xff]  }
 0x3b3   : > { %v6201_v5 = vpop.f32.mrb[51].mxu0 }
 0x3b4   : > { %v6202_v7 = vadd.f32 %v6201_v5, %v6200_v55  ;;  %v8351_v49 = vadd.f32 %v6199_v3, %v3297_v57  ;;  %v6767_v5 = vld [vmem:[%s9124_s5 + $0x58] sm:$0xff]  }
 0x3b5   : > { %6295 = vmatprep.subr.bf16.mxu0 %v6767_v5 }
 0x3b6   : > { %v8353_v38 = vadd.f32 %v6202_v7, %v3300_v56  ;;  %v6768_v56 = vld [vmem:[%s9124_s5 + $0x18] sm:$0xff]   ;;  %v6771_v7 = vld [vmem:[%s9124_s5 + $0x68] sm:$0xff]  }
 0x3b7   : > { %6296 = vmatpush3.bf16.msra.mxu0 %v6768_v56 }
 0x3b8   : > { %6297 = vmatprep.subr.bf16.mxu0 %v6769_v23 }
 0x3bb   : > { %6298 = vmatpush3.bf16.msra.mxu0 %v6770_v14 }
 0x3bc   : > { %6299 = vmatprep.subr.bf16.mxu0 %v6771_v7 }
 0x3bf   : > { %6300 = vmatpush3.bf16.msra.mxu0 %v6772_v36 }
 0x3c4   : > { %v6133_v17 = vpop.f32.mrb[48].mxu1 }
 0x3c5   : > { %v6134_v34 = vpop.f32.mrb[49].mxu1 }
 0x3c6   : > { %v8364_v10 = vadd.f32 %v6134_v34, %v6133_v17  ;;  %v6136_v12 = vpop.f32.mrb[50].mxu1 }
 0x3c7   : > { %v6137_v15 = vpop.f32.mrb[51].mxu1 }
 0x3c8   : > { %v8369_v30 = vadd.f32 %v6137_v15, %v6136_v12  ;;  %v6203_v8 = vpop.f32.mrb[52].mxu0 }
 0x3c9   : > { %v6204_v9 = vpop.f32.mrb[53].mxu0 }
 0x3ca   : > { %v6205_v50 = vadd.f32 %v6204_v9, %v6203_v8  ;;  %v6206_v48 = vpop.f32.mrb[54].mxu0  ;;  %v3321_v9 = vadd.f32 %v8297_v0, %v8293_v37 }
 0x3cb   : > { %v6207_v60 = vpop.f32.mrb[55].mxu0 }
 0x3cc   : > { %v6208_v24 = vadd.f32 %v6207_v60, %v6206_v48  ;;  %v6139_v25 = vpop.f32.mrb[52].mxu1  ;;  %v8375_v41 = vadd.f32 %v6205_v50, %v3305_v46  ;;  %v3324_v60 = vadd.f32 %v8301_v33, %v8293_v37 }
 0x3cd   : > { %v6140_v21 = vpop.f32.mrb[53].mxu1 }
 0x3ce   : > { %v8383_v61 = vadd.f32 %v6140_v21, %v6139_v25  ;;  %v6142_v27 = vpop.f32.mrb[54].mxu1  ;;  %v8385_v45 = vadd.f32 %v6208_v24, %v3308_v39 }
 0x3cf   : > { %v6143_v20 = vpop.f32.mrb[55].mxu1 }
 0x3d0   : > { %v8387_v52 = vadd.f32 %v6143_v20, %v6142_v27  ;;  %v6209_v28 = vpop.f32.mrb[56].mxu0 }
 0x3d1   : > { %v6210_v31 = vpop.f32.mrb[57].mxu0 }
 0x3d2   : > { %v6211_v42 = vadd.f32 %v6210_v31, %v6209_v28  ;;  %v6212_v54 = vpop.f32.mrb[58].mxu0 }
 0x3d3   : > { %v6213_v43 = vpop.f32.mrb[59].mxu0 }
 0x3d4   : > { %v6214_v57 = vadd.f32 %v6213_v43, %v6212_v54  ;;  %v8393_v3 = vadd.f32 %v6211_v42, %v3313_v32  ;;  %v3329_v32 = vadd.f32 %v8307_v58, %v8293_v37  ;;  %v3332_v43 = vadd.f32 %v8309_v63, %v8293_v37 }
 0x3d6   : > { %v8395_v55 = vadd.f32 %v6214_v57, %v3316_v51 }
 0x3e4   : > { %v6145_v16 = vpop.f32.mrb[56].mxu1 }
 0x3e5   : > { %v6146_v47 = vpop.f32.mrb[57].mxu1 }
 0x3e6   : > { %v8415_v17 = vadd.f32 %v6146_v47, %v6145_v16  ;;  %v6148_v34 = vpop.f32.mrb[58].mxu1 }
 0x3e7   : > { %v6149_v12 = vpop.f32.mrb[59].mxu1 }
 0x3e8   : > { %v8417_v40 = vadd.f32 %v6149_v12, %v6148_v34  ;;  %v6215_v15 = vpop.f32.mrb[60].mxu0 }
 0x3e9   : > { %v6216_v8 = vpop.f32.mrb[61].mxu0 }
 0x3ea   : > { %v6217_v46 = vadd.f32 %v6216_v8, %v6215_v15  ;;  %v6218_v50 = vpop.f32.mrb[62].mxu0 }
 0x3eb   : > { %v6219_v48 = vpop.f32.mrb[63].mxu0 }
 0x3ec   : > { %v6220_v39 = vadd.f32 %v6219_v48, %v6218_v50  ;;  %v6151_v24 = vpop.f32.mrb[60].mxu1  ;;  %v8423_v25 = vadd.f32 %v6217_v46, %v3321_v9  ;;  %v3340_v50 = vadd.f32 %v8321_v13, %v8293_v37 }
 0x3ed   : > { %v6152_v21 = vpop.f32.mrb[61].mxu1 }
 0x3ee   : > { %v8425_v6 = vadd.f32 %v6152_v21, %v6151_v24  ;;  %v6154_v4 = vpop.f32.mrb[62].mxu1  ;;  %v8427_v27 = vadd.f32 %v6220_v39, %v3324_v60 }
 0x3ef   : > { %v6155_v20 = vpop.f32.mrb[63].mxu1 }
 0x3f0   : > { %v8429_v28 = vadd.f32 %v6155_v20, %v6154_v4  ;;  %v6221_v0 = vpop.f32.mrb[64].mxu0 }
 0x3f1   : > { %v6222_v31 = vpop.f32.mrb[65].mxu0 }
 0x3f2   : > { %v6223_v42 = vadd.f32 %v6222_v31, %v6221_v0  ;;  %v6224_v33 = vpop.f32.mrb[66].mxu0 }
 0x3f3   : > { %v6225_v54 = vpop.f32.mrb[67].mxu0 }
 0x3f4   : > { %v6226_v51 = vadd.f32 %v6225_v54, %v6224_v33  ;;  %v6601_v57 = vpop.f32.mrb[64].mxu1  ;;  %v8435_v5 = vadd.f32 %v6223_v42, %v3329_v32 }
 0x3f5   : > { %v3595_v56 = vadd.f32 %v6601_v57, %v8315_v53  ;;  %v3586_v23 = vpop.f32.mrb[65].mxu1  ;;  %v3337_v53 = vadd.f32 %v8317_v59, %v8293_v37 }
 0x3f6   : > { %v3587_v14 = vadd.f32 %v3586_v23, %v8303_v44  ;;  %v6602_v7 = vpop.f32.mrb[66].mxu1  ;;  %v8439_v16 = vadd.f32 %v6226_v51, %v3332_v43 }
 0x3f7   : > { %v3715_v36 = vmax.f32 %v3595_v56, 0.0  ;;  %v3598_v58 = vadd.f32 %v6602_v7, %v8319_v11  ;;  %v3589_v47 = vpop.f32.mrb[67].mxu1  ;;  %v3348_v7 = vadd.f32 %v8333_v26, %v8293_v37 }
 0x3f8   : > { %v3713_v34 = vmax.f32 %v3587_v14, 0.0  ;;  %v3590_v12 = vadd.f32 %v3589_v47, %v8305_v2  ;;  %v6227_v63 = vpop.f32.mrb[68].mxu0 }
 0x3f9   : > { %3747 = vst.msk [vmem:[#allocation10 + $0x10] sm:$0xff] %vm377_vm13, %v3715_v36  ;;  %v3716_v15 = vmax.f32 %v3598_v58, 0.0  ;;  %v6228_v8 = vpop.f32.mrb[69].mxu0 }
 0x3fa   : > { %3745 = vst.msk [vmem:[#allocation10] sm:$0xff] %vm377_vm13, %v3713_v34  ;;  %v3714_v44 = vmax.f32 %v3590_v12, 0.0  ;;  %v6229_v9 = vadd.f32 %v6228_v8, %v6227_v63  ;;  %v6230_v46 = vpop.f32.mrb[70].mxu0 }
 0x3fb   : > { %3748 = vst.msk [vmem:[#allocation10 + $0x18] sm:$0xff] %vm377_vm13, %v3716_v15  ;;  %v6231_v11 = vpop.f32.mrb[71].mxu0 }
 0x3fc   : > { %3746 = vst.msk [vmem:[#allocation10 + $0x8] sm:$0xff] %vm377_vm13, %v3714_v44  ;;  %v6232_v2 = vadd.f32 %v6231_v11, %v6230_v46  ;;  %v6605_v48 = vpop.f32.mrb[68].mxu1  ;;  %v8451_v60 = vadd.f32 %v6229_v9, %v3337_v53  ;;  %v6773_v46 = vld [vmem:[%s9124_s5 + $0xc0] sm:$0xff]  }
 0x3fd   : > { %v3611_v39 = vadd.f32 %v6605_v48, %v8339_v29  ;;  %v3602_v59 = vpop.f32.mrb[69].mxu1  ;;  %v3345_v29 = vadd.f32 %v8331_v22, %v8293_v37  ;;  %v6774_v11 = vld [vmem:[%s9124_s5 + $0x80] sm:$0xff]   ;;  %6329 = vmatprep.subr.bf16.mxu1 %v6773_v46 }
 0x3fe   : > { %v3603_v24 = vadd.f32 %v3602_v59, %v8327_v1  ;;  %v6606_v21 = vpop.f32.mrb[70].mxu1  ;;  %v8455_v4 = vadd.f32 %v6232_v2, %v3340_v50  ;;  %6330 = vmatpush3.bf16.msra.mxu1 %v6774_v11 }
 0x3ff   : > { %v3719_v20 = vmax.f32 %v3611_v39, 0.0  ;;  %v3614_v0 = vadd.f32 %v6606_v21, %v8343_v18  ;;  %v3605_v31 = vpop.f32.mrb[71].mxu1 }
 0x400   : > { %v3717_v32 = vmax.f32 %v3603_v24, 0.0  ;;  %v3606_v13 = vadd.f32 %v3605_v31, %v8329_v19  ;;  %v6233_v42 = vpop.f32.mrb[72].mxu0 }
 0x401   : > { %3751 = vst.msk [vmem:[#allocation10 + $0x30] sm:$0xff] %vm377_vm13, %v3719_v20  ;;  %v3720_v33 = vmax.f32 %v3614_v0, 0.0  ;;  %v6234_v54 = vpop.f32.mrb[73].mxu0 }
 0x402   : > { %v3809_v43 = vld [vmem:[#allocation10 + $0x10] ss:$2 sm:$0xff]  ;;  %v3825_v1 = vld [vmem:[#allocation10 + $0x11] ss:$2 sm:$0xff]  ;;  %3749 = vst.msk [vmem:[#allocation10 + $0x20] sm:$0xff] %vm377_vm13, %v3717_v32  ;;  %v3718_v51 = vmax.f32 %v3606_v13, 0.0  ;;  %v6235_v57 = vadd.f32 %v6234_v54, %v6233_v42  ;;  %v3356_v42 = vadd.f32 %v8345_v62, %v8293_v37 }
 0x403   : > { %v6236_v56 = vpop.f32.mrb[74].mxu0  ;;  %v3848_v18 = vadd.f32 %v3825_v1, %v3809_v43  ;;  %v3777_v23 = vld [vmem:[#allocation10] ss:$2 sm:$0xff]  ;;  %v3793_v14 = vld [vmem:[#allocation10 + $0x1] ss:$2 sm:$0xff]  ;;  %3752 = vst.msk [vmem:[#allocation10 + $0x38] sm:$0xff] %vm377_vm13, %v3720_v33 }
 0x404   : > { %v6237_v19 = vpop.f32.mrb[75].mxu0  ;;  %v3840_v36 = vadd.f32 %v3793_v14, %v3777_v23  ;;  %3750 = vst.msk [vmem:[#allocation10 + $0x28] sm:$0xff] %vm377_vm13, %v3718_v51  ;;  %v6609_v58 = vpop.f32.mrb[72].mxu1  ;;  %v8467_v47 = vadd.f32 %v6235_v57, %v3345_v29  ;;  %v3881_v14 = vld [vmem:[#allocation4] sm:$0xff] }
 0x405   : > { %v6238_v22 = vadd.f32 %v6237_v19, %v6236_v56  ;;  %v3627_v34 = vadd.f32 %v6609_v58, %v8375_v41  ;;  %v3618_v12 = vpop.f32.mrb[73].mxu1  ;;  %v3929_v19 = vld [vmem:[#allocation4 + $0x2] sm:$0xff] }
 0x406   : > { %v3856_v63 = vadd.f32 %v3848_v18, %v3840_v36  ;;  %v3619_v15 = vadd.f32 %v3618_v12, %v8351_v49  ;;  %v6610_v8 = vpop.f32.mrb[74].mxu1  ;;  %v3897_v18 = vld [vmem:[#allocation4 + $0x1] sm:$0xff] }
 0x407   : > { %v8471_v53 = vadd.f32 %v6238_v22, %v3348_v7  ;;  %v3723_v44 = vmax.f32 %v3627_v34, 0.0  ;;  %v3630_v9 = vadd.f32 %v6610_v8, %v8385_v45  ;;  %v3621_v26 = vpop.f32.mrb[75].mxu1  ;;  %v3353_v45 = vadd.f32 %v8341_v35, %v8293_v37  ;;  %v6775_v22 = vld [vmem:[%s9124_s5 + $0x70] sm:$0xff]   ;;  %v6780_v8 = vld [vmem:[%s9124_s5 + $0x38] sm:$0xff]  }
 0x408   : > { %v3864_v41 = vmul.f32 0.25, %v3856_v63  ;;  %v3721_v50 = vmax.f32 %v3619_v15, 0.0  ;;  %v3622_v2 = vadd.f32 %v3621_v26, %v8353_v38  ;;  %v6239_v49 = vpop.f32.mrb[76].mxu0  ;;  %v6779_v15 = vld [vmem:[%s9124_s5 + $0x88] sm:$0xff]   ;;  %6301 = vmatprep.subr.bf16.mxu0 %v6775_v22  ;;  %v3369_v22 = vadd.f32 %v8383_v61, %v8293_v37 }
 0x409   : > { %3755 = vst.msk [vmem:[#allocation10 + $0x50] sm:$0xff] %vm377_vm13, %v3723_v44  ;;  %v3724_v48 = vmax.f32 %v3630_v9, 0.0  ;;  %v6240_v39 = vpop.f32.mrb[77].mxu0  ;;  %v3361_v44 = vadd.f32 %v8364_v10, %v8293_v37 }
 0x40a   : > { %3873 = vst.msk [vmem:[#allocation4 + $0x11] sm:$0xff] %vm377_vm13, %v3864_v41  ;;  %v3811_v59 = vld [vmem:[#allocation10 + $0x30] ss:$2 sm:$0xff]  ;;  %v3827_v24 = vld [vmem:[#allocation10 + $0x31] ss:$2 sm:$0xff]  ;;  %3753 = vst.msk [vmem:[#allocation10 + $0x40] sm:$0xff] %vm377_vm13, %v3721_v50  ;;  %v6241_v20 = vadd.f32 %v6240_v39, %v6239_v49 }
 0x40b   : > { %v3722_v21 = vmax.f32 %v3622_v2, 0.0  ;;  %v6242_v0 = vpop.f32.mrb[78].mxu0  ;;  %v3849_v38 = vadd.f32 %v3827_v24, %v3811_v59  ;;  %v3779_v31 = vld [vmem:[#allocation10 + $0x20] ss:$2 sm:$0xff]  ;;  %v3795_v32 = vld [vmem:[#allocation10 + $0x21] ss:$2 sm:$0xff] }
 0x40c   : > { %3756 = vst.msk [vmem:[#allocation10 + $0x58] sm:$0xff] %vm377_vm13, %v3724_v48  ;;  %v6243_v13 = vpop.f32.mrb[79].mxu0  ;;  %v3841_v35 = vadd.f32 %v3795_v32, %v3779_v31  ;;  %v6613_v54 = vpop.f32.mrb[76].mxu1  ;;  %v8490_v29 = vadd.f32 %v6241_v20, %v3353_v45 }
 0x40d   : > { %3754 = vst.msk [vmem:[#allocation10 + $0x48] sm:$0xff] %vm377_vm13, %v3722_v21  ;;  %v6244_v33 = vadd.f32 %v6243_v13, %v6242_v0  ;;  %v3643_v43 = vadd.f32 %v6613_v54, %v8423_v25  ;;  %v3634_v1 = vpop.f32.mrb[77].mxu1  ;;  %v6776_v25 = vld [vmem:[%s9124_s5 + $0x30] sm:$0xff]   ;;  %v3364_v0 = vadd.f32 %v8369_v30, %v8293_v37 }
 0x40e   : > { %v3857_v51 = vadd.f32 %v3849_v38, %v3841_v35  ;;  %v3635_v57 = vadd.f32 %v3634_v1, %v8393_v3  ;;  %v6614_v56 = vpop.f32.mrb[78].mxu1  ;;  %v6777_v3 = vld [vmem:[%s9124_s5 + $0xc8] sm:$0xff]   ;;  %6302 = vmatpush3.bf16.msra.mxu0 %v6776_v25 }
 0x40f   : > { %v8494_v23 = vadd.f32 %v6244_v33, %v3356_v42  ;;  %v3727_v62 = vmax.f32 %v3643_v43, 0.0  ;;  %v3646_v7 = vadd.f32 %v6614_v56, %v8427_v27  ;;  %v3637_v36 = vpop.f32.mrb[79].mxu1  ;;  %v6778_v27 = vld [vmem:[%s9124_s5 + $0x78] sm:$0xff]   ;;  %6331 = vmatprep.subr.bf16.mxu1 %v6777_v3 }
 0x410   : > { %v3865_v58 = vmul.f32 0.25, %v3857_v51  ;;  %v3725_v34 = vmax.f32 %v3635_v57, 0.0  ;;  %v3638_v12 = vadd.f32 %v3637_v36, %v8395_v55  ;;  %v6245_v63 = vpop.f32.mrb[80].mxu0  ;;  %6332 = vmatpush3.bf16.msra.mxu1 %v6779_v15  ;;  %6303 = vmatprep.subr.bf16.mxu0 %v6778_v27 }
 0x411   : > { %3759 = vst.msk [vmem:[#allocation10 + $0x70] sm:$0xff] %vm377_vm13, %v3727_v62  ;;  %v3728_v9 = vmax.f32 %v3646_v7, 0.0  ;;  %v6246_v55 = vpop.f32.mrb[81].mxu0  ;;  %v8519_v26 = vld [vmem:[#allocation4 + $0x11] sm:$0xff] }
 0x412   : > { %v8521_v46 = vld [vmem:[#allocation4 + $0x10] sm:$0xff]  ;;  %3874 = vst.msk [vmem:[#allocation4 + $0x21] sm:$0xff] %vm377_vm13, %v3865_v58  ;;  %3757 = vst.msk [vmem:[#allocation10 + $0x60] sm:$0xff] %vm377_vm13, %v3725_v34  ;;  %v3726_v2 = vmax.f32 %v3638_v12, 0.0  ;;  %v6247_v10 = vadd.f32 %v6246_v55, %v6245_v63  ;;  %v6248_v49 = vpop.f32.mrb[82].mxu0  ;;  %v3905_v48 = vpack.c.bf16 %v8519_v26, %v3897_v18  ;;  %6304 = vmatpush3.bf16.msra.mxu0 %v6780_v8 }
 0x413   : > { %v8523_v11 = vld [vmem:[#allocation4 + $0x12] sm:$0xff]  ;;  %v3889_v39 = vpack.c.bf16 %v8521_v46, %v3881_v14  ;;  %3760 = vst.msk [vmem:[#allocation10 + $0x78] sm:$0xff] %vm377_vm13, %v3728_v9  ;;  %v6249_v21 = vpop.f32.mrb[83].mxu0 }
 0x414   : > { %v3813_v41 = vld [vmem:[#allocation10 + $0x50] ss:$2 sm:$0xff]  ;;  %v3829_v50 = vld [vmem:[#allocation10 + $0x51] ss:$2 sm:$0xff]  ;;  %v3781_v59 = vld [vmem:[#allocation10 + $0x40] ss:$2 sm:$0xff]  ;;  %v3937_v20 = vpack.c.bf16 %v8523_v11, %v3929_v19  ;;  %v6250_v31 = vadd.f32 %v6249_v21, %v6248_v49  ;;  %3913 = vrot.lane.b32.xlu1 %v3905_v48, %s6942_s24  ;;  %v8535_v13 = vadd.f32 %v6247_v10, %v3361_v44  ;;  %v3372_v44 = vadd.f32 %v8387_v52, %v8293_v37 }
 0x415   : > { %v3850_v45 = vadd.f32 %v3829_v50, %v3813_v41  ;;  %v3797_v24 = vld [vmem:[#allocation10 + $0x41] ss:$2 sm:$0xff]  ;;  %3758 = vst.msk [vmem:[#allocation10 + $0x68] sm:$0xff] %vm377_vm13, %v3726_v2  ;;  %v6617_v32 = vpop.f32.mrb[80].mxu1  ;;  %3893 = vst.msk [vmem:[#allocation8] sm:$0xff] %vm377_vm13, %v3889_v39 }
 0x416   : > { %v3842_v38 = vadd.f32 %v3797_v24, %v3781_v59  ;;  %v3659_v42 = vadd.f32 %v6617_v32, %v8451_v60  ;;  %v3650_v35 = vpop.f32.mrb[81].mxu1  ;;  %3941 = vst.msk [vmem:[#allocation8 + $0x8] sm:$0xff] %vm377_vm13, %v3937_v20  ;;  %v8541_v43 = vadd.f32 %v6250_v31, %v3364_v0  ;;  %v6781_v60 = vld [vmem:[%s9124_s5 + $0xd0] sm:$0xff]   ;;  %v6783_v59 = vld [vmem:[%s9124_s5 + $0xd8] sm:$0xff]  }
 0x417   : > { %v3651_v54 = vadd.f32 %v3650_v35, %v8435_v5  ;;  %v6618_v30 = vpop.f32.mrb[82].mxu1  ;;  %v6782_v5 = vld [vmem:[%s9124_s5 + $0x90] sm:$0xff]   ;;  %6333 = vmatprep.subr.bf16.mxu1 %v6781_v60  ;;  %v3380_v60 = vadd.f32 %v8417_v40, %v8293_v37 }
 0x418   : > { %v3858_v33 = vadd.f32 %v3850_v45, %v3842_v38  ;;  %v3731_v1 = vmax.f32 %v3659_v42, 0.0  ;;  %v3662_v51 = vadd.f32 %v6618_v30, %v8455_v4  ;;  %v3653_v57 = vpop.f32.mrb[83].mxu1  ;;  %v6251_v19 = vpop.f32.mrb[84].mxu0  ;;  %6334 = vmatpush3.bf16.msra.mxu1 %v6782_v5  ;;  %v3377_v38 = vadd.f32 %v8415_v17, %v8293_v37 }
 0x419   : > { %v3729_v18 = vmax.f32 %v3651_v54, 0.0  ;;  %v3654_v14 = vadd.f32 %v3653_v57, %v8439_v16  ;;  %v6252_v7 = vpop.f32.mrb[85].mxu0  ;;  %v3946_v36 = vld [vmem:[#allocation4 + $0x20] sm:$0xff]  ;;  %6335 = vmatprep.subr.bf16.mxu1 %v6783_v59  ;;  %v3388_v59 = vadd.f32 %v8429_v28, %v8293_v37  ;;  %v6788_v28 = vld [vmem:[%s9124_s5 + $0xe8] sm:$0xff]  }
 0x41a   : > { %v3866_v56 = vmul.f32 0.25, %v3858_v33  ;;  %3763 = vst.msk [vmem:[#allocation10 + $0x90] sm:$0xff] %vm377_vm13, %v3731_v1  ;;  %v3732_v62 = vmax.f32 %v3662_v51, 0.0  ;;  %v3899_v4 = vld [vmem:[#allocation4 + $0x21] sm:$0xff]  ;;  %v3815_v16 = vld [vmem:[#allocation10 + $0x70] ss:$2 sm:$0xff]  ;;  %v6253_v58 = vadd.f32 %v6252_v7, %v6251_v19  ;;  %v3953_v12 = vpack.c.bf16 %v3946_v36, %v8521_v46 }
 0x41b   : > { %v3831_v25 = vld [vmem:[#allocation10 + $0x71] ss:$2 sm:$0xff]  ;;  %3761 = vst.msk [vmem:[#allocation10 + $0x80] sm:$0xff] %vm377_vm13, %v3729_v18  ;;  %v3730_v3 = vmax.f32 %v3654_v14, 0.0  ;;  %v6254_v34 = vpop.f32.mrb[86].mxu0  ;;  %v3985_v61 = vpack.c.bf16 %v3899_v4, %v8519_v26 }
 0x41c   : > { %3875 = vst.msk [vmem:[#allocation4 + $0x31] sm:$0xff] %vm377_vm13, %v3866_v56  ;;  %v3851_v63 = vadd.f32 %v3831_v25, %v3815_v16  ;;  %v3783_v27 = vld [vmem:[#allocation10 + $0x60] ss:$2 sm:$0xff]  ;;  %v3799_v15 = vld [vmem:[#allocation10 + $0x61] ss:$2 sm:$0xff]  ;;  %3764 = vst.msk [vmem:[#allocation10 + $0x98] sm:$0xff] %vm377_vm13, %v3732_v62  ;;  %3961 = vrot.lane.b32.xlu0 %v3953_v12, %s6942_s24  ;;  %v3530_v46 = vadd.f32 %v6253_v58, %v3369_v22 }
 0x41d   : > { %v6255_v8 = vpop.f32.mrb[87].mxu0  ;;  %v3843_v9 = vadd.f32 %v3799_v15, %v3783_v27  ;;  %3762 = vst.msk [vmem:[#allocation10 + $0x88] sm:$0xff] %vm377_vm13, %v3730_v3  ;;  %v6621_v41 = vpop.f32.mrb[84].mxu1  ;;  %3989 = vst.msk [vmem:[#allocation8 + $0x10] sm:$0xff] %vm377_vm13, %v3985_v61  ;;  %v6785_v61 = vld [vmem:[%s9124_s5 + $0xe0] sm:$0xff]  }
 0x41e   : > { %v6256_v55 = vadd.f32 %v6255_v8, %v6254_v34  ;;  %v3675_v50 = vadd.f32 %v6621_v41, %v8490_v29  ;;  %v3666_v2 = vpop.f32.mrb[85].mxu1  ;;  %v6784_v29 = vld [vmem:[%s9124_s5 + $0x98] sm:$0xff]  }
 0x41f   : > { %v3859_v10 = vadd.f32 %v3851_v63, %v3843_v9  ;;  %v3667_v49 = vadd.f32 %v3666_v2, %v8467_v47  ;;  %v6622_v26 = vpop.f32.mrb[86].mxu1  ;;  %v8574_v47 = vld [vmem:[#allocation4 + $0x22] sm:$0xff]  ;;  %6336 = vmatpush3.bf16.msra.mxu1 %v6784_v29 }
 0x420   : > { %v3533_v48 = vadd.f32 %v6256_v55, %v3372_v44  ;;  %v3735_v39 = vmax.f32 %v3675_v50, 0.0  ;;  %v3678_v52 = vadd.f32 %v6622_v26, %v8494_v23  ;;  %v3669_v45 = vpop.f32.mrb[87].mxu1  ;;  %v6257_v0 = vpop.f32.mrb[88].mxu0  ;;  %v6786_v44 = vld [vmem:[%s9124_s5 + $0xa0] sm:$0xff]   ;;  %6337 = vmatprep.subr.bf16.mxu1 %v6785_v61 }
 0x421   : > { %v3867_v24 = vmul.f32 0.25, %v3859_v10  ;;  %v3733_v21 = vmax.f32 %v3667_v49, 0.0  ;;  %v3670_v20 = vadd.f32 %v3669_v45, %v8471_v53  ;;  %v6258_v31 = vpop.f32.mrb[89].mxu0 }
 0x422   : > { %3767 = vst.msk [vmem:[#allocation10 + $0xb0] sm:$0xff] %vm377_vm13, %v3735_v39  ;;  %v3736_v23 = vmax.f32 %v3678_v52, 0.0  ;;  %v6259_v30 = vadd.f32 %v6258_v31, %v6257_v0  ;;  %v6260_v17 = vpop.f32.mrb[90].mxu0 }
 0x423   : > { %v8579_v32 = vld [vmem:[#allocation4 + $0x31] sm:$0xff]  ;;  %3876 = vst.msk [vmem:[#allocation4 + $0x41] sm:$0xff] %vm377_vm13, %v3867_v24  ;;  %3765 = vst.msk [vmem:[#allocation10 + $0xa0] sm:$0xff] %vm377_vm13, %v3733_v21  ;;  %v3734_v54 = vmax.f32 %v3670_v20, 0.0  ;;  %v6261_v14 = vpop.f32.mrb[91].mxu0  ;;  %6338 = vmatpush3.bf16.msra.mxu1 %v6786_v44 }
 0x424   : > { %v8581_v42 = vld [vmem:[#allocation4 + $0x30] sm:$0xff]  ;;  %v8588_v1 = vpack.c.bf16 %v8579_v32, %v3899_v4  ;;  %v3785_v56 = vld [vmem:[#allocation10 + $0x80] ss:$2 sm:$0xff]  ;;  %v3801_v18 = vld [vmem:[#allocation10 + $0x81] ss:$2 sm:$0xff]  ;;  %3768 = vst.msk [vmem:[#allocation10 + $0xb8] sm:$0xff] %vm377_vm13, %v3736_v23  ;;  %v6262_v62 = vadd.f32 %v6261_v14, %v6260_v17  ;;  %6339 = vmatprep.subr.bf16.mxu1 %v6788_v28 }
 0x425   : > { %v8583_v35 = vld [vmem:[#allocation4 + $0x32] sm:$0xff]  ;;  %v3890_v51 = vpack.c.bf16 %v8581_v42, %v3946_v36  ;;  %v3844_v5 = vadd.f32 %v3801_v18, %v3785_v56  ;;  %3766 = vst.msk [vmem:[#allocation10 + $0xa8] sm:$0xff] %vm377_vm13, %v3734_v54  ;;  %v6625_v7 = vpop.f32.mrb[88].mxu1  ;;  %v3538_v36 = vadd.f32 %v6259_v30, %v3377_v38 }
 0x426   : > { %v3817_v53 = vld [vmem:[#allocation10 + $0x90] ss:$2 sm:$0xff]  ;;  %v3833_v33 = vld [vmem:[#allocation10 + $0x91] ss:$2 sm:$0xff]  ;;  %v3938_v19 = vpack.c.bf16 %v8583_v35, %v8574_v47  ;;  %3915 = vrot.lane.b32.xlu1 %v8588_v1, %s6942_s24  ;;  %v3691_v4 = vadd.f32 %v6625_v7, %v3530_v46  ;;  %v3682_v22 = vpop.f32.mrb[89].mxu1  ;;  %v3541_v3 = vadd.f32 %v6262_v62, %v3380_v60  ;;  %v3385_v46 = vadd.f32 %v8425_v6, %v8293_v37  ;;  %v8627_v37 = vld [vmem:[%s9124_s5 + $0x100] sm:$0xff]  }
 0x427   : > { %v3852_v57 = vadd.f32 %v3833_v33, %v3817_v53  ;;  %3894 = vst.msk [vmem:[#allocation8 + $0x28] sm:$0xff] %vm377_vm13, %v3890_v51  ;;  %4038 = vst.msk [vmem:[#allocation8 + $0x18] sm:$0xff] %vm377_vm13, %v3890_v51  ;;  %v3683_v16 = vadd.f32 %v3682_v22, %v8535_v13  ;;  %v6626_v25 = vpop.f32.mrb[90].mxu1  ;;  %v6789_v33 = vld [vmem:[%s9124_s5 + $0xa8] sm:$0xff]   ;;  %6631 = vmatprep.subr.bf16.mxu0 %v8627_v37  ;;  %v6791_v44 = vld [vmem:[%s9124_s5 + $0xf0] sm:$0xff]  }
 0x428   : > { %3942 = vst.msk [vmem:[#allocation8 + $0x30] sm:$0xff] %vm377_vm13, %v3938_v19  ;;  %4086 = vst.msk [vmem:[#allocation8 + $0x20] sm:$0xff] %vm377_vm13, %v3938_v19  ;;  %v3739_v58 = vmax.f32 %v3691_v4, 0.0  ;;  %v3694_v34 = vadd.f32 %v6626_v25, %v3533_v48  ;;  %v3685_v12 = vpop.f32.mrb[91].mxu1  ;;  %v6263_v8 = vpop.f32.mrb[92].mxu0  ;;  %6340 = vmatpush3.bf16.msra.mxu1 %v6789_v33 }
 0x429   : > { %v3860_v40 = vadd.f32 %v3852_v57, %v3844_v5  ;;  %v3737_v27 = vmax.f32 %v3683_v16, 0.0  ;;  %v3686_v15 = vadd.f32 %v3685_v12, %v8541_v43  ;;  %v6264_v9 = vpop.f32.mrb[93].mxu0  ;;  %6341 = vmatprep.subr.bf16.mxu1 %v6791_v44 }
 0x42a   : > { %3771 = vst.msk [vmem:[#allocation10 + $0xd0] sm:$0xff] %vm377_vm13, %v3739_v58  ;;  %v3740_v13 = vmax.f32 %v3694_v34, 0.0  ;;  %v3948_v55 = vld [vmem:[#allocation4 + $0x40] sm:$0xff]  ;;  %v6265_v10 = vadd.f32 %v6264_v9, %v6263_v8  ;;  %v6266_v49 = vpop.f32.mrb[94].mxu0 }
 0x42b   : > { %v3868_v63 = vmul.f32 0.25, %v3860_v40  ;;  %v3901_v41 = vld [vmem:[#allocation4 + $0x41] sm:$0xff]  ;;  %v3819_v43 = vld [vmem:[#allocation10 + $0xb0] ss:$2 sm:$0xff]  ;;  %v3835_v50 = vld [vmem:[#allocation10 + $0xb1] ss:$2 sm:$0xff]  ;;  %v3954_v26 = vpack.c.bf16 %v3948_v55, %v8581_v42 }
 0x42c   : > { %3769 = vst.msk [vmem:[#allocation10 + $0xc0] sm:$0xff] %vm377_vm13, %v3737_v27  ;;  %v3738_v2 = vmax.f32 %v3686_v15, 0.0  ;;  %v3853_v48 = vadd.f32 %v3835_v50, %v3819_v43  ;;  %v3787_v39 = vld [vmem:[#allocation10 + $0xa0] ss:$2 sm:$0xff]  ;;  %v3803_v52 = vld [vmem:[#allocation10 + $0xa1] ss:$2 sm:$0xff]  ;;  %v3986_v6 = vpack.c.bf16 %v3901_v41, %v8579_v32  ;;  %v3546_v21 = vadd.f32 %v6265_v10, %v3385_v46 }
 0x42d   : > { %3877 = vst.msk [vmem:[#allocation4 + $0x51] sm:$0xff] %vm377_vm13, %v3868_v63  ;;  %3772 = vst.msk [vmem:[#allocation10 + $0xd8] sm:$0xff] %vm377_vm13, %v3740_v13  ;;  %v6267_v45 = vpop.f32.mrb[95].mxu0  ;;  %v3845_v29 = vadd.f32 %v3803_v52, %v3787_v39  ;;  %v6629_v20 = vpop.f32.mrb[92].mxu1  ;;  %3963 = vrot.lane.b32.xlu0 %v3954_v26, %s6942_s24  ;;  %v8635_v57 = vld [vmem:[#allocation4 + $0x42] sm:$0xff] }
 0x42e   : > { %3770 = vst.msk [vmem:[#allocation10 + $0xc8] sm:$0xff] %vm377_vm13, %v3738_v2  ;;  %v6268_v24 = vadd.f32 %v6267_v45, %v6266_v49  ;;  %v3698_v0 = vpop.f32.mrb[93].mxu1  ;;  %3990 = vst.msk [vmem:[#allocation8 + $0x38] sm:$0xff] %vm377_vm13, %v3986_v6  ;;  %v3707_v23 = vadd.f32 %v6629_v20, %v3546_v21  ;;  %v6794_v45 = vld [vmem:[%s9124_s5 + $0xf8] sm:$0xff]   ;;  %v4002_v20 = vpack.c.bf16 %v8635_v57, %v8583_v35 }
 0x42f   : > { %v3861_v38 = vadd.f32 %v3853_v48, %v3845_v29  ;;  %v3699_v31 = vadd.f32 %v3698_v0, %v3538_v36  ;;  %v6630_v53 = vpop.f32.mrb[94].mxu1  ;;  %v6795_v6 = vld [vmem:[%s9124_s5 + $0xb8] sm:$0xff]   ;;  %v4033_v29 = vld [vmem:[#allocation4 + $0x90] sm:$0xff] }
 0x430   : > { %v3549_v42 = vadd.f32 %v6268_v24, %v3388_v59  ;;  %v3701_v32 = vpop.f32.mrb[95].mxu1  ;;  %v3743_v30 = vmax.f32 %v3707_v23, 0.0  ;;  %v4001_v59 = vpack.c.bf16 %v8574_v47, %v8523_v11  ;;  %v4081_v24 = vld [vmem:[#allocation4 + $0x92] sm:$0xff] }
 0x431   : > { %v3869_v54 = vmul.f32 0.25, %v3861_v38  ;;  %v3741_v17 = vmax.f32 %v3699_v31, 0.0  ;;  %v3702_v56 = vadd.f32 %v3701_v32, %v3541_v3  ;;  %v4049_v35 = vld [vmem:[#allocation4 + $0x91] sm:$0xff] }
 0x432   : > { %v3710_v51 = vadd.f32 %v6630_v53, %v3549_v42  ;;  %3775 = vst.msk [vmem:[#allocation10 + $0xf0] sm:$0xff] %vm377_vm13, %v3743_v30  ;;  %v6790_v30 = vld [vmem:[%s9124_s5 + $0x108] sm:$0xff]  }
 0x433   : > { %3878 = vst.msk [vmem:[#allocation4 + $0x61] sm:$0xff] %vm377_vm13, %v3869_v54  ;;  %3773 = vst.msk [vmem:[#allocation10 + $0xe0] sm:$0xff] %vm377_vm13, %v3741_v17  ;;  %v3742_v25 = vmax.f32 %v3702_v56, 0.0  ;;  %v6796_v56 = vld [vmem:[%s9124_s5 + $0x118] sm:$0xff]  }
 0x434   : > { %v3902_v18 = vld [vmem:[#allocation4 + $0x51] sm:$0xff]  ;;  %v3744_v62 = vmax.f32 %v3710_v51, 0.0 }
 0x435   : > { %v3949_v14 = vld [vmem:[#allocation4 + $0x50] sm:$0xff]  ;;  %v8643_v7 = vpack.c.bf16 %v3902_v18, %v3901_v41  ;;  %v3789_v40 = vld [vmem:[#allocation10 + $0xc0] ss:$2 sm:$0xff]  ;;  %v3805_v16 = vld [vmem:[#allocation10 + $0xc1] ss:$2 sm:$0xff]  ;;  %3774 = vst.msk [vmem:[#allocation10 + $0xe8] sm:$0xff] %vm377_vm13, %v3742_v25 }
 0x436   : > { %v8637_v19 = vld [vmem:[#allocation4 + $0x52] sm:$0xff]  ;;  %v3891_v36 = vpack.c.bf16 %v3949_v14, %v3948_v55  ;;  %v3846_v3 = vadd.f32 %v3805_v16, %v3789_v40  ;;  %3776 = vst.msk [vmem:[#allocation10 + $0xf8] sm:$0xff] %vm377_vm13, %v3744_v62 }
 0x437   : > { %v3821_v60 = vld [vmem:[#allocation10 + $0xd0] ss:$2 sm:$0xff]  ;;  %v3837_v5 = vld [vmem:[#allocation10 + $0xd1] ss:$2 sm:$0xff]  ;;  %v3939_v4 = vpack.c.bf16 %v8637_v19, %v8635_v57  ;;  %3917 = vrot.lane.b32.xlu1 %v8643_v7, %s6942_s24 }
 0x438   : > { %v3854_v22 = vadd.f32 %v3837_v5, %v3821_v60  ;;  %3895 = vst.msk [vmem:[#allocation8 + $0x50] sm:$0xff] %vm377_vm13, %v3891_v36  ;;  %4039 = vst.msk [vmem:[#allocation8 + $0x40] sm:$0xff] %vm377_vm13, %v3891_v36  ;;  %v6792_v41 = vld [vmem:[%s9124_s5 + $0xb0] sm:$0xff]  }
 0x439   : > { %3943 = vst.msk [vmem:[#allocation8 + $0x58] sm:$0xff] %vm377_vm13, %v3939_v4  ;;  %4087 = vst.msk [vmem:[#allocation8 + $0x48] sm:$0xff] %vm377_vm13, %v3939_v4  ;;  %6342 = vmatpush3.bf16.msra.mxu1 %v6792_v41  ;;  %v6793_v51 = vld [vmem:[%s9124_s5 + $0x110] sm:$0xff]  }
 0x43a   : > { %v3862_v58 = vadd.f32 %v3854_v22, %v3846_v3  ;;  %v3950_v12 = vld [vmem:[#allocation4 + $0x60] sm:$0xff]  ;;  %6343 = vmatprep.subr.bf16.mxu1 %v6794_v45  ;;  %v6805_v45 = vld [vmem:[%s9126_s7 + $0x88] sm:$0xff]  }
 0x43b   : > { %v3903_v63 = vld [vmem:[#allocation4 + $0x61] sm:$0xff]  ;;  %v3955_v27 = vpack.c.bf16 %v3950_v12, %v3949_v14 }
 0x43c   : > { %v3870_v34 = vmul.f32 0.25, %v3862_v58  ;;  %v3987_v15 = vpack.c.bf16 %v3903_v63, %v3902_v18  ;;  %v3791_v9 = vld [vmem:[#allocation10 + $0xe0] ss:$2 sm:$0xff]  ;;  %v3807_v55 = vld [vmem:[#allocation10 + $0xe1] ss:$2 sm:$0xff] }
 0x43d   : > { %v3823_v8 = vld [vmem:[#allocation10 + $0xf0] ss:$2 sm:$0xff]  ;;  %v3839_v61 = vld [vmem:[#allocation10 + $0xf1] ss:$2 sm:$0xff]  ;;  %3965 = vrot.lane.b32.xlu0 %v3955_v27, %s6942_s24  ;;  %v3847_v46 = vadd.f32 %v3807_v55, %v3791_v9  ;;  %v3998_v50 = vld [vmem:[#allocation4 + $0x62] sm:$0xff]  ;;  %6344 = vmatpush3.bf16.msra.mxu1 %v6795_v6 }
 0x43e   : > { %3879 = vst.msk [vmem:[#allocation4 + $0x71] sm:$0xff] %vm377_vm13, %v3870_v34  ;;  %v3855_v13 = vadd.f32 %v3839_v61, %v3823_v8  ;;  %3991 = vst.msk [vmem:[#allocation8 + $0x60] sm:$0xff] %vm377_vm13, %v3987_v15  ;;  %v4003_v11 = vpack.c.bf16 %v3998_v50, %v8637_v19  ;;  %v4094_v34 = vld [vmem:[#allocation8 + $0x20] sm:$0xff]  ;;  %v6806_v6 = vld [vmem:[%s9126_s7 + $0x10] sm:$0xff]  }
 0x440   : > { %v3863_v43 = vadd.f32 %v3855_v13, %v3847_v46  ;;  %v4099_v61 = vld [vmem:[#allocation8 + $0x48] sm:$0xff] }
 0x442   : > { %v3871_v2 = vmul.f32 0.25, %v3863_v43 }
 0x444   : > { %3880 = vst.msk [vmem:[#allocation4 + $0x81] sm:$0xff] %vm377_vm13, %v3871_v2  ;;  %v6798_v2 = vld [vmem:[%s9126_s7] sm:$0xff]  }
 0x445   : > { %v3904_v10 = vld [vmem:[#allocation4 + $0x71] sm:$0xff] }
 0x446   : > { %v3951_v49 = vld [vmem:[#allocation4 + $0x70] sm:$0xff]  ;;  %v3908_v48 = vpack.c.bf16 %v3904_v10, %v3903_v63 }
 0x447   : > { %v3999_v26 = vld [vmem:[#allocation4 + $0x72] sm:$0xff]  ;;  %v3892_v39 = vpack.c.bf16 %v3951_v49, %v3950_v12 }
 0x448   : > { %v3940_v52 = vpack.c.bf16 %v3999_v26, %v3998_v50  ;;  %3919 = vrot.lane.b32.xlu1 %v3908_v48, %s6942_s24  ;;  %v6797_v50 = vld [vmem:[%s9126_s7 + $0x40] sm:$0xff]  }
 0x449   : > { %3896 = vst.msk [vmem:[#allocation8 + $0x78] sm:$0xff] %vm377_vm13, %v3892_v39  ;;  %4040 = vst.msk [vmem:[#allocation8 + $0x68] sm:$0xff] %vm377_vm13, %v3892_v39  ;;  %6377 = vmatprep.subr.bf16.mxu1 %v6797_v50  ;;  %v6802_v39 = vld [vmem:[%s9126_s7 + $0x8] sm:$0xff]  }
 0x44a   : > { %3944 = vst.msk [vmem:[#allocation8 + $0x80] sm:$0xff] %vm377_vm13, %v3940_v52  ;;  %4088 = vst.msk [vmem:[#allocation8 + $0x70] sm:$0xff] %vm377_vm13, %v3940_v52  ;;  %v6804_v52 = vld [vmem:[%s9126_s7 + $0x50] sm:$0xff]  }
 0x44b   : > { %v3952_v21 = vld [vmem:[#allocation4 + $0x80] sm:$0xff] }
 0x44c   : > { %4009 = vrot.lane.b32.xlu1 %v4001_v59, %s6942_s24  ;;  %v4000_v0 = vld [vmem:[#allocation4 + $0x82] sm:$0xff]  ;;  %v3956_v23 = vpack.c.bf16 %v3952_v21, %v3951_v49  ;;  %v4037_v42 = vpack.c.bf16 %v4033_v29, %v3952_v21  ;;  %v6807_v59 = vld [vmem:[%s9126_s7 + $0xd0] sm:$0xff]   ;;  %v6808_v29 = vld [vmem:[%s9126_s7 + $0x58] sm:$0xff]  }
 0x44d   : > { %v4048_v38 = vld [vmem:[#allocation4 + $0x81] sm:$0xff]  ;;  %v4085_v53 = vpack.c.bf16 %v4081_v24, %v4000_v0  ;;  %v4004_v47 = vpack.c.bf16 %v4000_v0, %v3999_v26  ;;  %v6809_v24 = vld [vmem:[%s9126_s7 + $0x90] sm:$0xff]   ;;  %v6810_v21 = vld [vmem:[%s9126_s7 + $0x18] sm:$0xff]  }
 0x44e   : > { %v3988_v31 = vpack.c.bf16 %v4048_v38, %v3904_v10  ;;  %3967 = vrot.lane.b32.xlu0 %v3956_v23, %s6942_s24  ;;  %4041 = vst.msk [vmem:[#allocation8 + $0x90] sm:$0xff] %vm377_vm13, %v4037_v42  ;;  %v4053_v32 = vpack.c.bf16 %v4049_v35, %v4048_v38  ;;  %v6799_v10 = vld [vmem:[%s9126_s7 + $0xc0] sm:$0xff]   ;;  %v6800_v49 = vld [vmem:[%s9126_s7 + $0x48] sm:$0xff]   ;;  %v6813_v38 = vld [vmem:[%s9126_s7 + $0x98] sm:$0xff]  }
 0x44f   : > { %4089 = vst.msk [vmem:[#allocation8 + $0x98] sm:$0xff] %vm377_vm13, %v4085_v53  ;;  %v6801_v26 = vld [vmem:[%s9126_s7 + $0x80] sm:$0xff]   ;;  %v6816_v42 = vld [vmem:[%s9126_s7 + $0x68] sm:$0xff]   ;;  %v6820_v35 = vld [vmem:[%s9126_s7 + $0x70] sm:$0xff]  }
 0x450   : > { %4011 = vrot.lane.b32.xlu1 %v4002_v20, %s6942_s24  ;;  %3992 = vst.msk [vmem:[#allocation8 + $0x88] sm:$0xff] %vm377_vm13, %v3988_v31  ;;  %v6811_v20 = vld [vmem:[%s9126_s7 + $0xd8] sm:$0xff]   ;;  %v6812_v0 = vld [vmem:[%s9126_s7 + $0x60] sm:$0xff]  }
 0x451   : > { %v4104_v44 = vld [vmem:[#allocation8 + $0x70] sm:$0xff]  ;;  %v6814_v23 = vld [vmem:[%s9126_s7 + $0x20] sm:$0xff]  }
 0x452   : > { %4058 = vrot.lane.b32.xlu0 %v8588_v1, %s6942_s24  ;;  %v6815_v31 = vld [vmem:[%s9126_s7 + $0xe0] sm:$0xff]  }
 0x453   : > { %v6817_v53 = vld [vmem:[%s9126_s7 + $0xa0] sm:$0xff]  }
 0x454   : > { %4013 = vrot.lane.b32.xlu1 %v4003_v11, %s6942_s24  ;;  %v6818_v11 = vld [vmem:[%s9126_s7 + $0x28] sm:$0xff]  }
 0x456   : > { %4060 = vrot.lane.b32.xlu0 %v8643_v7, %s6942_s24  ;;  %v4109_v55 = vld [vmem:[#allocation8 + $0x98] sm:$0xff] }
 0x458   : > { %4015 = vrot.lane.b32.xlu1 %v4004_v47, %s6942_s24  ;;  %v6819_v47 = vld [vmem:[%s9126_s7 + $0xe8] sm:$0xff]  }
 0x45a   : > { %4062 = vrot.lane.b32.xlu0 %v3908_v48, %s6942_s24  ;;  %v6803_v48 = vld [vmem:[%s9126_s7 + $0xc8] sm:$0xff]  }
 0x45e   : > { %4064 = vrot.lane.b32.xlu0 %v4053_v32, %s6942_s24  ;;  %v6821_v32 = vld [vmem:[%s9126_s7 + $0xa8] sm:$0xff]  }
 0x486   : > { %v3914_v28 = vpop.permute.xlu1 %3913 }
 0x487   : > { %3925 = vst.msk [vmem:[#allocation8] sm:$0xff] %vm2149_vm0, %v3914_v28  ;;  %v6822_v28 = vld [vmem:[%s9126_s7 + $0x30] sm:$0xff]  }
 0x48e   : > { %v3962_v33 = vpop.permute.xlu0 %3961  ;;  %v4090_v17 = vld [vmem:[#allocation8] sm:$0xff] }
 0x48f   : > { %3973 = vst.msk [vmem:[#allocation8 + $0x8] sm:$0xff] %vm2149_vm0, %v3962_v33  ;;  %v6823_v33 = vld [vmem:[%s9126_s7 + $0xf0] sm:$0xff]  }
 0x496   : > { %v4091_v1 = vld [vmem:[#allocation8 + $0x8] sm:$0xff] }
 0x497   : > { %4449 = vmatprep.mubr.bf16.mxu0 %v4091_v1  ;;  %v6825_v1 = vld [vmem:[%s9126_s7 + $0xb0] sm:$0xff]  }
 0x498   : > { %v3916_v54 = vpop.permute.xlu1 %3915  ;;  %4450 = vmatmul.mubr.bf16.vlgmr.msra.gmra.mrb[96].mxu0 %v4090_v17  ;;  %v6827_v17 = vld [vmem:[%s9126_s7 + $0xf8] sm:$0xff]  }
 0x499   : > { %3926 = vst.msk [vmem:[#allocation8 + $0x28] sm:$0xff] %vm2149_vm0, %v3916_v54  ;;  %6632 = vmatpush3.bf16.msra.mxu0 %v8627_v37  ;;  %v6824_v54 = vld [vmem:[%s9126_s7 + $0x78] sm:$0xff]  }
 0x49a   : > { %6633 = vmatprep.subr.bf16.mxu0 %v6790_v30 }
 0x49d   : > { %6634 = vmatpush3.bf16.msra.mxu0 %v6790_v30  ;;  %v6826_v30 = vld [vmem:[%s9126_s7 + $0x38] sm:$0xff]  }
 0x49e   : > { %6635 = vmatprep.subr.bf16.mxu0 %v6793_v51 }
 0x49f   : > { %v3964_v57 = vpop.permute.xlu0 %3963 }
 0x4a0   : > { %3974 = vst.msk [vmem:[#allocation8 + $0x30] sm:$0xff] %vm2149_vm0, %v3964_v57  ;;  %v4095_v37 = vld [vmem:[#allocation8 + $0x28] sm:$0xff]  ;;  %v6829_v57 = vld [vmem:[%s9126_s7 + $0x140] sm:$0xff]  }
 0x4a1   : > { %6636 = vmatpush3.bf16.msra.mxu0 %v6793_v51  ;;  %v6828_v51 = vld [vmem:[%s9126_s7 + $0xb8] sm:$0xff]  }
 0x4a2   : > { %6637 = vmatprep.subr.bf16.mxu0 %v6796_v56 }
 0x4a5   : > { %6638 = vmatpush3.bf16.msra.mxu0 %v6796_v56  ;;  %v6831_v56 = vld [vmem:[%s9126_s7 + $0x1c0] sm:$0xff]  }
 0x4a6   : > { %6417 = vmatprep.subr.bf16.mxu0 %v6799_v10 }
 0x4a7   : > { %v4096_v14 = vld [vmem:[#allocation8 + $0x30] sm:$0xff] }
 0x4a8   : > { %4457 = vmatprep.mubr.bf16.mxu0 %v4096_v14 }
 0x4a9   : > { %v3918_v18 = vpop.permute.xlu1 %3917  ;;  %4458 = vmatmul.mubr.bf16.gmra.mrb[100].mxu0 %v4095_v37 }
 0x4aa   : > { %3927 = vst.msk [vmem:[#allocation8 + $0x50] sm:$0xff] %vm2149_vm0, %v3918_v18 }
 0x4af   : > { %v3966_v19 = vpop.permute.xlu0 %3965 }
 0x4b0   : > { %3975 = vst.msk [vmem:[#allocation8 + $0x58] sm:$0xff] %vm2149_vm0, %v3966_v19 }
 0x4b1   : > { %v4100_v62 = vld [vmem:[#allocation8 + $0x50] sm:$0xff] }
 0x4b7   : > { %v4101_v5 = vld [vmem:[#allocation8 + $0x58] sm:$0xff] }
 0x4b8   : > { %4465 = vmatprep.mubr.bf16.mxu0 %v4101_v5 }
 0x4b9   : > { %4466 = vmatmul.mubr.bf16.gmra.mrb[104].mxu0 %v4100_v62 }
 0x4ba   : > { %v3920_v60 = vpop.permute.xlu1 %3919 }
 0x4bb   : > { %3928 = vst.msk [vmem:[#allocation8 + $0x78] sm:$0xff] %vm2149_vm0, %v3920_v60 }
 0x4be   : > { %v4010_v7 = vpop.permute.xlu1 %4009 }
 0x4bf   : > { %4021 = vst.msk [vmem:[#allocation8 + $0x10] sm:$0xff] %vm2149_vm0, %v4010_v7 }
 0x4c0   : > { %v3968_v4 = vpop.permute.xlu0 %3967 }
 0x4c1   : > { %3976 = vst.msk [vmem:[#allocation8 + $0x80] sm:$0xff] %vm2149_vm0, %v3968_v4 }
 0x4c2   : > { %v4012_v36 = vpop.permute.xlu1 %4011  ;;  %v4105_v58 = vld [vmem:[#allocation8 + $0x78] sm:$0xff] }
 0x4c3   : > { %4022 = vst.msk [vmem:[#allocation8 + $0x38] sm:$0xff] %vm2149_vm0, %v4012_v36 }
 0x4c4   : > { %v4059_v40 = vpop.permute.xlu0 %4058 }
 0x4c5   : > { %4070 = vst.msk [vmem:[#allocation8 + $0x18] sm:$0xff] %vm2149_vm0, %v4059_v40 }
 0x4c6   : > { %v4014_v22 = vpop.permute.xlu1 %4013  ;;  %v4092_v27 = vld [vmem:[#allocation8 + $0x10] sm:$0xff] }
 0x4c7   : > { %4023 = vst.msk [vmem:[#allocation8 + $0x60] sm:$0xff] %vm2149_vm0, %v4014_v22 }
 0x4c8   : > { %v4061_v25 = vpop.permute.xlu0 %4060  ;;  %v4106_v3 = vld [vmem:[#allocation8 + $0x80] sm:$0xff] }
 0x4c9   : > { %4071 = vst.msk [vmem:[#allocation8 + $0x40] sm:$0xff] %vm2149_vm0, %v4061_v25  ;;  %4473 = vmatprep.mubr.bf16.mxu0 %v4106_v3 }
 0x4ca   : > { %v4016_v16 = vpop.permute.xlu1 %4015  ;;  %4474 = vmatmul.mubr.bf16.gmra.mrb[108].mxu0 %v4105_v58  ;;  %v4097_v13 = vld [vmem:[#allocation8 + $0x38] sm:$0xff] }
 0x4cb   : > { %4024 = vst.msk [vmem:[#allocation8 + $0x88] sm:$0xff] %vm2149_vm0, %v4016_v16  ;;  %6639 = vmatprep.mubr.msk.bf16.mxu0 %vm377_vm13, %v4094_v34 }
 0x4cc   : > { %v4063_v12 = vpop.permute.xlu0 %4062  ;;  %v4093_v63 = vld [vmem:[#allocation8 + $0x18] sm:$0xff] }
 0x4cd   : > { %4072 = vst.msk [vmem:[#allocation8 + $0x68] sm:$0xff] %vm2149_vm0, %v4063_v12  ;;  %4514 = vmatprep.mubr.bf16.mxu1 %v4093_v63 }
 0x4ce   : > { %4515 = vmatmul.mubr.bf16.vlgmr.msra.gmra.mrb[96].mxu1 %v4092_v27  ;;  %v4102_v41 = vld [vmem:[#allocation8 + $0x60] sm:$0xff] }
 0x4cf   : > { %6378 = vmatpush3.bf16.msra.mxu1 %v6798_v2 }
 0x4d0   : > { %v4065_v15 = vpop.permute.xlu0 %4064  ;;  %v4098_v8 = vld [vmem:[#allocation8 + $0x40] sm:$0xff]  ;;  %6379 = vmatprep.subr.bf16.mxu1 %v6800_v49 }
 0x4d1   : > { %4073 = vst.msk [vmem:[#allocation8 + $0x90] sm:$0xff] %vm2149_vm0, %v4065_v15  ;;  %4522 = vmatprep.mubr.bf16.mxu1 %v4098_v8 }
 0x4d2   : > { %6640 = vmatmul.mubr.msk.bf16.vlgmr.msra.gmra.mrb[112].mxu0 %vm377_vm13, %v4099_v61  ;;  %v4107_v43 = vld [vmem:[#allocation8 + $0x88] sm:$0xff]  ;;  %v8834_v61 = vld [vmem:[%s9125_s6] ss:$0 sm:$0xff] }
 0x4d3   : > { %6643 = vmatprep.mubr.msk.bf16.mxu0 %vm377_vm13, %v4104_v44  ;;  %6418 = vmatpush3.bf16.msra.mxu0 %v6801_v26 }
 0x4d4   : > { %v4103_v9 = vld [vmem:[#allocation8 + $0x68] sm:$0xff]  ;;  %6419 = vmatprep.subr.bf16.mxu0 %v6803_v48  ;;  %6380 = vmatpush3.bf16.msra.mxu1 %v6802_v39 }
 0x4d5   : > { %6381 = vmatprep.subr.bf16.mxu1 %v6804_v52 }
 0x4d6   : > { %4523 = vmatmul.mubr.bf16.gmra.mrb[100].mxu1 %v4097_v13 }
 0x4d7   : > { %4530 = vmatprep.mubr.bf16.mxu1 %v4103_v9  ;;  %6420 = vmatpush3.bf16.msra.mxu0 %v6805_v45 }
 0x4d8   : > { %v4108_v46 = vld [vmem:[#allocation8 + $0x90] sm:$0xff]  ;;  %6382 = vmatpush3.bf16.msra.mxu1 %v6806_v6  ;;  %6421 = vmatprep.subr.bf16.mxu0 %v6807_v59  ;;  %v4645_v59 = vld [vmem:[#allocation5 + $0x1] sm:$0xff] }
 0x4d9   : > { %6383 = vmatprep.subr.bf16.mxu1 %v6808_v29 }
 0x4da   : > { %6644 = vmatmul.mubr.msk.bf16.gmra.mrb[116].mxu0 %vm377_vm13, %v4109_v55 }
 0x4db   : > { %6422 = vmatpush3.bf16.msra.mxu0 %v6809_v24 }
 0x4dc   : > { %6384 = vmatpush3.bf16.msra.mxu1 %v6810_v21  ;;  %6423 = vmatprep.subr.bf16.mxu0 %v6811_v20 }
 0x4dd   : > { %6385 = vmatprep.subr.bf16.mxu1 %v6812_v0 }
 0x4de   : > { %4531 = vmatmul.mubr.bf16.gmra.mrb[104].mxu1 %v4102_v41 }
 0x4df   : > { %4538 = vmatprep.mubr.bf16.mxu1 %v4108_v46  ;;  %6424 = vmatpush3.bf16.msra.mxu0 %v6813_v38 }
 0x4e0   : > { %6386 = vmatpush3.bf16.msra.mxu1 %v6814_v23  ;;  %6425 = vmatprep.subr.bf16.mxu0 %v6815_v31 }
 0x4e1   : > { %6387 = vmatprep.subr.bf16.mxu1 %v6816_v42 }
 0x4e3   : > { %6426 = vmatpush3.bf16.msra.mxu0 %v6817_v53 }
 0x4e4   : > { %6388 = vmatpush3.bf16.msra.mxu1 %v6818_v11  ;;  %6427 = vmatprep.subr.bf16.mxu0 %v6819_v47 }
 0x4e5   : > { %6389 = vmatprep.subr.bf16.mxu1 %v6820_v35 }
 0x4e6   : > { %4539 = vmatmul.mubr.bf16.gmra.mrb[108].mxu1 %v4107_v43 }
 0x4e7   : > { %6428 = vmatpush3.bf16.msra.mxu0 %v6821_v32 }
 0x4e8   : > { %6390 = vmatpush3.bf16.msra.mxu1 %v6822_v28  ;;  %6429 = vmatprep.subr.bf16.mxu0 %v6823_v33 }
 0x4e9   : > { %6391 = vmatprep.subr.bf16.mxu1 %v6824_v54 }
 0x4eb   : > { %6430 = vmatpush3.bf16.msra.mxu0 %v6825_v1 }
 0x4ec   : > { %6392 = vmatpush3.bf16.msra.mxu1 %v6826_v30  ;;  %6431 = vmatprep.subr.bf16.mxu0 %v6827_v17 }
 0x4ed   : > { %6457 = vmatprep.subr.bf16.mxu1 %v6829_v57 }
 0x4ef   : > { %6432 = vmatpush3.bf16.msra.mxu0 %v6828_v51  ;;  %v4629_v51 = vld [vmem:[#allocation5] sm:$0xff] }
 0x4f0   : > { %6497 = vmatprep.subr.bf16.mxu0 %v6831_v56 }
 0x56b   : > { %v6305_v18 = vpop.f32.mrb[96].mxu0 }
 0x56c   : > { %v6306_v14 = vpop.f32.mrb[97].mxu0 }
 0x56d   : > { %v6307_v37 = vadd.f32 %v6306_v14, %v6305_v18  ;;  %v6308_v19 = vpop.f32.mrb[98].mxu0 }
 0x56e   : > { %v6309_v60 = vpop.f32.mrb[99].mxu0 }
 0x56f   : > { %v6310_v5 = vadd.f32 %v6309_v60, %v6308_v19  ;;  %v4452_v41 = vadd.f32 %v6307_v37, %v8834_v61  ;;  %v6830_v19 = vld [vmem:[%s9126_s7 + $0x100] sm:$0xff]  }
 0x571   : > { %v4455_v2 = vadd.f32 %v6310_v5, %v8834_v61 }
 0x57c   : > { %v6311_v62 = vpop.f32.mrb[100].mxu0 }
 0x57d   : > { %v6312_v7 = vpop.f32.mrb[101].mxu0 }
 0x57e   : > { %v6313_v36 = vadd.f32 %v6312_v7, %v6311_v62  ;;  %v6314_v4 = vpop.f32.mrb[102].mxu0 }
 0x57f   : > { %v6315_v22 = vpop.f32.mrb[103].mxu0 }
 0x580   : > { %v6316_v40 = vadd.f32 %v6315_v22, %v6314_v4  ;;  %v4460_v0 = vadd.f32 %v6313_v36, %v8834_v61  ;;  %v4661_v4 = vld [vmem:[#allocation5 + $0x2] sm:$0xff] }
 0x582   : > { %v4463_v11 = vadd.f32 %v6316_v40, %v8834_v61  ;;  %v6832_v40 = vld [vmem:[%s9126_s7 + $0x148] sm:$0xff]  }
 0x58c   : > { %v6317_v16 = vpop.f32.mrb[104].mxu0 }
 0x58d   : > { %v6318_v25 = vpop.f32.mrb[105].mxu0 }
 0x58e   : > { %v6319_v3 = vadd.f32 %v6318_v25, %v6317_v16  ;;  %v6320_v58 = vpop.f32.mrb[106].mxu0 }
 0x58f   : > { %v6321_v34 = vpop.f32.mrb[107].mxu0 }
 0x590   : > { %v8827_v12 = vadd.f32 %v6321_v34, %v6320_v58  ;;  %v4468_v60 = vadd.f32 %v6319_v3, %v8834_v61 }
 0x592   : > { %v4471_v3 = vadd.f32 %v8827_v12, %v8834_v61  ;;  %v6835_v12 = vld [vmem:[%s9126_s7 + $0x1c8] sm:$0xff]  }
 0x59d   : > { %v6323_v63 = vpop.f32.mrb[108].mxu0 }
 0x59e   : > { %v6324_v27 = vpop.f32.mrb[109].mxu0 }
 0x59f   : > { %v8829_v15 = vadd.f32 %v6324_v27, %v6323_v63  ;;  %v6326_v8 = vpop.f32.mrb[110].mxu0 }
 0x5a0   : > { %v6327_v44 = vpop.f32.mrb[111].mxu0 }
 0x5a1   : > { %v8836_v13 = vadd.f32 %v6327_v44, %v6326_v8  ;;  %v6345_v9 = vpop.f32.mrb[96].mxu1  ;;  %v6833_v8 = vld [vmem:[%s9126_s7 + $0x180] sm:$0xff]  }
 0x5a2   : > { %v6346_v55 = vpop.f32.mrb[97].mxu1 }
 0x5a3   : > { %v6347_v46 = vadd.f32 %v6346_v55, %v6345_v9  ;;  %v6348_v43 = vpop.f32.mrb[98].mxu1  ;;  %v6834_v9 = vld [vmem:[%s9126_s7 + $0x108] sm:$0xff]  }
 0x5a4   : > { %v6349_v50 = vpop.f32.mrb[99].mxu1 }
 0x5a5   : > { %v6350_v10 = vadd.f32 %v6349_v50, %v6348_v43  ;;  %v6641_v49 = vpop.f32.mrb[112].mxu0  ;;  %v4517_v26 = vadd.f32 %v6347_v46, %v4452_v41  ;;  %v6836_v43 = vld [vmem:[%s9126_s7 + $0x150] sm:$0xff]  }
 0x5a6   : > { %v4581_v48 = vpop.f32.mrb[113].mxu0 }
 0x5a7   : > { %v4582_v39 = vadd.f32 %v4581_v48, %v4517_v26  ;;  %v6642_v52 = vpop.f32.mrb[114].mxu0  ;;  %v4520_v45 = vadd.f32 %v6350_v10, %v4455_v2 }
 0x5a8   : > { %v4584_v6 = vpop.f32.mrb[115].mxu0 }
 0x5a9   : > { %v8840_v29 = vmax.f32 %v4582_v39, 0.0  ;;  %v4585_v24 = vadd.f32 %v4584_v6, %v4520_v45  ;;  %v6351_v21 = vpop.f32.mrb[100].mxu1  ;;  %v6838_v39 = vld [vmem:[%s9126_s7 + $0x110] sm:$0xff]   ;;  %v4476_v45 = vadd.f32 %v8829_v15, %v8834_v61 }
 0x5aa   : > { %v6352_v20 = vpop.f32.mrb[101].mxu1 }
 0x5ab   : > { %4621 = vst [vmem:[#allocation5 + $0x11] sm:$0xff] %v8840_v29  ;;  %v8844_v38 = vmax.f32 %v4585_v24, 0.0  ;;  %v6353_v23 = vadd.f32 %v6352_v20, %v6351_v21  ;;  %v6354_v31 = vpop.f32.mrb[102].mxu1  ;;  %v4653_v42 = vpack.c.bf16 %v8840_v29, %v4645_v59 }
 0x5ac   : > { %v6355_v53 = vpop.f32.mrb[103].mxu1 }
 0x5ad   : > { %4622 = vst [vmem:[#allocation5 + $0x21] sm:$0xff] %v8844_v38  ;;  %v4525_v47 = vadd.f32 %v6353_v23, %v4460_v0  ;;  %v6356_v35 = vadd.f32 %v6355_v53, %v6354_v31  ;;  %v8849_v32 = vpop.f32.mrb[116].mxu0  ;;  %5425 = vmatprep.mubr.bf16.mxu1 %v4653_v42  ;;  %v4701_v28 = vpack.c.bf16 %v8844_v38, %v8840_v29  ;;  %v6840_v0 = vld [vmem:[%s9126_s7 + $0x158] sm:$0xff]  }
 0x5ae   : > { %v4597_v33 = vpop.f32.mrb[117].mxu0  ;;  %v4479_v23 = vadd.f32 %v8836_v13, %v8834_v61  ;;  %v6841_v61 = vld [vmem:[%s9126_s7 + $0x190] sm:$0xff]  }
 0x5af   : > { %v4590_v54 = vadd.f32 %v6641_v49, %v4525_v47  ;;  %v4528_v1 = vadd.f32 %v6356_v35, %v4463_v11  ;;  %v8853_v30 = vpop.f32.mrb[118].mxu0  ;;  %v6837_v49 = vld [vmem:[%s9126_s7 + $0x188] sm:$0xff]  }
 0x5b0   : > { %v4600_v17 = vpop.f32.mrb[119].mxu0 }
 0x5b1   : > { %v8855_v57 = vmax.f32 %v4590_v54, 0.0  ;;  %v4593_v56 = vadd.f32 %v6642_v52, %v4528_v1  ;;  %v6357_v18 = vpop.f32.mrb[104].mxu1  ;;  %v6839_v52 = vld [vmem:[%s9126_s7 + $0x1d0] sm:$0xff]   ;;  %v6843_v54 = vld [vmem:[%s9126_s7 + $0x1d8] sm:$0xff]  }
 0x5b2   : > { %v6358_v14 = vpop.f32.mrb[105].mxu1  ;;  %v4630_v37 = vld [vmem:[#allocation5 + $0x10] sm:$0xff] }
 0x5b3   : > { %4623 = vst [vmem:[#allocation5 + $0x31] sm:$0xff] %v8855_v57  ;;  %v8862_v5 = vmax.f32 %v4593_v56, 0.0  ;;  %v6359_v62 = vadd.f32 %v6358_v14, %v6357_v18  ;;  %v6360_v7 = vpop.f32.mrb[106].mxu1  ;;  %v4637_v36 = vpack.c.bf16 %v4630_v37, %v4629_v51  ;;  %v8864_v22 = vld [vmem:[#allocation5 + $0x12] sm:$0xff]  ;;  %v8871_v58 = vpack.c.bf16 %v8855_v57, %v8844_v38  ;;  %v6844_v56 = vld [vmem:[%s9126_s7 + $0x160] sm:$0xff]  }
 0x5b4   : > { %v6361_v16 = vpop.f32.mrb[107].mxu1  ;;  %v4678_v25 = vld [vmem:[#allocation5 + $0x20] sm:$0xff]  ;;  %v4669_v44 = vpack.c.bf16 %v8864_v22, %v4661_v4 }
 0x5b5   : > { %4624 = vst [vmem:[#allocation5 + $0x41] sm:$0xff] %v8862_v5  ;;  %v4533_v34 = vadd.f32 %v6359_v62, %v4468_v60  ;;  %v6362_v63 = vadd.f32 %v6361_v16, %v6360_v7  ;;  %5426 = vmatmul.mubr.bf16.vlgmr.msra.gmra.mrb[112].mxu1 %v4637_v36  ;;  %v4685_v27 = vpack.c.bf16 %v4678_v25, %v4630_v37  ;;  %v8923_v35 = vld [vmem:[#allocation5 + $0x22] sm:$0xff] }
 0x5b6   : > { %6458 = vmatpush3.bf16.msra.mxu1 %v6830_v19  ;;  %5433 = vmatprep.mubr.bf16.mxu1 %v8871_v58  ;;  %v4702_v55 = vpack.c.bf16 %v8862_v5, %v8855_v57  ;;  %v6846_v19 = vld [vmem:[%s9126_s7 + $0x120] sm:$0xff]   ;;  %v6848_v36 = vld [vmem:[%s9126_s7 + $0x168] sm:$0xff]  }
 0x5b7   : > { %v4598_v41 = vadd.f32 %v4597_v33, %v4533_v34  ;;  %v4536_v46 = vadd.f32 %v6362_v63, %v4471_v3  ;;  %5490 = vmatprep.mubr.bf16.mxu0 %v4685_v27  ;;  %6459 = vmatprep.subr.bf16.mxu1 %v6832_v40  ;;  %v6842_v33 = vld [vmem:[%s9126_s7 + $0x118] sm:$0xff]   ;;  %v6847_v60 = vld [vmem:[%s9126_s7 + $0x1e0] sm:$0xff]   ;;  %v6850_v63 = vld [vmem:[%s9126_s7 + $0x128] sm:$0xff]  }
 0x5b8   : > { %5491 = vmatmul.mubr.bf16.vlgmr.msra.gmra.mrb[120].mxu0 %v4669_v44  ;;  %v6849_v3 = vld [vmem:[%s9126_s7 + $0x1a0] sm:$0xff]   ;;  %v6851_v27 = vld [vmem:[%s9126_s7 + $0x1e8] sm:$0xff]   ;;  %v6852_v44 = vld [vmem:[%s9126_s7 + $0x170] sm:$0xff]  }
 0x5b9   : > { %v8892_v50 = vmax.f32 %v4598_v41, 0.0  ;;  %v4601_v2 = vadd.f32 %v4600_v17, %v4536_v46  ;;  %v6363_v10 = vpop.f32.mrb[108].mxu1  ;;  %6498 = vmatpush3.bf16.msra.mxu0 %v6833_v8  ;;  %v6854_v41 = vld [vmem:[%s9126_s7 + $0x130] sm:$0xff]   ;;  %v6865_v38 = vld [vmem:[%s9126_s7 + $0x220] sm:$0xff]  }
 0x5ba   : > { %v6364_v26 = vpop.f32.mrb[109].mxu1  ;;  %6460 = vmatpush3.bf16.msra.mxu1 %v6834_v9  ;;  %6499 = vmatprep.subr.bf16.mxu0 %v6835_v12  ;;  %v4632_v48 = vld [vmem:[#allocation5 + $0x30] sm:$0xff]  ;;  %v6853_v9 = vld [vmem:[%s9126_s7 + $0x1a8] sm:$0xff]  }
 0x5bb   : > { %4625 = vst [vmem:[#allocation5 + $0x51] sm:$0xff] %v8892_v50  ;;  %v8906_v6 = vmax.f32 %v4601_v2, 0.0  ;;  %v6365_v59 = vadd.f32 %v6364_v26, %v6363_v10  ;;  %v6366_v24 = vpop.f32.mrb[110].mxu1  ;;  %6461 = vmatprep.subr.bf16.mxu1 %v6836_v43  ;;  %v8908_v21 = vpack.c.bf16 %v4632_v48, %v4678_v25  ;;  %v8910_v20 = vld [vmem:[#allocation5 + $0x32] sm:$0xff]  ;;  %v8919_v42 = vpack.c.bf16 %v8892_v50, %v8862_v5 }
 0x5bc   : > { %v6367_v31 = vpop.f32.mrb[111].mxu1  ;;  %v4680_v15 = vld [vmem:[#allocation5 + $0x40] sm:$0xff]  ;;  %v8930_v13 = vpack.c.bf16 %v8910_v20, %v8923_v35  ;;  %v6855_v2 = vld [vmem:[%s9126_s7 + $0x1f0] sm:$0xff]   ;;  %v6856_v26 = vld [vmem:[%s9126_s7 + $0x178] sm:$0xff]  }
 0x5bd   : > { %4626 = vst [vmem:[#allocation5 + $0x61] sm:$0xff] %v8906_v6  ;;  %v4541_v53 = vadd.f32 %v6365_v59, %v4476_v45  ;;  %v6368_v11 = vadd.f32 %v6367_v31, %v6366_v24  ;;  %6500 = vmatpush3.bf16.msra.mxu0 %v6837_v49  ;;  %5434 = vmatmul.mubr.bf16.gmra.mrb[116].mxu1 %v8908_v21  ;;  %v4665_v25 = vld [vmem:[#allocation5 + $0x42] sm:$0xff]  ;;  %v6859_v59 = vld [vmem:[%s9126_s7 + $0x1f8] sm:$0xff]  }
 0x5be   : > { %v4686_v47 = vpack.c.bf16 %v4680_v15, %v4632_v48  ;;  %6462 = vmatpush3.bf16.msra.mxu1 %v6838_v39  ;;  %6501 = vmatprep.subr.bf16.mxu0 %v6839_v52  ;;  %v4703_v1 = vpack.c.bf16 %v8906_v6, %v8892_v50  ;;  %v4717_v49 = vpack.c.bf16 %v8923_v35, %v8864_v22  ;;  %v6857_v52 = vld [vmem:[%s9126_s7 + $0x1b0] sm:$0xff]   ;;  %v6858_v22 = vld [vmem:[%s9126_s7 + $0x138] sm:$0xff]   ;;  %v6861_v24 = vld [vmem:[%s9126_s7 + $0x200] sm:$0xff]  }
 0x5bf   : > { %v4606_v17 = vadd.f32 %v8849_v32, %v4541_v53  ;;  %v4544_v51 = vadd.f32 %v6368_v11, %v4479_v23  ;;  %6463 = vmatprep.subr.bf16.mxu1 %v6840_v0  ;;  %5441 = vmatprep.mubr.bf16.mxu1 %v8919_v42  ;;  %v6845_v32 = vld [vmem:[%s9126_s7 + $0x198] sm:$0xff]   ;;  %v6862_v23 = vld [vmem:[%s9126_s7 + $0x208] sm:$0xff]   ;;  %v4718_v31 = vpack.c.bf16 %v4665_v25, %v8910_v20  ;;  %v5947_v35 = vld [vmem:[%s9127_s8] ss:$0 sm:$0xff] }
 0x5c0   : > { %5498 = vmatprep.mubr.bf16.mxu0 %v4686_v47  ;;  %v6860_v0 = vld [vmem:[%s9126_s7 + $0x1b8] sm:$0xff]  }
 0x5c1   : > { %5499 = vmatmul.mubr.bf16.gmra.mrb[124].mxu0 %v8930_v13  ;;  %v8946_v18 = vmax.f32 %v4606_v17, 0.0  ;;  %v4609_v14 = vadd.f32 %v8853_v30, %v4544_v51  ;;  %v6864_v20 = vld [vmem:[%s9126_s7 + $0x218] sm:$0xff]  }
 0x5c2   : > { %6502 = vmatpush3.bf16.msra.mxu0 %v6841_v61  ;;  %6464 = vmatpush3.bf16.msra.mxu1 %v6842_v33  ;;  %v4634_v37 = vld [vmem:[#allocation5 + $0x50] sm:$0xff]  ;;  %v6868_v53 = vld [vmem:[%s9126_s7 + $0x238] sm:$0xff]  }
 0x5c3   : > { %6503 = vmatprep.subr.bf16.mxu0 %v6843_v54  ;;  %4627 = vst [vmem:[#allocation5 + $0x71] sm:$0xff] %v8946_v18  ;;  %v8959_v62 = vmax.f32 %v4609_v14, 0.0  ;;  %6465 = vmatprep.subr.bf16.mxu1 %v6844_v56  ;;  %v8961_v30 = vpack.c.bf16 %v4634_v37, %v4680_v15  ;;  %v8963_v7 = vld [vmem:[#allocation5 + $0x52] sm:$0xff]  ;;  %v8970_v4 = vpack.c.bf16 %v8946_v18, %v8906_v6 }
 0x5c4   : > { %v4682_v40 = vld [vmem:[#allocation5 + $0x60] sm:$0xff]  ;;  %v8978_v34 = vpack.c.bf16 %v8963_v7, %v4665_v25  ;;  %v4749_v5 = vld [vmem:[#allocation5 + $0x91] sm:$0xff] }
 0x5c5   : > { %4628 = vst [vmem:[#allocation5 + $0x81] sm:$0xff] %v8959_v62  ;;  %5442 = vmatmul.mubr.bf16.gmra.mrb[120].mxu1 %v8961_v30  ;;  %v4687_v16 = vpack.c.bf16 %v4682_v40, %v4634_v37  ;;  %v4704_v8 = vpack.c.bf16 %v8959_v62, %v8946_v18  ;;  %v4667_v39 = vld [vmem:[#allocation5 + $0x62] sm:$0xff]  ;;  %v6867_v15 = vld [vmem:[%s9126_s7 + $0x230] sm:$0xff]  }
 0x5c6   : > { %6504 = vmatpush3.bf16.msra.mxu0 %v6845_v32  ;;  %6466 = vmatpush3.bf16.msra.mxu1 %v6846_v19  ;;  %v4719_v29 = vpack.c.bf16 %v4667_v39, %v8963_v7  ;;  %v4765_v6 = vld [vmem:[#allocation5 + $0x92] sm:$0xff] }
 0x5c7   : > { %6505 = vmatprep.subr.bf16.mxu0 %v6847_v60  ;;  %5506 = vmatprep.mubr.bf16.mxu0 %v4687_v16 }
 0x5c8   : > { %6467 = vmatprep.subr.bf16.mxu1 %v6848_v36  ;;  %5449 = vmatprep.mubr.bf16.mxu1 %v8970_v4 }
 0x5c9   : > { %5507 = vmatmul.mubr.bf16.gmra.mrb[128].mxu0 %v8978_v34 }
 0x5ca   : > { %6506 = vmatpush3.bf16.msra.mxu0 %v6849_v3  ;;  %6468 = vmatpush3.bf16.msra.mxu1 %v6850_v63  ;;  %v4636_v12 = vld [vmem:[#allocation5 + $0x70] sm:$0xff] }
 0x5cb   : > { %6507 = vmatprep.subr.bf16.mxu0 %v6851_v27  ;;  %6469 = vmatprep.subr.bf16.mxu1 %v6852_v44  ;;  %v4640_v46 = vpack.c.bf16 %v4636_v12, %v4682_v40  ;;  %v4668_v43 = vld [vmem:[#allocation5 + $0x72] sm:$0xff] }
 0x5cc   : > { %v9002_v10 = vld [vmem:[#allocation5 + $0x80] sm:$0xff]  ;;  %v4672_v45 = vpack.c.bf16 %v4668_v43, %v4667_v39 }
 0x5cd   : > { %5450 = vmatmul.mubr.bf16.gmra.mrb[124].mxu1 %v4640_v46  ;;  %v4688_v48 = vpack.c.bf16 %v9002_v10, %v4636_v12 }
 0x5ce   : > { %6508 = vmatpush3.bf16.msra.mxu0 %v6853_v9  ;;  %6470 = vmatpush3.bf16.msra.mxu1 %v6854_v41 }
 0x5cf   : > { %5555 = vmatprep.mubr.bf16.mxu1 %v4717_v49  ;;  %5514 = vmatprep.mubr.bf16.mxu0 %v4688_v48 }
 0x5d0   : > { %6509 = vmatprep.subr.bf16.mxu0 %v6855_v2  ;;  %6471 = vmatprep.subr.bf16.mxu1 %v6856_v26 }
 0x5d1   : > { %5515 = vmatmul.mubr.bf16.gmra.mrb[132].mxu0 %v4672_v45 }
 0x5d2   : > { %6510 = vmatpush3.bf16.msra.mxu0 %v6857_v52  ;;  %5620 = vmatprep.mubr.bf16.mxu0 %v8871_v58  ;;  %v6863_v58 = vld [vmem:[%s9126_s7 + $0x210] sm:$0xff]  }
 0x5d3   : > { %6472 = vmatpush3.bf16.msra.mxu1 %v6858_v22  ;;  %6511 = vmatprep.subr.bf16.mxu0 %v6859_v59 }
 0x5d4   : > { %6647 = vmatprep.subr.bf16.mxu1 %v6861_v24 }
 0x5d6   : > { %6512 = vmatpush3.bf16.msra.mxu0 %v6860_v0  ;;  %5556 = vmatmul.mubr.bf16.vlgmr.msra.gmra.mrb[128].mxu1 %v4701_v28  ;;  %v4716_v28 = vld [vmem:[#allocation5 + $0x82] sm:$0xff] }
 0x5d7   : > { %6648 = vmatpush3.bf16.msra.mxu1 %v6861_v24  ;;  %5563 = vmatprep.mubr.bf16.mxu1 %v4718_v31  ;;  %v4720_v57 = vpack.c.bf16 %v4716_v28, %v4668_v43  ;;  %v4769_v11 = vpack.c.bf16 %v4765_v6, %v4716_v28 }
 0x5d8   : > { %6649 = vmatprep.subr.bf16.mxu1 %v6862_v23 }
 0x5d9   : > { %5621 = vmatmul.mubr.bf16.vlgmr.msra.gmra.mrb[136].mxu0 %v8908_v21  ;;  %v6866_v21 = vld [vmem:[%s9126_s7 + $0x228] sm:$0xff]  }
 0x5da   : > { %5628 = vmatprep.mubr.bf16.mxu0 %v8919_v42  ;;  %v4733_v42 = vld [vmem:[#allocation5 + $0x90] sm:$0xff] }
 0x5db   : > { %6650 = vmatpush3.bf16.msra.mxu1 %v6862_v23  ;;  %v4737_v50 = vpack.c.bf16 %v4733_v42, %v9002_v10 }
 0x5dc   : > { %6651 = vmatprep.subr.bf16.mxu1 %v6863_v58 }
 0x5de   : > { %5564 = vmatmul.mubr.bf16.gmra.mrb[132].mxu1 %v4702_v55  ;;  %v4753_v55 = vpack.c.bf16 %v4749_v5, %v8959_v62 }
 0x5df   : > { %6652 = vmatpush3.bf16.msra.mxu1 %v6863_v58  ;;  %5571 = vmatprep.mubr.bf16.mxu1 %v4719_v29 }
 0x5e0   : > { %6653 = vmatprep.subr.bf16.mxu1 %v6864_v20 }
 0x5e1   : > { %5629 = vmatmul.mubr.bf16.gmra.mrb[140].mxu0 %v8961_v30 }
 0x5e2   : > { %5636 = vmatprep.mubr.bf16.mxu0 %v8970_v4 }
 0x5e3   : > { %6654 = vmatpush3.bf16.msra.mxu1 %v6864_v20 }
 0x5e4   : > { %6655 = vmatprep.subr.bf16.mxu1 %v6865_v38 }
 0x5e6   : > { %5572 = vmatmul.mubr.bf16.gmra.mrb[136].mxu1 %v4703_v1 }
 0x5e7   : > { %6656 = vmatpush3.bf16.msra.mxu1 %v6865_v38  ;;  %5579 = vmatprep.mubr.bf16.mxu1 %v4720_v57 }
 0x5e8   : > { %6657 = vmatprep.subr.bf16.mxu1 %v6866_v21 }
 0x5e9   : > { %5637 = vmatmul.mubr.bf16.gmra.mrb[144].mxu0 %v4640_v46 }
 0x5ea   : > { %5644 = vmatprep.mubr.bf16.mxu0 %v4753_v55 }
 0x5eb   : > { %6658 = vmatpush3.bf16.msra.mxu1 %v6866_v21 }
 0x5ec   : > { %6659 = vmatprep.subr.bf16.mxu1 %v6867_v15 }
 0x5ee   : > { %5580 = vmatmul.mubr.bf16.gmra.mrb[140].mxu1 %v4704_v8 }
 0x5ef   : > { %6660 = vmatpush3.bf16.msra.mxu1 %v6867_v15  ;;  %6663 = vmatprep.mubr.bf16.mxu1 %v8930_v13 }
 0x5f0   : > { %6661 = vmatprep.subr.bf16.mxu1 %v6868_v53 }
 0x5f1   : > { %5645 = vmatmul.mubr.bf16.gmra.mrb[148].mxu0 %v4737_v50 }
 0x5f3   : > { %6662 = vmatpush3.bf16.msra.mxu1 %v6868_v53 }
 0x5f6   : > { %6664 = vmatmul.mubr.bf16.vlgmr.msra.gmra.mrb[144].mxu1 %v8978_v34 }
 0x5f7   : > { %6667 = vmatprep.mubr.bf16.mxu1 %v4672_v45 }
 0x5fe   : > { %6668 = vmatmul.mubr.bf16.gmra.mrb[148].mxu1 %v4769_v11 }
 0x688   : > { %v6393_v47 = vpop.f32.mrb[112].mxu1 }
 0x689   : > { %v6394_v61 = vpop.f32.mrb[113].mxu1 }
 0x68a   : > { %v6395_v33 = vadd.f32 %v6394_v61, %v6393_v47  ;;  %v6396_v54 = vpop.f32.mrb[114].mxu1 }
 0x68b   : > { %v6433_v13 = vpop.f32.mrb[120].mxu0  ;;  %v6397_v1 = vpop.f32.mrb[115].mxu1 }
 0x68c   : > { %v5428_v17 = vadd.f32 %v6395_v33, %v5947_v35  ;;  %v6398_v51 = vadd.f32 %v6397_v1, %v6396_v54  ;;  %v6434_v56 = vpop.f32.mrb[121].mxu0 }
 0x68d   : > { %v6435_v18 = vadd.f32 %v6434_v56, %v6433_v13  ;;  %v6436_v14 = vpop.f32.mrb[122].mxu0 }
 0x68e   : > { %v5431_v32 = vadd.f32 %v6398_v51, %v5947_v35  ;;  %v6437_v37 = vpop.f32.mrb[123].mxu0 }
 0x68f   : > { %v5493_v19 = vadd.f32 %v6435_v18, %v5428_v17  ;;  %v6438_v60 = vadd.f32 %v6437_v37, %v6436_v14 }
 0x690   : > { %v6399_v62 = vpop.f32.mrb[116].mxu1 }
 0x691   : > { %v5496_v30 = vadd.f32 %v6438_v60, %v5431_v32  ;;  %v6400_v7 = vpop.f32.mrb[117].mxu1 }
 0x692   : > { %v6401_v36 = vadd.f32 %v6400_v7, %v6399_v62  ;;  %v6402_v4 = vpop.f32.mrb[118].mxu1 }
 0x693   : > { %v6403_v16 = vpop.f32.mrb[119].mxu1 }
 0x694   : > { %v6439_v40 = vpop.f32.mrb[124].mxu0  ;;  %v5436_v25 = vadd.f32 %v6401_v36, %v5947_v35  ;;  %v6404_v3 = vadd.f32 %v6403_v16, %v6402_v4 }
 0x695   : > { %v6440_v34 = vpop.f32.mrb[125].mxu0 }
 0x696   : > { %v6441_v63 = vadd.f32 %v6440_v34, %v6439_v40  ;;  %v6442_v27 = vpop.f32.mrb[126].mxu0  ;;  %v5439_v8 = vadd.f32 %v6404_v3, %v5947_v35 }
 0x697   : > { %v6443_v44 = vpop.f32.mrb[127].mxu0 }
 0x698   : > { %v5501_v9 = vadd.f32 %v6441_v63, %v5436_v25  ;;  %v6444_v12 = vadd.f32 %v6443_v44, %v6442_v27  ;;  %v6405_v41 = vpop.f32.mrb[120].mxu1 }
 0x699   : > { %v6406_v43 = vpop.f32.mrb[121].mxu1 }
 0x69a   : > { %v5504_v46 = vadd.f32 %v6444_v12, %v5439_v8  ;;  %v6407_v2 = vadd.f32 %v6406_v43, %v6405_v41  ;;  %v6408_v10 = vpop.f32.mrb[122].mxu1 }
 0x69b   : > { %v6409_v26 = vpop.f32.mrb[123].mxu1 }
 0x69c   : > { %v6445_v49 = vpop.f32.mrb[128].mxu0  ;;  %v5444_v48 = vadd.f32 %v6407_v2, %v5947_v35  ;;  %v6410_v39 = vadd.f32 %v6409_v26, %v6408_v10 }
 0x69d   : > { %v6446_v52 = vpop.f32.mrb[129].mxu0 }
 0x69e   : > { %v6447_v45 = vadd.f32 %v6446_v52, %v6445_v49  ;;  %v6448_v22 = vpop.f32.mrb[130].mxu0  ;;  %v5447_v59 = vadd.f32 %v6410_v39, %v5947_v35 }
 0x69f   : > { %v6449_v24 = vpop.f32.mrb[131].mxu0 }
 0x6a0   : > { %v5509_v0 = vadd.f32 %v6447_v45, %v5444_v48  ;;  %v6450_v23 = vadd.f32 %v6449_v24, %v6448_v22  ;;  %v6411_v31 = vpop.f32.mrb[124].mxu1 }
 0x6a1   : > { %v6412_v20 = vpop.f32.mrb[125].mxu1 }
 0x6a2   : > { %v5512_v58 = vadd.f32 %v6450_v23, %v5447_v59  ;;  %v6413_v29 = vadd.f32 %v6412_v20, %v6411_v31  ;;  %v6414_v38 = vpop.f32.mrb[126].mxu1 }
 0x6a3   : > { %v6415_v21 = vpop.f32.mrb[127].mxu1 }
 0x6a4   : > { %v6451_v28 = vpop.f32.mrb[132].mxu0  ;;  %v5452_v57 = vadd.f32 %v6413_v29, %v5947_v35  ;;  %v6416_v5 = vadd.f32 %v6415_v21, %v6414_v38 }
 0x6a5   : > { %v6452_v55 = vpop.f32.mrb[133].mxu0 }
 0x6a6   : > { %v6453_v15 = vadd.f32 %v6452_v55, %v6451_v28  ;;  %v6454_v42 = vpop.f32.mrb[134].mxu0  ;;  %v5455_v53 = vadd.f32 %v6416_v5, %v5947_v35 }
 0x6a7   : > { %v6455_v50 = vpop.f32.mrb[135].mxu0 }
 0x6a8   : > { %v5517_v6 = vadd.f32 %v6453_v15, %v5452_v57  ;;  %v6456_v11 = vadd.f32 %v6455_v50, %v6454_v42 }
 0x6a9   : > { %v6473_v47 = vpop.f32.mrb[128].mxu1 }
 0x6aa   : > { %v5520_v61 = vadd.f32 %v6456_v11, %v5455_v53  ;;  %v6474_v33 = vpop.f32.mrb[129].mxu1 }
 0x6ab   : > { %v6475_v54 = vadd.f32 %v6474_v33, %v6473_v47  ;;  %v6476_v13 = vpop.f32.mrb[130].mxu1 }
 0x6ac   : > { %v6513_v1 = vpop.f32.mrb[136].mxu0  ;;  %v6477_v17 = vpop.f32.mrb[131].mxu1 }
 0x6ad   : > { %v5558_v51 = vadd.f32 %v6475_v54, %v5493_v19  ;;  %v6478_v56 = vadd.f32 %v6477_v17, %v6476_v13  ;;  %v6514_v18 = vpop.f32.mrb[137].mxu0 }
 0x6ae   : > { %v6515_v14 = vadd.f32 %v6514_v18, %v6513_v1  ;;  %v6516_v32 = vpop.f32.mrb[138].mxu0 }
 0x6af   : > { %v5561_v37 = vadd.f32 %v6478_v56, %v5496_v30  ;;  %v6517_v60 = vpop.f32.mrb[139].mxu0 }
 0x6b0   : > { %v6518_v62 = vadd.f32 %v6517_v60, %v6516_v32  ;;  %v5623_v7 = vadd.f32 %v6515_v14, %v5558_v51 }
 0x6b1   : > { %v6479_v35 = vpop.f32.mrb[132].mxu1 }
 0x6b2   : > { %v6480_v36 = vpop.f32.mrb[133].mxu1  ;;  %v5626_v4 = vadd.f32 %v6518_v62, %v5561_v37 }
 0x6b3   : > { %v6481_v40 = vadd.f32 %v6480_v36, %v6479_v35  ;;  %v6482_v16 = vpop.f32.mrb[134].mxu1 }
 0x6b4   : > { %v6519_v25 = vpop.f32.mrb[140].mxu0  ;;  %v6483_v3 = vpop.f32.mrb[135].mxu1 }
 0x6b5   : > { %v5566_v34 = vadd.f32 %v6481_v40, %v5501_v9  ;;  %v6484_v63 = vadd.f32 %v6483_v3, %v6482_v16  ;;  %v6520_v27 = vpop.f32.mrb[141].mxu0 }
 0x6b6   : > { %v6521_v8 = vadd.f32 %v6520_v27, %v6519_v25  ;;  %v6522_v19 = vpop.f32.mrb[142].mxu0 }
 0x6b7   : > { %v5569_v44 = vadd.f32 %v6484_v63, %v5504_v46  ;;  %v6523_v12 = vpop.f32.mrb[143].mxu0 }
 0x6b8   : > { %v6524_v41 = vadd.f32 %v6523_v12, %v6522_v19  ;;  %v5631_v43 = vadd.f32 %v6521_v8, %v5566_v34 }
 0x6b9   : > { %v6485_v30 = vpop.f32.mrb[136].mxu1 }
 0x6ba   : > { %v6486_v2 = vpop.f32.mrb[137].mxu1  ;;  %v5634_v10 = vadd.f32 %v6524_v41, %v5569_v44 }
 0x6bb   : > { %v6487_v49 = vadd.f32 %v6486_v2, %v6485_v30  ;;  %v6488_v26 = vpop.f32.mrb[138].mxu1 }
 0x6bc   : > { %v6525_v48 = vpop.f32.mrb[144].mxu0  ;;  %v6489_v39 = vpop.f32.mrb[139].mxu1 }
 0x6bd   : > { %v5574_v52 = vadd.f32 %v6487_v49, %v5509_v0  ;;  %v6490_v45 = vadd.f32 %v6489_v39, %v6488_v26  ;;  %v6526_v22 = vpop.f32.mrb[145].mxu0 }
 0x6be   : > { %v6527_v59 = vadd.f32 %v6526_v22, %v6525_v48  ;;  %v6528_v9 = vpop.f32.mrb[146].mxu0 }
 0x6bf   : > { %v5577_v24 = vadd.f32 %v6490_v45, %v5512_v58  ;;  %v6529_v23 = vpop.f32.mrb[147].mxu0 }
 0x6c0   : > { %v6530_v31 = vadd.f32 %v6529_v23, %v6528_v9  ;;  %v5639_v20 = vadd.f32 %v6527_v59, %v5574_v52 }
 0x6c1   : > { %v6491_v46 = vpop.f32.mrb[140].mxu1 }
 0x6c2   : > { %v6492_v29 = vpop.f32.mrb[141].mxu1  ;;  %v5642_v38 = vadd.f32 %v6530_v31, %v5577_v24 }
 0x6c3   : > { %v6493_v28 = vadd.f32 %v6492_v29, %v6491_v46  ;;  %v6494_v21 = vpop.f32.mrb[142].mxu1 }
 0x6c4   : > { %v6531_v57 = vpop.f32.mrb[148].mxu0  ;;  %v6495_v5 = vpop.f32.mrb[143].mxu1 }
 0x6c5   : > { %v5582_v55 = vadd.f32 %v6493_v28, %v5517_v6  ;;  %v6496_v15 = vadd.f32 %v6495_v5, %v6494_v21  ;;  %v6532_v42 = vpop.f32.mrb[149].mxu0 }
 0x6c6   : > { %v6533_v53 = vadd.f32 %v6532_v42, %v6531_v57  ;;  %v6534_v0 = vpop.f32.mrb[150].mxu0 }
 0x6c7   : > { %v5585_v50 = vadd.f32 %v6496_v15, %v5520_v61  ;;  %v6535_v11 = vpop.f32.mrb[151].mxu0 }
 0x6c8   : > { %v6536_v47 = vadd.f32 %v6535_v11, %v6534_v0  ;;  %v5647_v33 = vadd.f32 %v6533_v53, %v5582_v55 }
 0x6c9   : > { %v6665_v58 = vpop.f32.mrb[144].mxu1 }
 0x6ca   : > { %v5696_v54 = vadd.f32 %v6665_v58, %v5631_v43  ;;  %v5687_v13 = vpop.f32.mrb[145].mxu1  ;;  %v5650_v1 = vadd.f32 %v6536_v47, %v5585_v50 }
 0x6cb   : > { %v5688_v17 = vadd.f32 %v5687_v13, %v5623_v7  ;;  %v6666_v51 = vpop.f32.mrb[146].mxu1 }
 0x6cc   : > { %v5699_v56 = vadd.f32 %v6666_v51, %v5634_v10  ;;  %v5690_v18 = vpop.f32.mrb[147].mxu1  ;;  %v5720_v6 = vmax.f32 %v5696_v54, 0.0 }
 0x6cd   : > { %v5691_v14 = vadd.f32 %v5690_v18, %v5626_v4  ;;  %v5718_v32 = vmax.f32 %v5688_v17, 0.0 }
 0x6ce   : > { %v5721_v61 = vmax.f32 %v5699_v56, 0.0 }
 0x6cf   : > { %v5719_v37 = vmax.f32 %v5691_v14, 0.0 }
 0x6d1   : > { %v5726_v60 = vadd.f32 %v5719_v37, %v5718_v32  ;;  %v6669_v62 = vpop.f32.mrb[148].mxu1 }
 0x6d2   : > { %v5712_v35 = vadd.f32 %v6669_v62, %v5647_v33  ;;  %v5703_v36 = vpop.f32.mrb[149].mxu1 }
 0x6d3   : > { %v5727_v40 = vadd.f32 %v5726_v60, %v5720_v6  ;;  %v5704_v16 = vadd.f32 %v5703_v36, %v5639_v20  ;;  %v6670_v25 = vpop.f32.mrb[150].mxu1 }
 0x6d4   : > { %v5715_v3 = vadd.f32 %v6670_v25, %v5650_v1  ;;  %v5706_v34 = vpop.f32.mrb[151].mxu1  ;;  %v5724_v19 = vmax.f32 %v5712_v35, 0.0 }
 0x6d5   : > { %v5722_v63 = vmax.f32 %v5704_v16, 0.0  ;;  %v5728_v7 = vadd.f32 %v5727_v40, %v5721_v61  ;;  %v5707_v27 = vadd.f32 %v5706_v34, %v5642_v38 }
 0x6d6   : > { %v5725_v12 = vmax.f32 %v5715_v3, 0.0 }
 0x6d7   : > { %v5729_v8 = vadd.f32 %v5728_v7, %v5722_v63  ;;  %v5723_v4 = vmax.f32 %v5707_v27, 0.0 }
 0x6d9   : > { %v5730_v44 = vadd.f32 %v5729_v8, %v5723_v4 }
 0x6db   : > { %v5731_v41 = vadd.f32 %v5730_v44, %v5724_v19 }
 0x6dd   : > { %v5732_v43 = vadd.f32 %v5731_v41, %v5725_v12 }
 0x6df   : > { %v5733_v30 = vrot.slane %v5732_v43, 4 }
 0x6e1   : > { %v5734_v2 = vadd.f32 %v5733_v30, %v5732_v43 }
 0x6e3   : > { %v5735_v10 = vrot.slane %v5734_v2, 2 }
 0x6e5   : > { %v5736_v49 = vadd.f32 %v5735_v10, %v5734_v2 }
 0x6e7   : > { %v5737_v26 = vrot.slane %v5736_v49, 1 }
 0x6e9   : > { %v5738_v48 = vadd.f32 %v5737_v26, %v5736_v49 }
 0x6eb   : > { %v5740_v39 = vmul.f32 0.015625, %v5738_v48 }
 0x6ed   : > { %5741 = vst [vmem:[%s324_s26] sm:$0x1] %v5740_v39 }
 0x6ee   : > { %6883 = shalt.err (!%p6880_p3)
}
 0x6ef   : > { %s6884_s14 = scalar_lea.hbm %s9077_s29, 16  ;;  %s6888_s26 = scalar_lea.hbm %s9128_s9, 32 }
 0x6f0   : > { %p6885_p4 = scmp.ne.s32.totalorder %s9077_s29, %s6884_s14  ;;  %p6889_p9 = scmp.lt.u32.totalorder %s9077_s29, %s9128_s9 }
 0x6f1   : > { %p6890_p10 = scmp.lt.u32.totalorder %s6888_s26, %s6884_s14  ;;  %p6892_p12 = scmp.lt.u32.totalorder %s6884_s14, %s9077_s29 }
 0x6f2   : > { %p6886_p7 = pnand %p6885_p4, %p7032_p5 }
 0x6f3   : > { %p6891_p11 = por %p6890_p10, %p6889_p9 }
 0x6f4   : > { %p6887_p8 = pneg %p6886_p7 }
 0x6f5   : > { %p6893_p13 = por %p6892_p12, %p6891_p11 }
 0x6f7   : > { %p6894_p0 = pnand %p6893_p13, %p6887_p8 }
 0x6f9   : > { %6897 = shalt.err (!%p6894_p0)
}
 0x6fa   : > { %6672 = dma.vmem_to_hbm [thread:$0]  (%p7032_p5), %s9079_s27, 16, %s9077_s29, %s5743_s16  }
 0x6fb PF: > { %p6678_p1 = scmp.ge.s32.totalorder %s6932_s12, 2  ;;  %s5767_s17 = sand.u32 1, %s6920_s30  }
 0x6fc   : > { %s5768_s13 = scalar_lea.sflag [#allocation12], %s5767_s17 }
 0x6fd   : > { %p6675_p2 = pnand %p6678_p1, %p7036_p6 }
 0x6ff   : > { %6915 = dma.done.wait (!%p6675_p2), %s5768_s13, 16  }
 0x700   : > { %6917 = vsyncadd (!%p6675_p2), %s5768_s13, 4294967280  ;;  %p19_p3 = scmp.ge.s32.totalorder %s7019_s15, 4   ;;  %s9137_s30 = smov %s6924_s10 }
 0x701   : > { %s9138_s10 = smov %s6928_s11  ;;  %s9139_s11 = smov %s7030_s18 }
 0x702   : > { %s9140_s12 = smov %s7019_s15  ;;  %21 = sbr.rel (!%p19_p3) target bundleno = 3 (0x3), region = 134 }
 0x709   :  { %5772 = vsyncpa [#allocation12], 1 }
 0x70a   :  { %5774 = vsyncpa [#allocation12 + $0x1], 1 }

</bundles_post_ra>
